<compile_context>
chip_gen: v6e
topology: v6e:2x2x1
jax: 0.10.0
libtpu: 0.0.40
codegen_flags: <defaults>
</compile_context>

<pallas_src>
import functools

import numpy as np
import jax
import jax.numpy as jnp
from jax import lax
from jax.experimental import pallas as pl
from jax.experimental.pallas import tpu as pltpu

# dot_general dimension numbers: contract the LAST dim of both operands (A @ B^T).
_NT = (((1,), (1,)), ((), ()))


# ----------------------------- in-kernel helpers ------------------------------

def _dw_conv3x3_flat(x, w9, H, W):
    """Depthwise 3x3 (stride 1, zero pad 1) on a channels-major tile.

    x:  (C, H*W) activation, spatial flattened row-major onto lanes.
    w9: (C, 9)   per-channel taps, tap index = dy*3 + dx.
    The 9 taps are lane rolls (XLU) of the flattened image; border correctness
    (zero padding) is enforced with cheap iota-based masks, so no host-side pad
    and no padded copy is needed.
    """
    _, N = x.shape
    pos = lax.broadcasted_iota(jnp.int32, (1, N), 1)
    if (W & (W - 1)) == 0:                       # power-of-two width -> bitwise and
        col = jnp.bitwise_and(pos, W - 1)
    else:
        col = lax.rem(pos, W)

    acc = x * w9[:, 4:5]                         # centre tap (dy=1, dx=1)
    for dy in (0, 1, 2):
        for dx in (0, 1, 2):
            if dy == 1 and dx == 1:
                continue
            oy, ox = dy - 1, dx - 1
            shift = (-(oy * W + ox)) % N         # shifted[p] = x[p + oy*W + ox]
            t = pltpu.roll(x, shift=shift, axis=1)
            conds = []
            if oy < 0:
                conds.append(pos >= W)           # source row i-1 exists
            elif oy > 0:
                conds.append(pos < (H - 1) * W)  # source row i+1 exists
            if ox < 0:
                conds.append(col >= 1)           # source col j-1 exists
            elif ox > 0:
                conds.append(col <= W - 2)       # source col j+1 exists
            ok = conds[0]
            for c in conds[1:]:
                ok = jnp.logical_and(ok, c)
            t = jnp.where(ok, t, 0.0)
            acc = acc + t * w9[:, dy * 3 + dx: dy * 3 + dx + 1]
    return acc


def _fused_decoder_kernel(
    x_ref,        # (1, Cin, NX)  f32   x, NCHW flattened
    q_ref,        # (1, Cq,  NQ)  f32   q, NCHW flattened
    m_ref,        # (NK, NX)      bf16  bilinear (align_corners) reduce operator
    kv_dw_ref,    # (Cin, 9)      f32   to_kv depthwise taps
    w_kt_ref,     # (Cin, INNER)  bf16  to_kv pointwise, K half, transposed, head-major
    w_v_ref,      # (INNER, Cin)  bf16  to_kv pointwise, V half, head-major
    k_bias_ref,   # (NK, INNER)   f32   PE contribution to K (spatial-major)
    v_bias_ref,   # (INNER, NK)   f32   PE contribution to V (channel-major)
    q_dw_ref,     # (Cq, 9)       f32   to_q depthwise taps
    w_q_ref,      # (INNER, Cq)   bf16  to_q pointwise, head-major, *scale folded in*
    q_bias_ref,   # (INNER, NQ)   f32   PE contribution to Q (scale folded in)
    out_dw_ref,   # (INNER, 9)    f32   to_out depthwise taps (head-major channel order)
    w_out_ref,    # (Cout, INNER) bf16  to_out pointwise (columns head-major)
    o_ref,        # (1, Cout, NQ) f32   output, NCHW flattened (lane dense)
    *, HX, WX, HQ, WQ, heads, dim_head):
    f32 = jnp.float32
    bf16 = jnp.bfloat16

    # ---------------- to_kv: depthwise -> bilinear reduce -> pointwise 1x1 ----------
    a = _dw_conv3x3_flat(x_ref[0], kv_dw_ref[...], HX, WX)          # (Cin, NX) f32
    red = lax.dot_general(m_ref[...], a.astype(bf16), _NT,
                          preferred_element_type=f32)               # (NK, Cin), spatial-major
    redb = red.astype(bf16)
    k_sm = jnp.dot(redb, w_kt_ref[...],
                   preferred_element_type=f32) + k_bias_ref[...]    # (NK, INNER)
    v_cm = lax.dot_general(w_v_ref[...], redb, _NT,
                           preferred_element_type=f32) + v_bias_ref[...]  # (INNER, NK)

    # ---------------- to_q: depthwise -> pointwise 1x1 (scale + PE bias folded) ------
    aq = _dw_conv3x3_flat(q_ref[0], q_dw_ref[...], HQ, WQ)          # (Cq, NQ) f32
    q_cm = jnp.dot(w_q_ref[...], aq.astype(bf16),
                   preferred_element_type=f32) + q_bias_ref[...]    # (INNER, NQ)

    # ---------------- attention (per head, everything stays channel-major) -----------
    head_outs = []
    for h in range(heads):
        lo = h * dim_head
        q_h = q_cm[lo:lo + dim_head, :]          # (d, NQ)
        k_h = k_sm[:, lo:lo + dim_head]          # (NK, d)
        v_h = v_cm[lo:lo + dim_head, :]          # (d, NK)
        # scores^T: (NK, NQ); softmax over NK (axis 0), statistics kept in f32
        s = jnp.dot(k_h.astype(bf16), q_h.astype(bf16),
                    preferred_element_type=f32)
        s = s - jnp.max(s, axis=0, keepdims=True)
        p = jnp.exp(s)
        denom = jnp.sum(p, axis=0, keepdims=True)
        p = p * pl.reciprocal(denom, approx=True)                   # EUP reciprocal
        head_outs.append(jnp.dot(v_h.astype(bf16), p.astype(bf16),
                                 preferred_element_type=f32))       # (d, NQ)
    attn = jnp.concatenate(head_outs, axis=0)                       # (INNER, NQ)

    # ---------------- to_out: depthwise -> pointwise; result is NCHW-flat ------------
    ao = _dw_conv3x3_flat(attn, out_dw_ref[...], HQ, WQ)            # (INNER, NQ)
    o_ref[0] = jnp.dot(w_out_ref[...], ao.astype(bf16),
                       preferred_element_type=f32).astype(o_ref.dtype)  # (Cout, NQ)


# ----------------------------- host-side constants ------------------------------

def make_pos_encoding(param_channels, h, w, orig_ch):
    """PositionalEncodingPermute2D(param_channels) applied to a (B, orig_ch, h, w)
    tensor, returned channel-major as a (orig_ch, h, w) constant.
    NOTE: follows the given PyTorch source (channels = ceil(param_channels / 2))."""
    channels = int(np.ceil(param_channels / 2))
    inv_freq = 1.0 / (10000.0 ** (np.arange(0, channels, 2, dtype=np.float32)
                                  / np.float32(channels)))
    pos_h = np.arange(h, dtype=np.float32)
    pos_w = np.arange(w, dtype=np.float32)
    sin_h = np.einsum('i,j->ij', pos_h, inv_freq)
    sin_w = np.einsum('i,j->ij', pos_w, inv_freq)
    emb_h = np.concatenate([np.sin(sin_h), np.cos(sin_h)], axis=-1)
    emb_w = np.concatenate([np.sin(sin_w), np.cos(sin_w)], axis=-1)
    emb = np.zeros((h, w, 2 * channels), dtype=np.float32)
    emb[:, :, :channels] = emb_h[:, None, :]
    emb[:, :, channels:2 * channels] = emb_w[None, :, :]
    pe = emb[:, :, :orig_ch].astype(np.float32)         # (h, w, orig_ch)
    return jnp.asarray(np.transpose(pe, (2, 0, 1)))     # (orig_ch, h, w)


def bilinear_resize_matrix(n_in, n_out):
    """1-D bilinear interpolation operator, align_corners=True: (n_out, n_in)."""
    m = np.zeros((n_out, n_in), dtype=np.float32)
    if n_out == 1:
        m[0, 0] = 1.0
        return m
    i = np.arange(n_out, dtype=np.float32)
    src = i * (n_in - 1) / (n_out - 1)
    i0 = np.clip(np.floor(src).astype(np.int64), 0, max(n_in - 2, 0))
    frac = (src - i0).astype(np.float32)
    m[np.arange(n_out), i0] = 1.0 - frac
    m[np.arange(n_out), np.minimum(i0 + 1, n_in - 1)] += frac
    return m


def _depthwise3x3(x_chw, w_c33):
    """Plain-JAX depthwise 3x3 (pad 1, no bias); used only for the tiny PE-bias consts."""
    c = x_chw.shape[0]
    out = lax.conv_general_dilated(
        x_chw[None], w_c33.reshape(c, 1, 3, 3),
        window_strides=(1, 1), padding=((1, 1), (1, 1)),
        dimension_numbers=("NCHW", "OIHW", "NCHW"), feature_group_count=c)
    return out[0]


# ----------------------------- parameters ------------------------------

def init_params(key, in_ch, out_ch, inner_dim):
    ks = jax.random.split(key, 6)
    dw = lambda k, c: jax.random.normal(k, (c, 3, 3), jnp.float32) / 3.0
    pw = lambda k, co, ci: jax.random.normal(k, (co, ci), jnp.float32) / np.sqrt(float(ci))
    return dict(
        kv_dw=dw(ks[0], in_ch), kv_pw=pw(ks[1], 2 * inner_dim, in_ch),
        q_dw=dw(ks[2], out_ch), q_pw=pw(ks[3], inner_dim, out_ch),
        out_dw=dw(ks[4], inner_dim), out_pw=pw(ks[5], out_ch, inner_dim),
    )


# ----------------------------- model forward ------------------------------

def linear_attention_decoder_forward(x_nchw, q_nchw, params, cfg):
    heads, dim_head = cfg["heads"], cfg["dim_head"]
    inner = heads * dim_head
    rh, rw = cfg["reduce_size"]
    scale = float(dim_head) ** (-0.5)

    B, Cin, HX, WX = x_nchw.shape
    _, Cq, HQ, WQ = q_nchw.shape
    out_ch = Cq
    NX, NQ, NK = HX * WX, HQ * WQ, rh * rw
    f32, bf16 = jnp.float32, jnp.bfloat16

    # -- fold the einops head split/merge permutation (and the softmax scale) into the
    #    weights: channel (dim_head, heads)-interleaved -> head-major.
    perm = np.asarray([di * heads + h for h in range(heads) for di in range(dim_head)])
    w_q = params["q_pw"][perm] * scale                   # (inner, Cq)
    w_k = params["kv_pw"][perm]                          # (inner, Cin)
    w_v = params["kv_pw"][inner + perm]                  # (inner, Cin)
    w_out = params["out_pw"][:, perm]                    # (out_ch, inner)
    kv_dw = params["kv_dw"].reshape(Cin, 9)
    q_dw = params["q_dw"].reshape(Cq, 9)
    out_dw = params["out_dw"][perm].reshape(inner, 9)

    # -- bilinear (align_corners=True) reduce operator on flattened spatial positions
    m = jnp.asarray(np.kron(bilinear_resize_matrix(HX, rh),
                            bilinear_resize_matrix(WX, rw)))        # (NK, NX)

    # -- positional encodings, folded into constant biases via linearity
    xpe = make_pos_encoding(2 * out_ch, HX, WX, Cin)                 # (Cin, HX, WX)
    qpe = make_pos_encoding(out_ch, HQ, WQ, Cq)                      # (Cq,  HQ, WQ)
    pe_kv_red = _depthwise3x3(xpe, params["kv_dw"]).reshape(Cin, NX) @ m.T   # (Cin, NK)
    k_bias = (w_k @ pe_kv_red).T                                     # (NK, inner)
    v_bias = w_v @ pe_kv_red                                         # (inner, NK)
    q_bias = w_q @ _depthwise3x3(qpe, params["q_dw"]).reshape(Cq, NQ)  # (inner, NQ)

    # -- activations already have the layout the kernel wants: NCHW flattened (free reshape)
    x_flat = x_nchw.reshape(B, Cin, NX)
    q_flat = q_nchw.reshape(B, Cq, NQ)

    kernel = functools.partial(_fused_decoder_kernel, HX=HX, WX=WX, HQ=HQ, WQ=WQ,
                               heads=heads, dim_head=dim_head)
    bcast = lambda i: (0, 0)

    matmul_flops = 2 * (NK * NX * Cin + 2 * NK * Cin * inner + inner * Cq * NQ
                        + 2 * heads * dim_head * NK * NQ + out_ch * inner * NQ)
    conv_flops = 2 * 9 * (Cin * NX + Cq * NQ + inner * NQ)
    cost = pl.CostEstimate(
        flops=B * (matmul_flops + conv_flops),
        transcendentals=B * heads * NK * NQ,
        bytes_accessed=4 * (x_flat.size + q_flat.size + B * out_ch * NQ) + 2 * m.size)

    out_flat = pl.pallas_call(
        kernel,
        out_shape=jax.ShapeDtypeStruct((B, out_ch, NQ), f32),
        grid=(B,),
        in_specs=[
            pl.BlockSpec((1, Cin, NX), lambda i: (i, 0, 0)),
            pl.BlockSpec((1, Cq, NQ), lambda i: (i, 0, 0)),
            pl.BlockSpec((NK, NX), bcast),
            pl.BlockSpec((Cin, 9), bcast),
            pl.BlockSpec((Cin, inner), bcast),
            pl.BlockSpec((inner, Cin), bcast),
            pl.BlockSpec((NK, inner), bcast),
            pl.BlockSpec((inner, NK), bcast),
            pl.BlockSpec((Cq, 9), bcast),
            pl.BlockSpec((inner, Cq), bcast),
            pl.BlockSpec((inner, NQ), bcast),
            pl.BlockSpec((inner, 9), bcast),
            pl.BlockSpec((out_ch, inner), bcast),
        ],
        out_specs=pl.BlockSpec((1, out_ch, NQ), lambda i: (i, 0, 0)),
        compiler_params=pltpu.CompilerParams(dimension_semantics=("parallel",)),
        cost_estimate=cost,
    )(x_flat, q_flat,
      m.astype(bf16), kv_dw, jnp.transpose(w_k).astype(bf16), w_v.astype(bf16),
      k_bias, v_bias, q_dw, w_q.astype(bf16), q_bias,
      out_dw, w_out.astype(bf16))

    return out_flat.reshape(B, out_ch, HQ, WQ)          # already NCHW: free reshape


# ----------------------------- main ------------------------------

if __name__ == "__main__":
    B = 2
    out_ch = 8
    in_ch = 2 * out_ch            # decoder: x carries 2x the channels of q
    heads = 4
    dim_head = 8                  # inner_dim = 32
    reduce_size = (8, 8)
    HX = WX = HQ = WQ = 16

    cfg = dict(heads=heads, dim_head=dim_head, reduce_size=reduce_size)

    key = jax.random.PRNGKey(0)
    kx, kq, kp = jax.random.split(key, 3)
    x = jax.random.normal(kx, (B, in_ch, HX, WX), jnp.float32)
    q = jax.random.normal(kq, (B, out_ch, HQ, WQ), jnp.float32)
    params = init_params(kp, in_ch, out_ch, heads * dim_head)

    fwd = jax.jit(lambda xx, qq: linear_attention_decoder_forward(xx, qq, params, cfg))
    out = fwd(x, q)
    jax.block_until_ready(out)

    expected = (B, out_ch, HQ, WQ)
    assert out.shape == expected, (out.shape, expected)
    assert bool(jnp.all(jnp.isfinite(out)))
    print("KERNEL_OK")
</pallas_src>

<mosaic_0001>
module attributes {stable_mosaic.version = 11 : i64} {
  func.func @_fused_decoder_kernel(%arg0: i32, %arg1: memref<1x16x256xf32, #tpu.memory_space<vmem>>, %arg2: memref<1x8x256xf32, #tpu.memory_space<vmem>>, %arg3: memref<64x256xbf16, #tpu.memory_space<vmem>>, %arg4: memref<16x9xf32, #tpu.memory_space<vmem>>, %arg5: memref<16x32xbf16, #tpu.memory_space<vmem>>, %arg6: memref<32x16xbf16, #tpu.memory_space<vmem>>, %arg7: memref<64x32xf32, #tpu.memory_space<vmem>>, %arg8: memref<32x64xf32, #tpu.memory_space<vmem>>, %arg9: memref<8x9xf32, #tpu.memory_space<vmem>>, %arg10: memref<32x8xbf16, #tpu.memory_space<vmem>>, %arg11: memref<32x256xf32, #tpu.memory_space<vmem>>, %arg12: memref<32x9xf32, #tpu.memory_space<vmem>>, %arg13: memref<8x32xbf16, #tpu.memory_space<vmem>>, %arg14: memref<1x8x256xf32, #tpu.memory_space<vmem>>) attributes {dimension_semantics = [#tpu.dimension_semantics<parallel>], iteration_bounds = array<i64: 2>, scalar_prefetch = 0 : i64, scratch_operands = 0 : i64, tpu.core_type = #tpu.core_type<tc>, window_params = [{transform_indices = @transform_0, window_bounds = array<i64: 1, 16, 256>}, {transform_indices = @transform_1, window_bounds = array<i64: 1, 8, 256>}, {pipeline_mode = #tpu.pipeline_mode<synchronous>, transform_indices = @transform_2, window_bounds = array<i64: 64, 256>}, {pipeline_mode = #tpu.pipeline_mode<synchronous>, transform_indices = @transform_3, window_bounds = array<i64: 16, 9>}, {pipeline_mode = #tpu.pipeline_mode<synchronous>, transform_indices = @transform_4, window_bounds = array<i64: 16, 32>}, {pipeline_mode = #tpu.pipeline_mode<synchronous>, transform_indices = @transform_5, window_bounds = array<i64: 32, 16>}, {pipeline_mode = #tpu.pipeline_mode<synchronous>, transform_indices = @transform_6, window_bounds = array<i64: 64, 32>}, {pipeline_mode = #tpu.pipeline_mode<synchronous>, transform_indices = @transform_7, window_bounds = array<i64: 32, 64>}, {pipeline_mode = #tpu.pipeline_mode<synchronous>, transform_indices = @transform_8, window_bounds = array<i64: 8, 9>}, {pipeline_mode = #tpu.pipeline_mode<synchronous>, transform_indices = @transform_9, window_bounds = array<i64: 32, 8>}, {pipeline_mode = #tpu.pipeline_mode<synchronous>, transform_indices = @transform_10, window_bounds = array<i64: 32, 256>}, {pipeline_mode = #tpu.pipeline_mode<synchronous>, transform_indices = @transform_11, window_bounds = array<i64: 32, 9>}, {pipeline_mode = #tpu.pipeline_mode<synchronous>, transform_indices = @transform_12, window_bounds = array<i64: 8, 32>}, {transform_indices = @transform_13, window_bounds = array<i64: 1, 8, 256>}]} {
    %c0 = arith.constant 0 : index
    %c0_0 = arith.constant 0 : index
    %c0_1 = arith.constant 0 : index
    %0 = vector.load %arg1[%c0, %c0_0, %c0_1] : memref<1x16x256xf32, #tpu.memory_space<vmem>>, vector<1x16x256xf32>
    %1 = vector.shape_cast %0 : vector<1x16x256xf32> to vector<16x256xf32>
    %c0_2 = arith.constant 0 : index
    %c0_3 = arith.constant 0 : index
    %2 = vector.load %arg4[%c0_2, %c0_3] : memref<16x9xf32, #tpu.memory_space<vmem>>, vector<16x9xf32>
    %3 = tpu.iota {dimensions = array<i32: 1>} : vector<1x256xi32>
    %c15_i32 = arith.constant 15 : i32
    %4 = vector.broadcast %c15_i32 : i32 to vector<1x256xi32>
    %5 = arith.andi %3, %4 : vector<1x256xi32>
    %6 = vector.extract_strided_slice %2 {offsets = [0, 4], sizes = [16, 1], strides = [1, 1]} : vector<16x9xf32> to vector<16x1xf32>
    %7 = vector.broadcast %6 : vector<16x1xf32> to vector<16x256xf32>
    %8 = arith.mulf %1, %7 : vector<16x256xf32>
    %c17_i32 = arith.constant 17 : i32
    %9 = tpu.dynamic_rotate %1 by %c17_i32 dim 1 : vector<16x256xf32>, i32 -> vector<16x256xf32>
    %c16_i32 = arith.constant 16 : i32
    %10 = vector.broadcast %c16_i32 : i32 to vector<1x256xi32>
    %11 = arith.cmpi sge, %3, %10 : vector<1x256xi32>
    %c1_i32 = arith.constant 1 : i32
    %12 = vector.broadcast %c1_i32 : i32 to vector<1x256xi32>
    %13 = arith.cmpi sge, %5, %12 : vector<1x256xi32>
    %14 = arith.andi %11, %13 : vector<1x256xi1>
    %cst = arith.constant 0.000000e+00 : f32
    %15 = vector.shape_cast %14 : vector<1x256xi1> to vector<1x256xi1>
    %16 = vector.broadcast %15 : vector<1x256xi1> to vector<16x256xi1>
    %17 = vector.broadcast %cst : f32 to vector<16x256xf32>
    %18 = arith.select %16, %9, %17 : vector<16x256xi1>, vector<16x256xf32>
    %19 = vector.extract_strided_slice %2 {offsets = [0, 0], sizes = [16, 1], strides = [1, 1]} : vector<16x9xf32> to vector<16x1xf32>
    %20 = vector.broadcast %19 : vector<16x1xf32> to vector<16x256xf32>
    %21 = arith.mulf %18, %20 : vector<16x256xf32>
    %22 = arith.addf %8, %21 : vector<16x256xf32>
    %c16_i32_4 = arith.constant 16 : i32
    %23 = tpu.dynamic_rotate %1 by %c16_i32_4 dim 1 : vector<16x256xf32>, i32 -> vector<16x256xf32>
    %c16_i32_5 = arith.constant 16 : i32
    %24 = vector.broadcast %c16_i32_5 : i32 to vector<1x256xi32>
    %25 = arith.cmpi sge, %3, %24 : vector<1x256xi32>
    %cst_6 = arith.constant 0.000000e+00 : f32
    %26 = vector.shape_cast %25 : vector<1x256xi1> to vector<1x256xi1>
    %27 = vector.broadcast %26 : vector<1x256xi1> to vector<16x256xi1>
    %28 = vector.broadcast %cst_6 : f32 to vector<16x256xf32>
    %29 = arith.select %27, %23, %28 : vector<16x256xi1>, vector<16x256xf32>
    %30 = vector.extract_strided_slice %2 {offsets = [0, 1], sizes = [16, 1], strides = [1, 1]} : vector<16x9xf32> to vector<16x1xf32>
    %31 = vector.broadcast %30 : vector<16x1xf32> to vector<16x256xf32>
    %32 = arith.mulf %29, %31 : vector<16x256xf32>
    %33 = arith.addf %22, %32 : vector<16x256xf32>
    %c15_i32_7 = arith.constant 15 : i32
    %34 = tpu.dynamic_rotate %1 by %c15_i32_7 dim 1 : vector<16x256xf32>, i32 -> vector<16x256xf32>
    %c16_i32_8 = arith.constant 16 : i32
    %35 = vector.broadcast %c16_i32_8 : i32 to vector<1x256xi32>
    %36 = arith.cmpi sge, %3, %35 : vector<1x256xi32>
    %c14_i32 = arith.constant 14 : i32
    %37 = vector.broadcast %c14_i32 : i32 to vector<1x256xi32>
    %38 = arith.cmpi sle, %5, %37 : vector<1x256xi32>
    %39 = arith.andi %36, %38 : vector<1x256xi1>
    %cst_9 = arith.constant 0.000000e+00 : f32
    %40 = vector.shape_cast %39 : vector<1x256xi1> to vector<1x256xi1>
    %41 = vector.broadcast %40 : vector<1x256xi1> to vector<16x256xi1>
    %42 = vector.broadcast %cst_9 : f32 to vector<16x256xf32>
    %43 = arith.select %41, %34, %42 : vector<16x256xi1>, vector<16x256xf32>
    %44 = vector.extract_strided_slice %2 {offsets = [0, 2], sizes = [16, 1], strides = [1, 1]} : vector<16x9xf32> to vector<16x1xf32>
    %45 = vector.broadcast %44 : vector<16x1xf32> to vector<16x256xf32>
    %46 = arith.mulf %43, %45 : vector<16x256xf32>
    %47 = arith.addf %33, %46 : vector<16x256xf32>
    %c1_i32_10 = arith.constant 1 : i32
    %48 = tpu.dynamic_rotate %1 by %c1_i32_10 dim 1 : vector<16x256xf32>, i32 -> vector<16x256xf32>
    %c1_i32_11 = arith.constant 1 : i32
    %49 = vector.broadcast %c1_i32_11 : i32 to vector<1x256xi32>
    %50 = arith.cmpi sge, %5, %49 : vector<1x256xi32>
    %cst_12 = arith.constant 0.000000e+00 : f32
    %51 = vector.shape_cast %50 : vector<1x256xi1> to vector<1x256xi1>
    %52 = vector.broadcast %51 : vector<1x256xi1> to vector<16x256xi1>
    %53 = vector.broadcast %cst_12 : f32 to vector<16x256xf32>
    %54 = arith.select %52, %48, %53 : vector<16x256xi1>, vector<16x256xf32>
    %55 = vector.extract_strided_slice %2 {offsets = [0, 3], sizes = [16, 1], strides = [1, 1]} : vector<16x9xf32> to vector<16x1xf32>
    %56 = vector.broadcast %55 : vector<16x1xf32> to vector<16x256xf32>
    %57 = arith.mulf %54, %56 : vector<16x256xf32>
    %58 = arith.addf %47, %57 : vector<16x256xf32>
    %c255_i32 = arith.constant 255 : i32
    %59 = tpu.dynamic_rotate %1 by %c255_i32 dim 1 : vector<16x256xf32>, i32 -> vector<16x256xf32>
    %c14_i32_13 = arith.constant 14 : i32
    %60 = vector.broadcast %c14_i32_13 : i32 to vector<1x256xi32>
    %61 = arith.cmpi sle, %5, %60 : vector<1x256xi32>
    %cst_14 = arith.constant 0.000000e+00 : f32
    %62 = vector.shape_cast %61 : vector<1x256xi1> to vector<1x256xi1>
    %63 = vector.broadcast %62 : vector<1x256xi1> to vector<16x256xi1>
    %64 = vector.broadcast %cst_14 : f32 to vector<16x256xf32>
    %65 = arith.select %63, %59, %64 : vector<16x256xi1>, vector<16x256xf32>
    %66 = vector.extract_strided_slice %2 {offsets = [0, 5], sizes = [16, 1], strides = [1, 1]} : vector<16x9xf32> to vector<16x1xf32>
    %67 = vector.broadcast %66 : vector<16x1xf32> to vector<16x256xf32>
    %68 = arith.mulf %65, %67 : vector<16x256xf32>
    %69 = arith.addf %58, %68 : vector<16x256xf32>
    %c241_i32 = arith.constant 241 : i32
    %70 = tpu.dynamic_rotate %1 by %c241_i32 dim 1 : vector<16x256xf32>, i32 -> vector<16x256xf32>
    %c240_i32 = arith.constant 240 : i32
    %71 = vector.broadcast %c240_i32 : i32 to vector<1x256xi32>
    %72 = arith.cmpi slt, %3, %71 : vector<1x256xi32>
    %c1_i32_15 = arith.constant 1 : i32
    %73 = vector.broadcast %c1_i32_15 : i32 to vector<1x256xi32>
    %74 = arith.cmpi sge, %5, %73 : vector<1x256xi32>
    %75 = arith.andi %72, %74 : vector<1x256xi1>
    %cst_16 = arith.constant 0.000000e+00 : f32
    %76 = vector.shape_cast %75 : vector<1x256xi1> to vector<1x256xi1>
    %77 = vector.broadcast %76 : vector<1x256xi1> to vector<16x256xi1>
    %78 = vector.broadcast %cst_16 : f32 to vector<16x256xf32>
    %79 = arith.select %77, %70, %78 : vector<16x256xi1>, vector<16x256xf32>
    %80 = vector.extract_strided_slice %2 {offsets = [0, 6], sizes = [16, 1], strides = [1, 1]} : vector<16x9xf32> to vector<16x1xf32>
    %81 = vector.broadcast %80 : vector<16x1xf32> to vector<16x256xf32>
    %82 = arith.mulf %79, %81 : vector<16x256xf32>
    %83 = arith.addf %69, %82 : vector<16x256xf32>
    %c240_i32_17 = arith.constant 240 : i32
    %84 = tpu.dynamic_rotate %1 by %c240_i32_17 dim 1 : vector<16x256xf32>, i32 -> vector<16x256xf32>
    %c240_i32_18 = arith.constant 240 : i32
    %85 = vector.broadcast %c240_i32_18 : i32 to vector<1x256xi32>
    %86 = arith.cmpi slt, %3, %85 : vector<1x256xi32>
    %cst_19 = arith.constant 0.000000e+00 : f32
    %87 = vector.shape_cast %86 : vector<1x256xi1> to vector<1x256xi1>
    %88 = vector.broadcast %87 : vector<1x256xi1> to vector<16x256xi1>
    %89 = vector.broadcast %cst_19 : f32 to vector<16x256xf32>
    %90 = arith.select %88, %84, %89 : vector<16x256xi1>, vector<16x256xf32>
    %91 = vector.extract_strided_slice %2 {offsets = [0, 7], sizes = [16, 1], strides = [1, 1]} : vector<16x9xf32> to vector<16x1xf32>
    %92 = vector.broadcast %91 : vector<16x1xf32> to vector<16x256xf32>
    %93 = arith.mulf %90, %92 : vector<16x256xf32>
    %94 = arith.addf %83, %93 : vector<16x256xf32>
    %c239_i32 = arith.constant 239 : i32
    %95 = tpu.dynamic_rotate %1 by %c239_i32 dim 1 : vector<16x256xf32>, i32 -> vector<16x256xf32>
    %c240_i32_20 = arith.constant 240 : i32
    %96 = vector.broadcast %c240_i32_20 : i32 to vector<1x256xi32>
    %97 = arith.cmpi slt, %3, %96 : vector<1x256xi32>
    %c14_i32_21 = arith.constant 14 : i32
    %98 = vector.broadcast %c14_i32_21 : i32 to vector<1x256xi32>
    %99 = arith.cmpi sle, %5, %98 : vector<1x256xi32>
    %100 = arith.andi %97, %99 : vector<1x256xi1>
    %cst_22 = arith.constant 0.000000e+00 : f32
    %101 = vector.shape_cast %100 : vector<1x256xi1> to vector<1x256xi1>
    %102 = vector.broadcast %101 : vector<1x256xi1> to vector<16x256xi1>
    %103 = vector.broadcast %cst_22 : f32 to vector<16x256xf32>
    %104 = arith.select %102, %95, %103 : vector<16x256xi1>, vector<16x256xf32>
    %105 = vector.extract_strided_slice %2 {offsets = [0, 8], sizes = [16, 1], strides = [1, 1]} : vector<16x9xf32> to vector<16x1xf32>
    %106 = vector.broadcast %105 : vector<16x1xf32> to vector<16x256xf32>
    %107 = arith.mulf %104, %106 : vector<16x256xf32>
    %108 = arith.addf %94, %107 : vector<16x256xf32>
    %c0_23 = arith.constant 0 : index
    %c0_24 = arith.constant 0 : index
    %109 = vector.load %arg3[%c0_23, %c0_24] : memref<64x256xbf16, #tpu.memory_space<vmem>>, vector<64x256xbf16>
    %110 = arith.truncf %108 : vector<16x256xf32> to vector<16x256xbf16>
    %cst_25 = arith.constant dense<0.000000e+00> : vector<64x16xf32>
    %111 = tpu.matmul %109, %110, %cst_25 {dimension_numbers = #tpu.dot_dimension_numbers<[1], [1], [0], [0], [0, 0, 1, 0], [], []>} : vector<64x256xbf16>, vector<16x256xbf16>, vector<64x16xf32> -> vector<64x16xf32>
    %112 = arith.truncf %111 : vector<64x16xf32> to vector<64x16xbf16>
    %c0_26 = arith.constant 0 : index
    %c0_27 = arith.constant 0 : index
    %113 = vector.load %arg5[%c0_26, %c0_27] : memref<16x32xbf16, #tpu.memory_space<vmem>>, vector<16x32xbf16>
    %cst_28 = arith.constant dense<0.000000e+00> : vector<64x32xf32>
    %114 = tpu.matmul %112, %113, %cst_28 {dimension_numbers = #tpu.dot_dimension_numbers<[1], [0], [0], [1], [0, 0, 1, 1], [], []>} : vector<64x16xbf16>, vector<16x32xbf16>, vector<64x32xf32> -> vector<64x32xf32>
    %c0_29 = arith.constant 0 : index
    %c0_30 = arith.constant 0 : index
    %115 = vector.load %arg7[%c0_29, %c0_30] : memref<64x32xf32, #tpu.memory_space<vmem>>, vector<64x32xf32>
    %116 = arith.addf %114, %115 : vector<64x32xf32>
    %c0_31 = arith.constant 0 : index
    %c0_32 = arith.constant 0 : index
    %117 = vector.load %arg6[%c0_31, %c0_32] : memref<32x16xbf16, #tpu.memory_space<vmem>>, vector<32x16xbf16>
    %cst_33 = arith.constant dense<0.000000e+00> : vector<32x64xf32>
    %118 = tpu.matmul %117, %112, %cst_33 {dimension_numbers = #tpu.dot_dimension_numbers<[1], [1], [0], [0], [0, 0, 1, 0], [], []>} : vector<32x16xbf16>, vector<64x16xbf16>, vector<32x64xf32> -> vector<32x64xf32>
    %c0_34 = arith.constant 0 : index
    %c0_35 = arith.constant 0 : index
    %119 = vector.load %arg8[%c0_34, %c0_35] : memref<32x64xf32, #tpu.memory_space<vmem>>, vector<32x64xf32>
    %120 = arith.addf %118, %119 : vector<32x64xf32>
    %c0_36 = arith.constant 0 : index
    %c0_37 = arith.constant 0 : index
    %c0_38 = arith.constant 0 : index
    %121 = vector.load %arg2[%c0_36, %c0_37, %c0_38] : memref<1x8x256xf32, #tpu.memory_space<vmem>>, vector<1x8x256xf32>
    %122 = vector.shape_cast %121 : vector<1x8x256xf32> to vector<8x256xf32>
    %c0_39 = arith.constant 0 : index
    %c0_40 = arith.constant 0 : index
    %123 = vector.load %arg9[%c0_39, %c0_40] : memref<8x9xf32, #tpu.memory_space<vmem>>, vector<8x9xf32>
    %124 = tpu.iota {dimensions = array<i32: 1>} : vector<1x256xi32>
    %c15_i32_41 = arith.constant 15 : i32
    %125 = vector.broadcast %c15_i32_41 : i32 to vector<1x256xi32>
    %126 = arith.andi %124, %125 : vector<1x256xi32>
    %127 = vector.extract_strided_slice %123 {offsets = [0, 4], sizes = [8, 1], strides = [1, 1]} : vector<8x9xf32> to vector<8x1xf32>
    %128 = vector.broadcast %127 : vector<8x1xf32> to vector<8x256xf32>
    %129 = arith.mulf %122, %128 : vector<8x256xf32>
    %c17_i32_42 = arith.constant 17 : i32
    %130 = tpu.dynamic_rotate %122 by %c17_i32_42 dim 1 : vector<8x256xf32>, i32 -> vector<8x256xf32>
    %c16_i32_43 = arith.constant 16 : i32
    %131 = vector.broadcast %c16_i32_43 : i32 to vector<1x256xi32>
    %132 = arith.cmpi sge, %124, %131 : vector<1x256xi32>
    %c1_i32_44 = arith.constant 1 : i32
    %133 = vector.broadcast %c1_i32_44 : i32 to vector<1x256xi32>
    %134 = arith.cmpi sge, %126, %133 : vector<1x256xi32>
    %135 = arith.andi %132, %134 : vector<1x256xi1>
    %cst_45 = arith.constant 0.000000e+00 : f32
    %136 = vector.shape_cast %135 : vector<1x256xi1> to vector<1x256xi1>
    %137 = vector.broadcast %136 : vector<1x256xi1> to vector<8x256xi1>
    %138 = vector.broadcast %cst_45 : f32 to vector<8x256xf32>
    %139 = arith.select %137, %130, %138 : vector<8x256xi1>, vector<8x256xf32>
    %140 = vector.extract_strided_slice %123 {offsets = [0, 0], sizes = [8, 1], strides = [1, 1]} : vector<8x9xf32> to vector<8x1xf32>
    %141 = vector.broadcast %140 : vector<8x1xf32> to vector<8x256xf32>
    %142 = arith.mulf %139, %141 : vector<8x256xf32>
    %143 = arith.addf %129, %142 : vector<8x256xf32>
    %c16_i32_46 = arith.constant 16 : i32
    %144 = tpu.dynamic_rotate %122 by %c16_i32_46 dim 1 : vector<8x256xf32>, i32 -> vector<8x256xf32>
    %c16_i32_47 = arith.constant 16 : i32
    %145 = vector.broadcast %c16_i32_47 : i32 to vector<1x256xi32>
    %146 = arith.cmpi sge, %124, %145 : vector<1x256xi32>
    %cst_48 = arith.constant 0.000000e+00 : f32
    %147 = vector.shape_cast %146 : vector<1x256xi1> to vector<1x256xi1>
    %148 = vector.broadcast %147 : vector<1x256xi1> to vector<8x256xi1>
    %149 = vector.broadcast %cst_48 : f32 to vector<8x256xf32>
    %150 = arith.select %148, %144, %149 : vector<8x256xi1>, vector<8x256xf32>
    %151 = vector.extract_strided_slice %123 {offsets = [0, 1], sizes = [8, 1], strides = [1, 1]} : vector<8x9xf32> to vector<8x1xf32>
    %152 = vector.broadcast %151 : vector<8x1xf32> to vector<8x256xf32>
    %153 = arith.mulf %150, %152 : vector<8x256xf32>
    %154 = arith.addf %143, %153 : vector<8x256xf32>
    %c15_i32_49 = arith.constant 15 : i32
    %155 = tpu.dynamic_rotate %122 by %c15_i32_49 dim 1 : vector<8x256xf32>, i32 -> vector<8x256xf32>
    %c16_i32_50 = arith.constant 16 : i32
    %156 = vector.broadcast %c16_i32_50 : i32 to vector<1x256xi32>
    %157 = arith.cmpi sge, %124, %156 : vector<1x256xi32>
    %c14_i32_51 = arith.constant 14 : i32
    %158 = vector.broadcast %c14_i32_51 : i32 to vector<1x256xi32>
    %159 = arith.cmpi sle, %126, %158 : vector<1x256xi32>
    %160 = arith.andi %157, %159 : vector<1x256xi1>
    %cst_52 = arith.constant 0.000000e+00 : f32
    %161 = vector.shape_cast %160 : vector<1x256xi1> to vector<1x256xi1>
    %162 = vector.broadcast %161 : vector<1x256xi1> to vector<8x256xi1>
    %163 = vector.broadcast %cst_52 : f32 to vector<8x256xf32>
    %164 = arith.select %162, %155, %163 : vector<8x256xi1>, vector<8x256xf32>
    %165 = vector.extract_strided_slice %123 {offsets = [0, 2], sizes = [8, 1], strides = [1, 1]} : vector<8x9xf32> to vector<8x1xf32>
    %166 = vector.broadcast %165 : vector<8x1xf32> to vector<8x256xf32>
    %167 = arith.mulf %164, %166 : vector<8x256xf32>
    %168 = arith.addf %154, %167 : vector<8x256xf32>
    %c1_i32_53 = arith.constant 1 : i32
    %169 = tpu.dynamic_rotate %122 by %c1_i32_53 dim 1 : vector<8x256xf32>, i32 -> vector<8x256xf32>
    %c1_i32_54 = arith.constant 1 : i32
    %170 = vector.broadcast %c1_i32_54 : i32 to vector<1x256xi32>
    %171 = arith.cmpi sge, %126, %170 : vector<1x256xi32>
    %cst_55 = arith.constant 0.000000e+00 : f32
    %172 = vector.shape_cast %171 : vector<1x256xi1> to vector<1x256xi1>
    %173 = vector.broadcast %172 : vector<1x256xi1> to vector<8x256xi1>
    %174 = vector.broadcast %cst_55 : f32 to vector<8x256xf32>
    %175 = arith.select %173, %169, %174 : vector<8x256xi1>, vector<8x256xf32>
    %176 = vector.extract_strided_slice %123 {offsets = [0, 3], sizes = [8, 1], strides = [1, 1]} : vector<8x9xf32> to vector<8x1xf32>
    %177 = vector.broadcast %176 : vector<8x1xf32> to vector<8x256xf32>
    %178 = arith.mulf %175, %177 : vector<8x256xf32>
    %179 = arith.addf %168, %178 : vector<8x256xf32>
    %c255_i32_56 = arith.constant 255 : i32
    %180 = tpu.dynamic_rotate %122 by %c255_i32_56 dim 1 : vector<8x256xf32>, i32 -> vector<8x256xf32>
    %c14_i32_57 = arith.constant 14 : i32
    %181 = vector.broadcast %c14_i32_57 : i32 to vector<1x256xi32>
    %182 = arith.cmpi sle, %126, %181 : vector<1x256xi32>
    %cst_58 = arith.constant 0.000000e+00 : f32
    %183 = vector.shape_cast %182 : vector<1x256xi1> to vector<1x256xi1>
    %184 = vector.broadcast %183 : vector<1x256xi1> to vector<8x256xi1>
    %185 = vector.broadcast %cst_58 : f32 to vector<8x256xf32>
    %186 = arith.select %184, %180, %185 : vector<8x256xi1>, vector<8x256xf32>
    %187 = vector.extract_strided_slice %123 {offsets = [0, 5], sizes = [8, 1], strides = [1, 1]} : vector<8x9xf32> to vector<8x1xf32>
    %188 = vector.broadcast %187 : vector<8x1xf32> to vector<8x256xf32>
    %189 = arith.mulf %186, %188 : vector<8x256xf32>
    %190 = arith.addf %179, %189 : vector<8x256xf32>
    %c241_i32_59 = arith.constant 241 : i32
    %191 = tpu.dynamic_rotate %122 by %c241_i32_59 dim 1 : vector<8x256xf32>, i32 -> vector<8x256xf32>
    %c240_i32_60 = arith.constant 240 : i32
    %192 = vector.broadcast %c240_i32_60 : i32 to vector<1x256xi32>
    %193 = arith.cmpi slt, %124, %192 : vector<1x256xi32>
    %c1_i32_61 = arith.constant 1 : i32
    %194 = vector.broadcast %c1_i32_61 : i32 to vector<1x256xi32>
    %195 = arith.cmpi sge, %126, %194 : vector<1x256xi32>
    %196 = arith.andi %193, %195 : vector<1x256xi1>
    %cst_62 = arith.constant 0.000000e+00 : f32
    %197 = vector.shape_cast %196 : vector<1x256xi1> to vector<1x256xi1>
    %198 = vector.broadcast %197 : vector<1x256xi1> to vector<8x256xi1>
    %199 = vector.broadcast %cst_62 : f32 to vector<8x256xf32>
    %200 = arith.select %198, %191, %199 : vector<8x256xi1>, vector<8x256xf32>
    %201 = vector.extract_strided_slice %123 {offsets = [0, 6], sizes = [8, 1], strides = [1, 1]} : vector<8x9xf32> to vector<8x1xf32>
    %202 = vector.broadcast %201 : vector<8x1xf32> to vector<8x256xf32>
    %203 = arith.mulf %200, %202 : vector<8x256xf32>
    %204 = arith.addf %190, %203 : vector<8x256xf32>
    %c240_i32_63 = arith.constant 240 : i32
    %205 = tpu.dynamic_rotate %122 by %c240_i32_63 dim 1 : vector<8x256xf32>, i32 -> vector<8x256xf32>
    %c240_i32_64 = arith.constant 240 : i32
    %206 = vector.broadcast %c240_i32_64 : i32 to vector<1x256xi32>
    %207 = arith.cmpi slt, %124, %206 : vector<1x256xi32>
    %cst_65 = arith.constant 0.000000e+00 : f32
    %208 = vector.shape_cast %207 : vector<1x256xi1> to vector<1x256xi1>
    %209 = vector.broadcast %208 : vector<1x256xi1> to vector<8x256xi1>
    %210 = vector.broadcast %cst_65 : f32 to vector<8x256xf32>
    %211 = arith.select %209, %205, %210 : vector<8x256xi1>, vector<8x256xf32>
    %212 = vector.extract_strided_slice %123 {offsets = [0, 7], sizes = [8, 1], strides = [1, 1]} : vector<8x9xf32> to vector<8x1xf32>
    %213 = vector.broadcast %212 : vector<8x1xf32> to vector<8x256xf32>
    %214 = arith.mulf %211, %213 : vector<8x256xf32>
    %215 = arith.addf %204, %214 : vector<8x256xf32>
    %c239_i32_66 = arith.constant 239 : i32
    %216 = tpu.dynamic_rotate %122 by %c239_i32_66 dim 1 : vector<8x256xf32>, i32 -> vector<8x256xf32>
    %c240_i32_67 = arith.constant 240 : i32
    %217 = vector.broadcast %c240_i32_67 : i32 to vector<1x256xi32>
    %218 = arith.cmpi slt, %124, %217 : vector<1x256xi32>
    %c14_i32_68 = arith.constant 14 : i32
    %219 = vector.broadcast %c14_i32_68 : i32 to vector<1x256xi32>
    %220 = arith.cmpi sle, %126, %219 : vector<1x256xi32>
    %221 = arith.andi %218, %220 : vector<1x256xi1>
    %cst_69 = arith.constant 0.000000e+00 : f32
    %222 = vector.shape_cast %221 : vector<1x256xi1> to vector<1x256xi1>
    %223 = vector.broadcast %222 : vector<1x256xi1> to vector<8x256xi1>
    %224 = vector.broadcast %cst_69 : f32 to vector<8x256xf32>
    %225 = arith.select %223, %216, %224 : vector<8x256xi1>, vector<8x256xf32>
    %226 = vector.extract_strided_slice %123 {offsets = [0, 8], sizes = [8, 1], strides = [1, 1]} : vector<8x9xf32> to vector<8x1xf32>
    %227 = vector.broadcast %226 : vector<8x1xf32> to vector<8x256xf32>
    %228 = arith.mulf %225, %227 : vector<8x256xf32>
    %229 = arith.addf %215, %228 : vector<8x256xf32>
    %c0_70 = arith.constant 0 : index
    %c0_71 = arith.constant 0 : index
    %230 = vector.load %arg10[%c0_70, %c0_71] : memref<32x8xbf16, #tpu.memory_space<vmem>>, vector<32x8xbf16>
    %231 = arith.truncf %229 : vector<8x256xf32> to vector<8x256xbf16>
    %cst_72 = arith.constant dense<0.000000e+00> : vector<32x256xf32>
    %232 = tpu.matmul %230, %231, %cst_72 {dimension_numbers = #tpu.dot_dimension_numbers<[1], [0], [0], [1], [0, 0, 1, 1], [], []>} : vector<32x8xbf16>, vector<8x256xbf16>, vector<32x256xf32> -> vector<32x256xf32>
    %c0_73 = arith.constant 0 : index
    %c0_74 = arith.constant 0 : index
    %233 = vector.load %arg11[%c0_73, %c0_74] : memref<32x256xf32, #tpu.memory_space<vmem>>, vector<32x256xf32>
    %234 = arith.addf %232, %233 : vector<32x256xf32>
    %235 = vector.extract_strided_slice %234 {offsets = [0, 0], sizes = [8, 256], strides = [1, 1]} : vector<32x256xf32> to vector<8x256xf32>
    %236 = vector.extract_strided_slice %116 {offsets = [0, 0], sizes = [64, 8], strides = [1, 1]} : vector<64x32xf32> to vector<64x8xf32>
    %237 = vector.extract_strided_slice %120 {offsets = [0, 0], sizes = [8, 64], strides = [1, 1]} : vector<32x64xf32> to vector<8x64xf32>
    %238 = arith.truncf %236 : vector<64x8xf32> to vector<64x8xbf16>
    %239 = arith.truncf %235 : vector<8x256xf32> to vector<8x256xbf16>
    %cst_75 = arith.constant dense<0.000000e+00> : vector<64x256xf32>
    %240 = tpu.matmul %238, %239, %cst_75 {dimension_numbers = #tpu.dot_dimension_numbers<[1], [0], [0], [1], [0, 0, 1, 1], [], []>} : vector<64x8xbf16>, vector<8x256xbf16>, vector<64x256xf32> -> vector<64x256xf32>
    %cst_76 = arith.constant dense<0xFF800000> : vector<256xf32>
    %241 = vector.multi_reduction <maximumf>, %240, %cst_76 [0] : vector<64x256xf32> to vector<256xf32>
    %242 = vector.shape_cast %241 : vector<256xf32> to vector<1x256xf32>
    %243 = vector.broadcast %242 : vector<1x256xf32> to vector<64x256xf32>
    %244 = arith.subf %240, %243 : vector<64x256xf32>
    %245 = math.exp %244 : vector<64x256xf32>
    %cst_77 = arith.constant dense<0.000000e+00> : vector<256xf32>
    %246 = vector.multi_reduction <add>, %245, %cst_77 [0] : vector<64x256xf32> to vector<256xf32>
    %247 = vector.shape_cast %246 : vector<256xf32> to vector<1x256xf32>
    %248 = tpu.reciprocal %247 {approx = true} : vector<1x256xf32> -> vector<1x256xf32>
    %249 = vector.broadcast %248 : vector<1x256xf32> to vector<64x256xf32>
    %250 = arith.mulf %245, %249 : vector<64x256xf32>
    %251 = arith.truncf %237 : vector<8x64xf32> to vector<8x64xbf16>
    %252 = arith.truncf %250 : vector<64x256xf32> to vector<64x256xbf16>
    %cst_78 = arith.constant dense<0.000000e+00> : vector<8x256xf32>
    %253 = tpu.matmul %251, %252, %cst_78 {dimension_numbers = #tpu.dot_dimension_numbers<[1], [0], [0], [1], [0, 0, 1, 1], [], []>} : vector<8x64xbf16>, vector<64x256xbf16>, vector<8x256xf32> -> vector<8x256xf32>
    %254 = vector.extract_strided_slice %234 {offsets = [8, 0], sizes = [8, 256], strides = [1, 1]} : vector<32x256xf32> to vector<8x256xf32>
    %255 = vector.extract_strided_slice %116 {offsets = [0, 8], sizes = [64, 8], strides = [1, 1]} : vector<64x32xf32> to vector<64x8xf32>
    %256 = vector.extract_strided_slice %120 {offsets = [8, 0], sizes = [8, 64], strides = [1, 1]} : vector<32x64xf32> to vector<8x64xf32>
    %257 = arith.truncf %255 : vector<64x8xf32> to vector<64x8xbf16>
    %258 = arith.truncf %254 : vector<8x256xf32> to vector<8x256xbf16>
    %cst_79 = arith.constant dense<0.000000e+00> : vector<64x256xf32>
    %259 = tpu.matmul %257, %258, %cst_79 {dimension_numbers = #tpu.dot_dimension_numbers<[1], [0], [0], [1], [0, 0, 1, 1], [], []>} : vector<64x8xbf16>, vector<8x256xbf16>, vector<64x256xf32> -> vector<64x256xf32>
    %cst_80 = arith.constant dense<0xFF800000> : vector<256xf32>
    %260 = vector.multi_reduction <maximumf>, %259, %cst_80 [0] : vector<64x256xf32> to vector<256xf32>
    %261 = vector.shape_cast %260 : vector<256xf32> to vector<1x256xf32>
    %262 = vector.broadcast %261 : vector<1x256xf32> to vector<64x256xf32>
    %263 = arith.subf %259, %262 : vector<64x256xf32>
    %264 = math.exp %263 : vector<64x256xf32>
    %cst_81 = arith.constant dense<0.000000e+00> : vector<256xf32>
    %265 = vector.multi_reduction <add>, %264, %cst_81 [0] : vector<64x256xf32> to vector<256xf32>
    %266 = vector.shape_cast %265 : vector<256xf32> to vector<1x256xf32>
    %267 = tpu.reciprocal %266 {approx = true} : vector<1x256xf32> -> vector<1x256xf32>
    %268 = vector.broadcast %267 : vector<1x256xf32> to vector<64x256xf32>
    %269 = arith.mulf %264, %268 : vector<64x256xf32>
    %270 = arith.truncf %256 : vector<8x64xf32> to vector<8x64xbf16>
    %271 = arith.truncf %269 : vector<64x256xf32> to vector<64x256xbf16>
    %cst_82 = arith.constant dense<0.000000e+00> : vector<8x256xf32>
    %272 = tpu.matmul %270, %271, %cst_82 {dimension_numbers = #tpu.dot_dimension_numbers<[1], [0], [0], [1], [0, 0, 1, 1], [], []>} : vector<8x64xbf16>, vector<64x256xbf16>, vector<8x256xf32> -> vector<8x256xf32>
    %273 = vector.extract_strided_slice %234 {offsets = [16, 0], sizes = [8, 256], strides = [1, 1]} : vector<32x256xf32> to vector<8x256xf32>
    %274 = vector.extract_strided_slice %116 {offsets = [0, 16], sizes = [64, 8], strides = [1, 1]} : vector<64x32xf32> to vector<64x8xf32>
    %275 = vector.extract_strided_slice %120 {offsets = [16, 0], sizes = [8, 64], strides = [1, 1]} : vector<32x64xf32> to vector<8x64xf32>
    %276 = arith.truncf %274 : vector<64x8xf32> to vector<64x8xbf16>
    %277 = arith.truncf %273 : vector<8x256xf32> to vector<8x256xbf16>
    %cst_83 = arith.constant dense<0.000000e+00> : vector<64x256xf32>
    %278 = tpu.matmul %276, %277, %cst_83 {dimension_numbers = #tpu.dot_dimension_numbers<[1], [0], [0], [1], [0, 0, 1, 1], [], []>} : vector<64x8xbf16>, vector<8x256xbf16>, vector<64x256xf32> -> vector<64x256xf32>
    %cst_84 = arith.constant dense<0xFF800000> : vector<256xf32>
    %279 = vector.multi_reduction <maximumf>, %278, %cst_84 [0] : vector<64x256xf32> to vector<256xf32>
    %280 = vector.shape_cast %279 : vector<256xf32> to vector<1x256xf32>
    %281 = vector.broadcast %280 : vector<1x256xf32> to vector<64x256xf32>
    %282 = arith.subf %278, %281 : vector<64x256xf32>
    %283 = math.exp %282 : vector<64x256xf32>
    %cst_85 = arith.constant dense<0.000000e+00> : vector<256xf32>
    %284 = vector.multi_reduction <add>, %283, %cst_85 [0] : vector<64x256xf32> to vector<256xf32>
    %285 = vector.shape_cast %284 : vector<256xf32> to vector<1x256xf32>
    %286 = tpu.reciprocal %285 {approx = true} : vector<1x256xf32> -> vector<1x256xf32>
    %287 = vector.broadcast %286 : vector<1x256xf32> to vector<64x256xf32>
    %288 = arith.mulf %283, %287 : vector<64x256xf32>
    %289 = arith.truncf %275 : vector<8x64xf32> to vector<8x64xbf16>
    %290 = arith.truncf %288 : vector<64x256xf32> to vector<64x256xbf16>
    %cst_86 = arith.constant dense<0.000000e+00> : vector<8x256xf32>
    %291 = tpu.matmul %289, %290, %cst_86 {dimension_numbers = #tpu.dot_dimension_numbers<[1], [0], [0], [1], [0, 0, 1, 1], [], []>} : vector<8x64xbf16>, vector<64x256xbf16>, vector<8x256xf32> -> vector<8x256xf32>
    %292 = vector.extract_strided_slice %234 {offsets = [24, 0], sizes = [8, 256], strides = [1, 1]} : vector<32x256xf32> to vector<8x256xf32>
    %293 = vector.extract_strided_slice %116 {offsets = [0, 24], sizes = [64, 8], strides = [1, 1]} : vector<64x32xf32> to vector<64x8xf32>
    %294 = vector.extract_strided_slice %120 {offsets = [24, 0], sizes = [8, 64], strides = [1, 1]} : vector<32x64xf32> to vector<8x64xf32>
    %295 = arith.truncf %293 : vector<64x8xf32> to vector<64x8xbf16>
    %296 = arith.truncf %292 : vector<8x256xf32> to vector<8x256xbf16>
    %cst_87 = arith.constant dense<0.000000e+00> : vector<64x256xf32>
    %297 = tpu.matmul %295, %296, %cst_87 {dimension_numbers = #tpu.dot_dimension_numbers<[1], [0], [0], [1], [0, 0, 1, 1], [], []>} : vector<64x8xbf16>, vector<8x256xbf16>, vector<64x256xf32> -> vector<64x256xf32>
    %cst_88 = arith.constant dense<0xFF800000> : vector<256xf32>
    %298 = vector.multi_reduction <maximumf>, %297, %cst_88 [0] : vector<64x256xf32> to vector<256xf32>
    %299 = vector.shape_cast %298 : vector<256xf32> to vector<1x256xf32>
    %300 = vector.broadcast %299 : vector<1x256xf32> to vector<64x256xf32>
    %301 = arith.subf %297, %300 : vector<64x256xf32>
    %302 = math.exp %301 : vector<64x256xf32>
    %cst_89 = arith.constant dense<0.000000e+00> : vector<256xf32>
    %303 = vector.multi_reduction <add>, %302, %cst_89 [0] : vector<64x256xf32> to vector<256xf32>
    %304 = vector.shape_cast %303 : vector<256xf32> to vector<1x256xf32>
    %305 = tpu.reciprocal %304 {approx = true} : vector<1x256xf32> -> vector<1x256xf32>
    %306 = vector.broadcast %305 : vector<1x256xf32> to vector<64x256xf32>
    %307 = arith.mulf %302, %306 : vector<64x256xf32>
    %308 = arith.truncf %294 : vector<8x64xf32> to vector<8x64xbf16>
    %309 = arith.truncf %307 : vector<64x256xf32> to vector<64x256xbf16>
    %cst_90 = arith.constant dense<0.000000e+00> : vector<8x256xf32>
    %310 = tpu.matmul %308, %309, %cst_90 {dimension_numbers = #tpu.dot_dimension_numbers<[1], [0], [0], [1], [0, 0, 1, 1], [], []>} : vector<8x64xbf16>, vector<64x256xbf16>, vector<8x256xf32> -> vector<8x256xf32>
    %311 = tpu.concatenate %253, %272, %291, %310 in 0 : vector<8x256xf32>, vector<8x256xf32>, vector<8x256xf32>, vector<8x256xf32> -> vector<32x256xf32>
    %c0_91 = arith.constant 0 : index
    %c0_92 = arith.constant 0 : index
    %312 = vector.load %arg12[%c0_91, %c0_92] : memref<32x9xf32, #tpu.memory_space<vmem>>, vector<32x9xf32>
    %313 = tpu.iota {dimensions = array<i32: 1>} : vector<1x256xi32>
    %c15_i32_93 = arith.constant 15 : i32
    %314 = vector.broadcast %c15_i32_93 : i32 to vector<1x256xi32>
    %315 = arith.andi %313, %314 : vector<1x256xi32>
    %316 = vector.extract_strided_slice %312 {offsets = [0, 4], sizes = [32, 1], strides = [1, 1]} : vector<32x9xf32> to vector<32x1xf32>
    %317 = vector.broadcast %316 : vector<32x1xf32> to vector<32x256xf32>
    %318 = arith.mulf %311, %317 : vector<32x256xf32>
    %c17_i32_94 = arith.constant 17 : i32
    %319 = tpu.dynamic_rotate %311 by %c17_i32_94 dim 1 : vector<32x256xf32>, i32 -> vector<32x256xf32>
    %c16_i32_95 = arith.constant 16 : i32
    %320 = vector.broadcast %c16_i32_95 : i32 to vector<1x256xi32>
    %321 = arith.cmpi sge, %313, %320 : vector<1x256xi32>
    %c1_i32_96 = arith.constant 1 : i32
    %322 = vector.broadcast %c1_i32_96 : i32 to vector<1x256xi32>
    %323 = arith.cmpi sge, %315, %322 : vector<1x256xi32>
    %324 = arith.andi %321, %323 : vector<1x256xi1>
    %cst_97 = arith.constant 0.000000e+00 : f32
    %325 = vector.shape_cast %324 : vector<1x256xi1> to vector<1x256xi1>
    %326 = vector.broadcast %325 : vector<1x256xi1> to vector<32x256xi1>
    %327 = vector.broadcast %cst_97 : f32 to vector<32x256xf32>
    %328 = arith.select %326, %319, %327 : vector<32x256xi1>, vector<32x256xf32>
    %329 = vector.extract_strided_slice %312 {offsets = [0, 0], sizes = [32, 1], strides = [1, 1]} : vector<32x9xf32> to vector<32x1xf32>
    %330 = vector.broadcast %329 : vector<32x1xf32> to vector<32x256xf32>
    %331 = arith.mulf %328, %330 : vector<32x256xf32>
    %332 = arith.addf %318, %331 : vector<32x256xf32>
    %c16_i32_98 = arith.constant 16 : i32
    %333 = tpu.dynamic_rotate %311 by %c16_i32_98 dim 1 : vector<32x256xf32>, i32 -> vector<32x256xf32>
    %c16_i32_99 = arith.constant 16 : i32
    %334 = vector.broadcast %c16_i32_99 : i32 to vector<1x256xi32>
    %335 = arith.cmpi sge, %313, %334 : vector<1x256xi32>
    %cst_100 = arith.constant 0.000000e+00 : f32
    %336 = vector.shape_cast %335 : vector<1x256xi1> to vector<1x256xi1>
    %337 = vector.broadcast %336 : vector<1x256xi1> to vector<32x256xi1>
    %338 = vector.broadcast %cst_100 : f32 to vector<32x256xf32>
    %339 = arith.select %337, %333, %338 : vector<32x256xi1>, vector<32x256xf32>
    %340 = vector.extract_strided_slice %312 {offsets = [0, 1], sizes = [32, 1], strides = [1, 1]} : vector<32x9xf32> to vector<32x1xf32>
    %341 = vector.broadcast %340 : vector<32x1xf32> to vector<32x256xf32>
    %342 = arith.mulf %339, %341 : vector<32x256xf32>
    %343 = arith.addf %332, %342 : vector<32x256xf32>
    %c15_i32_101 = arith.constant 15 : i32
    %344 = tpu.dynamic_rotate %311 by %c15_i32_101 dim 1 : vector<32x256xf32>, i32 -> vector<32x256xf32>
    %c16_i32_102 = arith.constant 16 : i32
    %345 = vector.broadcast %c16_i32_102 : i32 to vector<1x256xi32>
    %346 = arith.cmpi sge, %313, %345 : vector<1x256xi32>
    %c14_i32_103 = arith.constant 14 : i32
    %347 = vector.broadcast %c14_i32_103 : i32 to vector<1x256xi32>
    %348 = arith.cmpi sle, %315, %347 : vector<1x256xi32>
    %349 = arith.andi %346, %348 : vector<1x256xi1>
    %cst_104 = arith.constant 0.000000e+00 : f32
    %350 = vector.shape_cast %349 : vector<1x256xi1> to vector<1x256xi1>
    %351 = vector.broadcast %350 : vector<1x256xi1> to vector<32x256xi1>
    %352 = vector.broadcast %cst_104 : f32 to vector<32x256xf32>
    %353 = arith.select %351, %344, %352 : vector<32x256xi1>, vector<32x256xf32>
    %354 = vector.extract_strided_slice %312 {offsets = [0, 2], sizes = [32, 1], strides = [1, 1]} : vector<32x9xf32> to vector<32x1xf32>
    %355 = vector.broadcast %354 : vector<32x1xf32> to vector<32x256xf32>
    %356 = arith.mulf %353, %355 : vector<32x256xf32>
    %357 = arith.addf %343, %356 : vector<32x256xf32>
    %c1_i32_105 = arith.constant 1 : i32
    %358 = tpu.dynamic_rotate %311 by %c1_i32_105 dim 1 : vector<32x256xf32>, i32 -> vector<32x256xf32>
    %c1_i32_106 = arith.constant 1 : i32
    %359 = vector.broadcast %c1_i32_106 : i32 to vector<1x256xi32>
    %360 = arith.cmpi sge, %315, %359 : vector<1x256xi32>
    %cst_107 = arith.constant 0.000000e+00 : f32
    %361 = vector.shape_cast %360 : vector<1x256xi1> to vector<1x256xi1>
    %362 = vector.broadcast %361 : vector<1x256xi1> to vector<32x256xi1>
    %363 = vector.broadcast %cst_107 : f32 to vector<32x256xf32>
    %364 = arith.select %362, %358, %363 : vector<32x256xi1>, vector<32x256xf32>
    %365 = vector.extract_strided_slice %312 {offsets = [0, 3], sizes = [32, 1], strides = [1, 1]} : vector<32x9xf32> to vector<32x1xf32>
    %366 = vector.broadcast %365 : vector<32x1xf32> to vector<32x256xf32>
    %367 = arith.mulf %364, %366 : vector<32x256xf32>
    %368 = arith.addf %357, %367 : vector<32x256xf32>
    %c255_i32_108 = arith.constant 255 : i32
    %369 = tpu.dynamic_rotate %311 by %c255_i32_108 dim 1 : vector<32x256xf32>, i32 -> vector<32x256xf32>
    %c14_i32_109 = arith.constant 14 : i32
    %370 = vector.broadcast %c14_i32_109 : i32 to vector<1x256xi32>
    %371 = arith.cmpi sle, %315, %370 : vector<1x256xi32>
    %cst_110 = arith.constant 0.000000e+00 : f32
    %372 = vector.shape_cast %371 : vector<1x256xi1> to vector<1x256xi1>
    %373 = vector.broadcast %372 : vector<1x256xi1> to vector<32x256xi1>
    %374 = vector.broadcast %cst_110 : f32 to vector<32x256xf32>
    %375 = arith.select %373, %369, %374 : vector<32x256xi1>, vector<32x256xf32>
    %376 = vector.extract_strided_slice %312 {offsets = [0, 5], sizes = [32, 1], strides = [1, 1]} : vector<32x9xf32> to vector<32x1xf32>
    %377 = vector.broadcast %376 : vector<32x1xf32> to vector<32x256xf32>
    %378 = arith.mulf %375, %377 : vector<32x256xf32>
    %379 = arith.addf %368, %378 : vector<32x256xf32>
    %c241_i32_111 = arith.constant 241 : i32
    %380 = tpu.dynamic_rotate %311 by %c241_i32_111 dim 1 : vector<32x256xf32>, i32 -> vector<32x256xf32>
    %c240_i32_112 = arith.constant 240 : i32
    %381 = vector.broadcast %c240_i32_112 : i32 to vector<1x256xi32>
    %382 = arith.cmpi slt, %313, %381 : vector<1x256xi32>
    %c1_i32_113 = arith.constant 1 : i32
    %383 = vector.broadcast %c1_i32_113 : i32 to vector<1x256xi32>
    %384 = arith.cmpi sge, %315, %383 : vector<1x256xi32>
    %385 = arith.andi %382, %384 : vector<1x256xi1>
    %cst_114 = arith.constant 0.000000e+00 : f32
    %386 = vector.shape_cast %385 : vector<1x256xi1> to vector<1x256xi1>
    %387 = vector.broadcast %386 : vector<1x256xi1> to vector<32x256xi1>
    %388 = vector.broadcast %cst_114 : f32 to vector<32x256xf32>
    %389 = arith.select %387, %380, %388 : vector<32x256xi1>, vector<32x256xf32>
    %390 = vector.extract_strided_slice %312 {offsets = [0, 6], sizes = [32, 1], strides = [1, 1]} : vector<32x9xf32> to vector<32x1xf32>
    %391 = vector.broadcast %390 : vector<32x1xf32> to vector<32x256xf32>
    %392 = arith.mulf %389, %391 : vector<32x256xf32>
    %393 = arith.addf %379, %392 : vector<32x256xf32>
    %c240_i32_115 = arith.constant 240 : i32
    %394 = tpu.dynamic_rotate %311 by %c240_i32_115 dim 1 : vector<32x256xf32>, i32 -> vector<32x256xf32>
    %c240_i32_116 = arith.constant 240 : i32
    %395 = vector.broadcast %c240_i32_116 : i32 to vector<1x256xi32>
    %396 = arith.cmpi slt, %313, %395 : vector<1x256xi32>
    %cst_117 = arith.constant 0.000000e+00 : f32
    %397 = vector.shape_cast %396 : vector<1x256xi1> to vector<1x256xi1>
    %398 = vector.broadcast %397 : vector<1x256xi1> to vector<32x256xi1>
    %399 = vector.broadcast %cst_117 : f32 to vector<32x256xf32>
    %400 = arith.select %398, %394, %399 : vector<32x256xi1>, vector<32x256xf32>
    %401 = vector.extract_strided_slice %312 {offsets = [0, 7], sizes = [32, 1], strides = [1, 1]} : vector<32x9xf32> to vector<32x1xf32>
    %402 = vector.broadcast %401 : vector<32x1xf32> to vector<32x256xf32>
    %403 = arith.mulf %400, %402 : vector<32x256xf32>
    %404 = arith.addf %393, %403 : vector<32x256xf32>
    %c239_i32_118 = arith.constant 239 : i32
    %405 = tpu.dynamic_rotate %311 by %c239_i32_118 dim 1 : vector<32x256xf32>, i32 -> vector<32x256xf32>
    %c240_i32_119 = arith.constant 240 : i32
    %406 = vector.broadcast %c240_i32_119 : i32 to vector<1x256xi32>
    %407 = arith.cmpi slt, %313, %406 : vector<1x256xi32>
    %c14_i32_120 = arith.constant 14 : i32
    %408 = vector.broadcast %c14_i32_120 : i32 to vector<1x256xi32>
    %409 = arith.cmpi sle, %315, %408 : vector<1x256xi32>
    %410 = arith.andi %407, %409 : vector<1x256xi1>
    %cst_121 = arith.constant 0.000000e+00 : f32
    %411 = vector.shape_cast %410 : vector<1x256xi1> to vector<1x256xi1>
    %412 = vector.broadcast %411 : vector<1x256xi1> to vector<32x256xi1>
    %413 = vector.broadcast %cst_121 : f32 to vector<32x256xf32>
    %414 = arith.select %412, %405, %413 : vector<32x256xi1>, vector<32x256xf32>
    %415 = vector.extract_strided_slice %312 {offsets = [0, 8], sizes = [32, 1], strides = [1, 1]} : vector<32x9xf32> to vector<32x1xf32>
    %416 = vector.broadcast %415 : vector<32x1xf32> to vector<32x256xf32>
    %417 = arith.mulf %414, %416 : vector<32x256xf32>
    %418 = arith.addf %404, %417 : vector<32x256xf32>
    %c0_122 = arith.constant 0 : index
    %c0_123 = arith.constant 0 : index
    %419 = vector.load %arg13[%c0_122, %c0_123] : memref<8x32xbf16, #tpu.memory_space<vmem>>, vector<8x32xbf16>
    %420 = arith.truncf %418 : vector<32x256xf32> to vector<32x256xbf16>
    %cst_124 = arith.constant dense<0.000000e+00> : vector<8x256xf32>
    %421 = tpu.matmul %419, %420, %cst_124 {dimension_numbers = #tpu.dot_dimension_numbers<[1], [0], [0], [1], [0, 0, 1, 1], [], []>} : vector<8x32xbf16>, vector<32x256xbf16>, vector<8x256xf32> -> vector<8x256xf32>
    %c0_125 = arith.constant 0 : index
    %c0_126 = arith.constant 0 : index
    %c0_127 = arith.constant 0 : index
    %422 = vector.load %arg14[%c0_125, %c0_126, %c0_127] : memref<1x8x256xf32, #tpu.memory_space<vmem>>, vector<1x8x256xf32>
    %423 = vector.shape_cast %422 : vector<1x8x256xf32> to vector<8x256xf32>
    %424 = vector.shape_cast %421 : vector<8x256xf32> to vector<1x8x256xf32>
    tpu.vector_store %arg14[%c0_125, %c0_126, %c0_127], %424 {strides = array<i32>} : memref<1x8x256xf32, #tpu.memory_space<vmem>>, vector<1x8x256xf32>,
    return
  }
  func.func @transform_0(%arg0: i32) -> (i32, i32, i32) {
    %c0_i32 = arith.constant 0 : i32
    %c0_i32_0 = arith.constant 0 : i32
    %c0_i32_1 = arith.constant 0 : i32
    return %arg0, %c0_i32, %c0_i32_0 : i32, i32, i32
  }
  func.func @transform_1(%arg0: i32) -> (i32, i32, i32) {
    %c0_i32 = arith.constant 0 : i32
    %c0_i32_0 = arith.constant 0 : i32
    %c0_i32_1 = arith.constant 0 : i32
    return %arg0, %c0_i32, %c0_i32_0 : i32, i32, i32
  }
  func.func @transform_2(%arg0: i32) -> (i32, i32) {
    %c0_i32 = arith.constant 0 : i32
    %c0_i32_0 = arith.constant 0 : i32
    %c0_i32_1 = arith.constant 0 : i32
    return %c0_i32, %c0_i32_0 : i32, i32
  }
  func.func @transform_3(%arg0: i32) -> (i32, i32) {
    %c0_i32 = arith.constant 0 : i32
    %c0_i32_0 = arith.constant 0 : i32
    %c0_i32_1 = arith.constant 0 : i32
    return %c0_i32, %c0_i32_0 : i32, i32
  }
  func.func @transform_4(%arg0: i32) -> (i32, i32) {
    %c0_i32 = arith.constant 0 : i32
    %c0_i32_0 = arith.constant 0 : i32
    %c0_i32_1 = arith.constant 0 : i32
    return %c0_i32, %c0_i32_0 : i32, i32
  }
  func.func @transform_5(%arg0: i32) -> (i32, i32) {
    %c0_i32 = arith.constant 0 : i32
    %c0_i32_0 = arith.constant 0 : i32
    %c0_i32_1 = arith.constant 0 : i32
    return %c0_i32, %c0_i32_0 : i32, i32
  }
  func.func @transform_6(%arg0: i32) -> (i32, i32) {
    %c0_i32 = arith.constant 0 : i32
    %c0_i32_0 = arith.constant 0 : i32
    %c0_i32_1 = arith.constant 0 : i32
    return %c0_i32, %c0_i32_0 : i32, i32
  }
  func.func @transform_7(%arg0: i32) -> (i32, i32) {
    %c0_i32 = arith.constant 0 : i32
    %c0_i32_0 = arith.constant 0 : i32
    %c0_i32_1 = arith.constant 0 : i32
    return %c0_i32, %c0_i32_0 : i32, i32
  }
  func.func @transform_8(%arg0: i32) -> (i32, i32) {
    %c0_i32 = arith.constant 0 : i32
    %c0_i32_0 = arith.constant 0 : i32
    %c0_i32_1 = arith.constant 0 : i32
    return %c0_i32, %c0_i32_0 : i32, i32
  }
  func.func @transform_9(%arg0: i32) -> (i32, i32) {
    %c0_i32 = arith.constant 0 : i32
    %c0_i32_0 = arith.constant 0 : i32
    %c0_i32_1 = arith.constant 0 : i32
    return %c0_i32, %c0_i32_0 : i32, i32
  }
  func.func @transform_10(%arg0: i32) -> (i32, i32) {
    %c0_i32 = arith.constant 0 : i32
    %c0_i32_0 = arith.constant 0 : i32
    %c0_i32_1 = arith.constant 0 : i32
    return %c0_i32, %c0_i32_0 : i32, i32
  }
  func.func @transform_11(%arg0: i32) -> (i32, i32) {
    %c0_i32 = arith.constant 0 : i32
    %c0_i32_0 = arith.constant 0 : i32
    %c0_i32_1 = arith.constant 0 : i32
    return %c0_i32, %c0_i32_0 : i32, i32
  }
  func.func @transform_12(%arg0: i32) -> (i32, i32) {
    %c0_i32 = arith.constant 0 : i32
    %c0_i32_0 = arith.constant 0 : i32
    %c0_i32_1 = arith.constant 0 : i32
    return %c0_i32, %c0_i32_0 : i32, i32
  }
  func.func @transform_13(%arg0: i32) -> (i32, i32, i32) {
    %c0_i32 = arith.constant 0 : i32
    %c0_i32_0 = arith.constant 0 : i32
    %c0_i32_1 = arith.constant 0 : i32
    return %arg0, %c0_i32, %c0_i32_0 : i32, i32, i32
  }
}

</mosaic_0001>

<bundles_post_ra>
// kernel: _lambda_.1
= control target key start
LH: loop header
LB: loop body
LE: loop exit
PB: predicated region body
PF: predicated region fallthrough
CT: control target
= control target key end

     0   :  { %s3503_s25 = smov 0   ;;  %s5259_s0 = inlined_call_operand.vmem [shape: f32[2,16,256], index: 0, kind: input, shape index: {}]   ;;  %s5260_s1 = inlined_call_operand.vmem [shape: f32[2,8,256], index: 1, kind: input, shape index: {}]   ;;  %s5261_s2 = inlined_call_operand.vmem [shape: bf16[64,256], index: 2, kind: input, shape index: {}]   ;;  %s5262_s3 = inlined_call_operand.vmem [shape: f32[16,9], index: 3, kind: input, shape index: {}]   ;;  %s5263_s4 = inlined_call_operand.vmem [shape: bf16[16,32], index: 4, kind: input, shape index: {}]   ;;  %s5264_s5 = inlined_call_operand.vmem [shape: bf16[32,16], index: 5, kind: input, shape index: {}]   ;;  %s5265_s6 = inlined_call_operand.vmem [shape: f32[64,32], index: 6, kind: input, shape index: {}]   ;;  %s5266_s7 = inlined_call_operand.vmem [shape: f32[32,64], index: 7, kind: input, shape index: {}]   ;;  %s5267_s8 = inlined_call_operand.vmem [shape: f32[8,9], index: 8, kind: input, shape index: {}]   ;;  %s5268_s9 = inlined_call_operand.vmem [shape: bf16[32,8], index: 9, kind: input, shape index: {}]   ;;  %s5269_s10 = inlined_call_operand.vmem [shape: f32[32,256], index: 10, kind: input, shape index: {}]   ;;  %s5270_s11 = inlined_call_operand.vmem [shape: f32[32,9], index: 11, kind: input, shape index: {}]   ;;  %s5271_s12 = inlined_call_operand.vmem [shape: bf16[8,32], index: 12, kind: input, shape index: {}]   ;;  %s5272_s13 = inlined_call_operand.vmem [shape: f32[2,8,256], index: 13, kind: output, shape index: {}]  }
   0x1 LB: > { %s3066_s26 = sadd.s32 4294967295, %s3412_s25   ;;  %p3070_p0 = scmp.ge.s32.totalorder %s3412_s25, 1  ;;  %s3412_s25 = sphi %s3503_s25, %s23_s25  }
   0x2   : > { %p397_p1 = scmp.lt.s32.totalorder %s3412_s25, 3 }
   0x4   : > { %p398_p2 = pnand %p3070_p0, %p397_p1 }
   0x6   : > { %401 = sbr.rel (%p398_p2) target bundleno = 2563 (0xa03), region = 72 }
   0xb   : > { %v3514_v0 = vld [vmem:[%s5262_s3] sm:$0xff]  ;;  %p446_p3 = scmp.lt.s32.totalorder %s3066_s26, 1  ;;  %v5293_v1 = vmov 0   ;;  %v3415_v2 = vmov 4   ;;  %v3521_v3 = vld [vmem:[%s5262_s3 + $0x8] sm:$0xff]  ;;  %v3416_v4 = vmov 1   ;;  %v468_v49 = vlaneseq }
   0xc   : > { %3194 = vset.pattern.permute.xlu1 %v5293_v1  ;;  %3193 = vset.pattern.permute.xlu0 %v3415_v2  ;;  %s3417_s18 = smov 17   ;;  %v3418_v9 = vmov 2   ;;  %s3419_s19 = smov 16   ;;  %v5281_v10 = vmov 3   ;;  %v5279_v11 = vmov 5   ;;  %v5277_v12 = vmov 6  }
   0xd   : > { %515 = vperm.xlu1 %3194, %v3514_v0   ;;  %475 = vperm.xlu0 %3193, %v3514_v0   ;;  %s5485_s26 = smov (!%p446_p3, %s3066_s26), 1  ;;  %s3421_s20 = smov 15   ;;  %v5275_v13 = vmov 7   ;;  %v5273_v14 = vmov 8   ;;  %v1087_v15 = vld [vmem:[%s5267_s8] sm:$0xff]  ;;  %v3740_v51 = vand.u32 127, %v468_v49 }
   0xe   : > { %s3126_s14 = sshll.u32 %s5485_s26, 5  ;;  %s3423_s21 = smov 1   ;;  %v3247_v18 = vld [vmem:[%s5261_s2 + $0x4] ss:$8 sps:$4 sm:$0xff]  }
   0xf   : > { %s450_s17 = scalar_lea.vmem %s5259_s0, %s3126_s14  ;;  %s5291_s22 = smov 127   ;;  %881 = vmatprep.mubr.bf16.mxu0 %v3247_v18  ;;  %v3747_v54 = vadd.s32 128, %v3740_v51  ;;  %v471_v55 = vand.u32 15, %v3740_v51  ;;  %vm5325_vm0 = vcmp.lt.s32.totalorder %v3740_v51, 17  ;;  %vm5289_vm1 = vcmp.ge.s32.totalorder %v3740_v51, 16 }
  0x10   : > { %v3537_v5 = vld [vmem:[%s450_s17 + $0x10] sm:$0xff]  ;;  %v3539_v6 = vld [vmem:[%s450_s17] sm:$0xff]  ;;  %v3545_v7 = vld [vmem:[%s450_s17 + $0x18] sm:$0xff]  ;;  %s5286_s23 = smov 113   ;;  %s3429_s24 = smov 112   ;;  %vm5326_vm5 = vcmp.lt.s32.totalorder %v3740_v51, 16 }
  0x11   : > { %519 = vperm.xlu1 %3194, %v3521_v3   ;;  %480 = vperm.xlu0 %3193, %v3521_v3   ;;  %v3547_v8 = vld [vmem:[%s450_s17 + $0x8] sm:$0xff]  ;;  %s3430_s27 = smov 111   ;;  %s5285_s30 = sshll.u32 %s5485_s26, 4  ;;  %v472_v58 = vand.u32 15, %v3747_v54  ;;  %vm3757_vm2 = vcmp.ge.s32.totalorder %v471_v55, 1  ;;  %vm5288_vm6 = vcmp.lt.s32.totalorder %v3740_v51, 15 }
  0x12   : > { %s455_s16 = scalar_lea.vmem %s5260_s1, %s5285_s30  ;;  %vm3767_vm3 = vmand %vm5289_vm1, %vm3757_vm2  ;;  %vm3795_vm7 = vcmp.le.s32.totalorder %v471_v55, 14  ;;  %vm5327_vm10 = vcmp.lt.s32.totalorder %v3740_v51, 1  ;;  %vm5283_vm11 = vcmp.lt.s32.totalorder %v3740_v51, 127  ;;  %vm5284_vm12 = vcmp.lt.s32.totalorder %v3740_v51, 113  ;;  %s3431_s15 = smov 120  }
  0x13   : > { %v3634_v16 = vld [vmem:[%s455_s16 + $0x8] sm:$0xff]  ;;  %v3640_v17 = vld [vmem:[%s455_s16] sm:$0xff]  ;;  %vm3773_vm4 = vcmp.ge.s32.totalorder %v472_v58, 1  ;;  %vm3805_vm8 = vcmp.le.s32.totalorder %v472_v58, 14  ;;  %vm3833_vm9 = vmand %vm5289_vm1, %vm3795_vm7  ;;  %vm696_vm13 = vcmp.lt.s32.totalorder %v3747_v54, 240  ;;  %vm731_vm14 = vcmp.lt.s32.totalorder %v3740_v51, 112 }
  0x14   : > { %vm3940_vm15 = vmand %vm696_vm13, %vm3773_vm4  ;;  %s5365_s14 = smov 127  }
  0x15   : > { %3196 = vset.pattern.permute.xlu1 %v3416_v4  ;;  %3195 = vset.pattern.permute.xlu0 %v3416_v4 }
  0x16   : > { %556 = vperm.xlu1 %3196, %v3521_v3   ;;  %552 = vperm.xlu0 %3195, %v3514_v0  }
  0x1a   : > { %489 = vrot.lane.b32.xlu0 %v3537_v5, %s3417_s18  ;;  %487 = vrot.lane.b32.xlu1 %v3539_v6, %s3417_s18 }
  0x1b   : > { %3197 = vset.pattern.permute.xlu1 %v3418_v9  ;;  %3198 = vset.pattern.permute.xlu0 %v3418_v9 }
  0x1e   : > { %493 = vrot.lane.b32.xlu0 %v3545_v7, %s3417_s18  ;;  %491 = vrot.lane.b32.xlu1 %v3547_v8, %s3417_s18 }
  0x22   : > { %597 = vperm.xlu0 %3198, %v3521_v3   ;;  %593 = vperm.xlu1 %3197, %v3514_v0  }
  0x26   : > { %534 = vrot.lane.b32.xlu0 %v3547_v8, %s3419_s19  ;;  %530 = vrot.lane.b32.xlu1 %v3539_v6, %s3419_s19 }
  0x27   : > { %3199 = vset.pattern.permute.xlu0 %v5281_v10  ;;  %3200 = vset.pattern.permute.xlu1 %v5281_v10 }
  0x2a   : > { %630 = vperm.xlu0 %3199, %v3514_v0   ;;  %532 = vrot.lane.b32.xlu1 %v3537_v5, %s3419_s19 }
  0x2e   : > { %536 = vrot.lane.b32.xlu1 %v3545_v7, %s3419_s19  ;;  %569 = vrot.lane.b32.xlu0 %v3537_v5, %s3421_s20 }
  0x2f   : > { %3202 = vset.pattern.permute.xlu0 %v5279_v11 }
  0x32   : > { %634 = vperm.xlu1 %3200, %v3521_v3   ;;  %573 = vrot.lane.b32.xlu0 %v3545_v7, %s3421_s20 }
  0x36   : > { %567 = vrot.lane.b32.xlu1 %v3539_v6, %s3421_s20  ;;  %671 = vperm.xlu0 %3202, %v3521_v3  }
  0x37   : > { %3201 = vset.pattern.permute.xlu1 %v5279_v11 }
  0x3a   : > { %571 = vrot.lane.b32.xlu1 %v3547_v8, %s3421_s20  ;;  %612 = vrot.lane.b32.xlu0 %v3547_v8, %s3423_s21 }
  0x3b   : > { %3203 = vset.pattern.permute.xlu0 %v5277_v12 }
  0x3e   : > { %667 = vperm.xlu1 %3201, %v3514_v0   ;;  %708 = vperm.xlu0 %3203, %v3514_v0  }
  0x42   : > { %608 = vrot.lane.b32.xlu1 %v3539_v6, %s3423_s21  ;;  %647 = vrot.lane.b32.xlu0 %v3537_v5, %s5291_s22 }
  0x43   : > { %3204 = vset.pattern.permute.xlu1 %v5277_v12  ;;  %3206 = vset.pattern.permute.xlu0 %v5275_v13 }
  0x46   : > { %610 = vrot.lane.b32.xlu1 %v3537_v5, %s3423_s21  ;;  %651 = vrot.lane.b32.xlu0 %v3545_v7, %s5291_s22 }
  0x4a   : > { %614 = vrot.lane.b32.xlu1 %v3545_v7, %s3423_s21  ;;  %749 = vperm.xlu0 %3206, %v3521_v3  }
  0x4e   : > { %712 = vperm.xlu1 %3204, %v3521_v3   ;;  %686 = vrot.lane.b32.xlu0 %v3547_v8, %s5286_s23 }
  0x4f   : > { %3207 = vset.pattern.permute.xlu0 %v5273_v14 }
  0x52   : > { %645 = vrot.lane.b32.xlu1 %v3539_v6, %s5291_s22  ;;  %784 = vperm.xlu0 %3207, %v3514_v0  }
  0x53   : > { %3205 = vset.pattern.permute.xlu1 %v5275_v13 }
  0x56   : > { %649 = vrot.lane.b32.xlu1 %v3547_v8, %s5291_s22  ;;  %725 = vrot.lane.b32.xlu0 %v3537_v5, %s3429_s24 }
  0x57   : > { %3210 = vset.pattern.permute.xlu0 %v5293_v1 }
  0x5a   : > { %745 = vperm.xlu1 %3205, %v3514_v0   ;;  %729 = vrot.lane.b32.xlu0 %v3545_v7, %s3429_s24 }
  0x5e   : > { %682 = vrot.lane.b32.xlu1 %v3539_v6, %s5286_s23  ;;  %762 = vrot.lane.b32.xlu0 %v3537_v5, %s3430_s27 }
  0x5f   : > { %3208 = vset.pattern.permute.xlu1 %v5273_v14 }
  0x62   : > { %684 = vrot.lane.b32.xlu1 %v3537_v5, %s5286_s23  ;;  %766 = vrot.lane.b32.xlu0 %v3545_v7, %s3430_s27 }
  0x66   : > { %688 = vrot.lane.b32.xlu1 %v3545_v7, %s5286_s23  ;;  %1104 = vperm.xlu0 %3210, %v1087_v15  }
  0x6a   : > { %788 = vperm.xlu1 %3208, %v3521_v3   ;;  %1097 = vrot.lane.b32.xlu0 %v3634_v16, %s3417_s18 }
  0x6b   : > { %3213 = vset.pattern.permute.xlu0 %v5281_v10 }
  0x6e   : > { %723 = vrot.lane.b32.xlu1 %v3539_v6, %s3429_s24  ;;  %1111 = vrot.lane.b32.xlu0 %v3640_v17, %s3419_s19 }
  0x6f   : > { %3209 = vset.pattern.permute.xlu1 %v3415_v2 }
  0x72   : > { %727 = vrot.lane.b32.xlu1 %v3547_v8, %s3429_s24  ;;  %1152 = vperm.xlu0 %3213, %v1087_v15  }
  0x76   : > { %760 = vrot.lane.b32.xlu1 %v3539_v6, %s3430_s27  ;;  %3214 = vset.pattern.permute.xlu0 %v5279_v11 }
  0x77   : > { %1168 = vperm.xlu0 %3214, %v1087_v15  }
  0x7a   : > { %764 = vrot.lane.b32.xlu1 %v3547_v8, %s3430_s27 }
  0x7b   : > { %3215 = vset.pattern.permute.xlu0 %v5277_v12 }
  0x7c   : > { %1184 = vperm.xlu0 %3215, %v1087_v15  }
  0x7e   : > { %1090 = vperm.xlu1 %3209, %v1087_v15  }
  0x80   : > { %3216 = vset.pattern.permute.xlu0 %v5275_v13 }
  0x81   : > { %1200 = vperm.xlu0 %3216, %v1087_v15  }
  0x82   : > { %3211 = vset.pattern.permute.xlu1 %v3416_v4 }
  0x83   : > { %1120 = vperm.xlu1 %3211, %v1087_v15  }
  0x85   : > { %3217 = vset.pattern.permute.xlu0 %v5273_v14 }
  0x86   : > { %1216 = vperm.xlu0 %3217, %v1087_v15  }
  0x87   : > { %1095 = vrot.lane.b32.xlu1 %v3640_v17, %s3417_s18 }
  0x88   : > { %v3663_v19 = vpop.permute.xlu1 %515  ;;  %v3665_v20 = vpop.permute.xlu0 %475  ;;  %3212 = vset.pattern.permute.xlu1 %v3418_v9 }
  0x89   : > { %v484_v55 = vmul.f32 %v3665_v20, %v3547_v8 }
  0x8a   : > { %1207 = vrot.lane.b32.xlu0 %v3640_v17, %s3430_s27 }
  0x8b   : > { %1136 = vperm.xlu1 %3212, %v1087_v15   ;;  %3218 = vset.pattern.permute.xlu0 %v3415_v2 }
  0x8c   : > { %v3671_v21 = vpop.permute.xlu1 %519  ;;  %v3673_v22 = vpop.permute.xlu0 %480 }
  0x8d   : > { %v485_v12 = vmul.f32 %v3673_v22, %v3537_v5 }
  0x8f   : > { %1113 = vrot.lane.b32.xlu1 %v3634_v16, %s3419_s19 }
  0x90   : > { %3219 = vset.pattern.permute.xlu1 %v3415_v2 }
  0x91   : > { %v3678_v23 = vpop.permute.xlu1 %556  ;;  %v3680_v24 = vpop.permute.xlu0 %552 }
  0x93   : > { %1127 = vrot.lane.b32.xlu1 %v3640_v17, %s3421_s20 }
  0x95   : > { %v490_v25 = vpop.permute.xlu0 %489  ;;  %v488_v26 = vpop.permute.xlu1 %487 }
  0x97   : > { %1129 = vrot.lane.b32.xlu1 %v3634_v16, %s3421_s20 }
  0x99   : > { %v494_v27 = vpop.permute.xlu0 %493  ;;  %v492_v28 = vpop.permute.xlu1 %491 }
  0x9a   : > { %v499_v62 = vsel %vm5325_vm0, %v494_v27, %v490_v25  ;;  %v497_v0 = vsel %vm5325_vm0, %v490_v25, %v494_v27  ;;  %v498_v3 = vsel %vm5325_vm0, %v492_v28, %v488_v26  ;;  %v496_v18 = vsel %vm5325_vm0, %v488_v26, %v492_v28 }
  0x9b   : > { %1143 = vrot.lane.b32.xlu1 %v3640_v17, %s3423_s21  ;;  %v512_v14 = vsel %vm3767_vm3, %v499_v62, 0.0  ;;  %v513_v13 = vsel %vm3773_vm4, %v497_v0, 0.0  ;;  %v510_v25 = vsel %vm3767_vm3, %v498_v3, 0.0  ;;  %v483_v26 = vmul.f32 %v3665_v20, %v3539_v6 }
  0x9c   : > { %v511_v28 = vsel %vm3773_vm4, %v496_v18, 0.0  ;;  %v486_v6 = vmul.f32 %v3673_v22, %v3545_v7  ;;  %v524_v18 = vmul.f32 %v3671_v21, %v512_v14  ;;  %v525_v11 = vmul.f32 %v3671_v21, %v513_v13 }
  0x9d   : > { %v3688_v29 = vpop.permute.xlu0 %597  ;;  %v3690_v30 = vpop.permute.xlu1 %593  ;;  %v522_v58 = vmul.f32 %v3663_v19, %v510_v25  ;;  %v523_v20 = vmul.f32 %v3663_v19, %v511_v28 }
  0x9f   : > { %1145 = vrot.lane.b32.xlu1 %v3634_v16, %s3423_s21 }
  0xa1   : > { %v3694_v31 = vpop.permute.xlu0 %534  ;;  %v3696_v32 = vpop.permute.xlu1 %530 }
  0xa2   : > { %v541_v10 = vsel %vm5326_vm5, %v3694_v31, %v3696_v32 }
  0xa3   : > { %1159 = vrot.lane.b32.xlu1 %v3640_v17, %s5291_s22 }
  0xa5   : > { %v3700_v33 = vpop.permute.xlu0 %630  ;;  %v533_v34 = vpop.permute.xlu1 %532 }
  0xa7   : > { %1161 = vrot.lane.b32.xlu1 %v3634_v16, %s5291_s22  ;;  %s3432_s22 = smov 104  }
  0xa9   : > { %v3704_v35 = vpop.permute.xlu0 %569  ;;  %v537_v36 = vpop.permute.xlu1 %536 }
  0xaa   : > { %v542_v62 = vsel %vm5326_vm5, %v537_v36, %v533_v34  ;;  %v540_v8 = vsel %vm5326_vm5, %v533_v34, %v537_v36  ;;  %v539_v34 = vsel %vm5326_vm5, %v3696_v32, %v3694_v31  ;;  %v547_v36 = vsel %vm5289_vm1, %v541_v10, 0.0 }
  0xab   : > { %1175 = vrot.lane.b32.xlu1 %v3640_v17, %s5286_s23  ;;  %v549_v5 = vsel %vm5289_vm1, %v542_v62, 0.0  ;;  %v529_v31 = vadd.f32 %v525_v11, %v486_v6  ;;  %v526_v32 = vadd.f32 %v522_v58, %v483_v26  ;;  %v527_v10 = vadd.f32 %v523_v20, %v484_v55 }
  0xac   : > { %v561_v25 = vmul.f32 %v3678_v23, %v549_v5 }
  0xad   : > { %v574_v37 = vpop.permute.xlu0 %573  ;;  %v3708_v38 = vpop.permute.xlu1 %634 }
  0xae   : > { %v577_v13 = vsel %vm5288_vm6, %v3704_v35, %v574_v37  ;;  %v579_v14 = vsel %vm5288_vm6, %v574_v37, %v3704_v35  ;;  %v562_v35 = vmul.f32 %v3678_v23, %v540_v8  ;;  %v528_v37 = vadd.f32 %v524_v18, %v485_v12 }
  0xaf   : > { %1177 = vrot.lane.b32.xlu1 %v3634_v16, %s5286_s23  ;;  %v590_v28 = vsel %vm3833_vm9, %v579_v14, 0.0  ;;  %v591_v62 = vsel %vm3805_vm8, %v577_v13, 0.0  ;;  %v559_v12 = vmul.f32 %v3680_v24, %v547_v36  ;;  %v560_v23 = vmul.f32 %v3680_v24, %v539_v34 }
  0xb0   : > { %v566_v26 = vadd.f32 %v562_v35, %v529_v31  ;;  %v602_v55 = vmul.f32 %v3688_v29, %v590_v28  ;;  %v603_v6 = vmul.f32 %v3688_v29, %v591_v62  ;;  %v565_v20 = vadd.f32 %v561_v25, %v528_v37 }
  0xb1   : > { %v3712_v39 = vpop.permute.xlu1 %567  ;;  %v3714_v40 = vpop.permute.xlu0 %671  ;;  %v564_v34 = vadd.f32 %v560_v23, %v527_v10 }
  0xb2   : > { %v606_v36 = vadd.f32 %v602_v55, %v565_v20  ;;  %v607_v35 = vadd.f32 %v603_v6, %v566_v26 }
  0xb3   : > { %1191 = vrot.lane.b32.xlu1 %v3640_v17, %s3429_s24 }
  0xb5   : > { %v3718_v41 = vpop.permute.xlu1 %571  ;;  %v3720_v42 = vpop.permute.xlu0 %612 }
  0xb6   : > { %v578_v21 = vsel %vm5288_vm6, %v3718_v41, %v3712_v39  ;;  %v576_v24 = vsel %vm5288_vm6, %v3712_v39, %v3718_v41 }
  0xb7   : > { %1193 = vrot.lane.b32.xlu1 %v3634_v16, %s3429_s24  ;;  %v588_v8 = vsel %vm3833_vm9, %v578_v21, 0.0  ;;  %v563_v21 = vadd.f32 %v559_v12, %v526_v32 }
  0xb8   : > { %v600_v13 = vmul.f32 %v3690_v30, %v588_v8 }
  0xb9   : > { %v3724_v43 = vpop.permute.xlu1 %667  ;;  %v3726_v44 = vpop.permute.xlu0 %708 }
  0xba   : > { %v604_v32 = vadd.f32 %v600_v13, %v563_v21 }
  0xbb   : > { %1209 = vrot.lane.b32.xlu1 %v3634_v16, %s3430_s27 }
  0xbd   : > { %v3730_v45 = vpop.permute.xlu1 %608  ;;  %v3732_v46 = vpop.permute.xlu0 %647 }
  0xc1   : > { %v3734_v47 = vpop.permute.xlu1 %610  ;;  %v3736_v48 = vpop.permute.xlu0 %651 }
  0xc2   : > { %v655_v41 = vsel %vm5283_vm11, %v3732_v46, %v3736_v48  ;;  %v657_v14 = vsel %vm5283_vm11, %v3736_v48, %v3732_v46 }
  0xc3   : > { %v664_v48 = vsel %vm3795_vm7, %v655_v41, 0.0  ;;  %v665_v62 = vsel %vm3805_vm8, %v657_v14, 0.0 }
  0xc4   : > { %v676_v26 = vmul.f32 %v3714_v40, %v664_v48  ;;  %v677_v55 = vmul.f32 %v3714_v40, %v665_v62 }
  0xc5   : > { %v3738_v50 = vpop.permute.xlu1 %614  ;;  %v3744_v53 = vpop.permute.xlu0 %749 }
  0xc6   : > { %v618_v18 = vsel %vm5327_vm10, %v3734_v47, %v3738_v50  ;;  %v620_v5 = vsel %vm5327_vm10, %v3738_v50, %v3734_v47  ;;  %v617_v47 = vsel %vm5327_vm10, %v3730_v45, %v3720_v42  ;;  %v619_v50 = vsel %vm5327_vm10, %v3720_v42, %v3730_v45 }
  0xc7   : > { %v627_v29 = vsel %vm3757_vm2, %v620_v5, 0.0  ;;  %v628_v39 = vsel %vm3773_vm4, %v618_v18, 0.0  ;;  %v589_v42 = vsel %vm3805_vm8, %v576_v24, 0.0  ;;  %v625_v37 = vsel %vm3757_vm2, %v619_v50, 0.0 }
  0xc8   : > { %v626_v25 = vsel %vm3773_vm4, %v617_v47, 0.0  ;;  %v639_v28 = vmul.f32 %v3708_v38, %v627_v29  ;;  %v640_v46 = vmul.f32 %v3708_v38, %v628_v39  ;;  %v601_v31 = vmul.f32 %v3690_v30, %v589_v42 }
  0xc9   : > { %v3742_v52 = vpop.permute.xlu1 %712  ;;  %v3752_v57 = vpop.permute.xlu0 %686  ;;  %v637_v23 = vmul.f32 %v3700_v33, %v625_v37  ;;  %v638_v38 = vmul.f32 %v3700_v33, %v626_v25 }
  0xca   : > { %v644_v40 = vadd.f32 %v640_v46, %v607_v35  ;;  %v605_v24 = vadd.f32 %v601_v31, %v564_v34 }
  0xcb   : > { %v641_v47 = vadd.f32 %v637_v23, %v604_v32 }
  0xcc   : > { %v642_v39 = vadd.f32 %v638_v38, %v605_v24 }
  0xcd   : > { %v3750_v56 = vpop.permute.xlu1 %645  ;;  %v3785_v49 = vpop.permute.xlu0 %784 }
  0xd1   : > { %v3761_v60 = vpop.permute.xlu1 %649  ;;  %v3843_v19 = vpop.permute.xlu0 %725 }
  0xd2   : > { %v654_v18 = vsel %vm5283_vm11, %v3750_v56, %v3761_v60  ;;  %v656_v30 = vsel %vm5283_vm11, %v3761_v60, %v3750_v56  ;;  %v643_v60 = vadd.f32 %v639_v28, %v606_v36  ;;  %vm5290_vm11 = vcmp.lt.s32.totalorder %v3740_v51, 111 }
  0xd3   : > { %v662_v20 = vsel %vm3795_vm7, %v654_v18, 0.0  ;;  %v663_v13 = vsel %vm3805_vm8, %v656_v30, 0.0  ;;  %v681_v36 = vadd.f32 %v677_v55, %v644_v40 }
  0xd4   : > { %v680_v42 = vadd.f32 %v676_v26, %v643_v60  ;;  %v674_v35 = vmul.f32 %v3724_v43, %v662_v20  ;;  %v675_v37 = vmul.f32 %v3724_v43, %v663_v13  ;;  %v5343_v43 = vmov 0 }
  0xd5   : > { %v3781_v15 = vpop.permute.xlu1 %745  ;;  %v730_v58 = vpop.permute.xlu0 %729 }
  0xd6   : > { %v735_v50 = vsel %vm731_vm14, %v730_v58, %v3843_v19  ;;  %v733_v46 = vsel %vm731_vm14, %v3843_v19, %v730_v58 }
  0xd9   : > { %v3809_v3 = vpop.permute.xlu1 %682  ;;  %v763_v10 = vpop.permute.xlu0 %762 }
  0xda   : > { %v693_v56 = vsel %vm5284_vm12, %v3752_v57, %v3809_v3 }
  0xdd   : > { %v685_v22 = vpop.permute.xlu1 %684  ;;  %v767_v21 = vpop.permute.xlu0 %766 }
  0xde   : > { %v770_v48 = vsel %vm5290_vm11, %v763_v10, %v767_v21  ;;  %v772_v62 = vsel %vm5290_vm11, %v767_v21, %v763_v10  ;;  %v754_v10 = vmul.f32 %v3744_v53, %v733_v46  ;;  %v3251_v46 = vld [vmem:[%s5261_s2 + $0x24] ss:$8 sps:$4 sm:$0xff]  }
  0xdf   : > { %v781_v38 = vsel %vm3795_vm7, %v770_v48, 0.0 }
  0xe1   : > { %v689_v11 = vpop.permute.xlu1 %688 }
  0xe2   : > { %v692_v8 = vsel %vm5284_vm12, %v685_v22, %v689_v11  ;;  %v694_v12 = vsel %vm5284_vm12, %v689_v11, %v685_v22  ;;  %v691_v22 = vsel %vm5284_vm12, %v3809_v3, %v3752_v57  ;;  %v704_v3 = vsel %vm3940_vm15, %v693_v56, 0.0  ;;  %vm3989_vm12 = vmand %vm696_vm13, %vm3805_vm8 }
  0xe3   : > { %v705_v11 = vsel %vm3757_vm2, %v692_v8, 0.0  ;;  %v706_v6 = vsel %vm3940_vm15, %v694_v12, 0.0  ;;  %v703_v57 = vsel %vm3757_vm2, %v691_v22, 0.0  ;;  %v716_v28 = vmul.f32 %v3726_v44, %v704_v3 }
  0xe4   : > { %v717_v41 = vmul.f32 %v3742_v52, %v705_v11  ;;  %v718_v14 = vmul.f32 %v3742_v52, %v706_v6  ;;  %v715_v25 = vmul.f32 %v3726_v44, %v703_v57  ;;  %v743_v52 = vsel %vm696_vm13, %v735_v50, 0.0 }
  0xe5   : > { %v3907_v45 = vpop.permute.xlu1 %788  ;;  %v5344_v43 = vsel %vm3989_vm12, 4294967295, %v5343_v43  ;;  %v678_v8 = vadd.f32 %v674_v35, %v641_v47  ;;  %v679_v12 = vadd.f32 %v675_v37, %v642_v39  ;;  %v755_v23 = vmul.f32 %v3744_v53, %v743_v52  ;;  %v3250_v37 = vld [vmem:[%s5261_s2 + $0x10] ss:$8 sps:$4 sm:$0xff]  }
  0xe6   : > { %5345 = vst [vmem:[#allocation2_spill] sm:$0xff] %v5344_v43  ;;  %v722_v31 = vadd.f32 %v718_v14, %v681_v36  ;;  %v721_v32 = vadd.f32 %v717_v41, %v680_v42  ;;  %v782_v18 = vsel %vm3989_vm12, %v772_v62, 0.0  ;;  %v793_v11 = vmul.f32 %v3907_v45, %v781_v38  ;;  %v3248_v36 = vld [vmem:[%s5261_s2 + $0x14] ss:$8 sps:$4 sm:$0xff]   ;;  %v3253_v62 = vld [vmem:[%s5261_s2 + $0x20] ss:$8 sps:$4 sm:$0xff]  }
  0xe7   : > { %v720_v55 = vadd.f32 %v716_v28, %v679_v12  ;;  %v719_v22 = vadd.f32 %v715_v25, %v678_v8  ;;  %v794_v6 = vmul.f32 %v3907_v45, %v782_v18  ;;  %v3256_v38 = vld [vmem:[%s5261_s2 + $0x30] ss:$8 sps:$4 sm:$0xff]  }
  0xe8   : > { %v759_v53 = vadd.f32 %v755_v23, %v722_v31  ;;  %v758_v40 = vadd.f32 %v754_v10, %v721_v32 }
  0xe9   : > { %v724_v5 = vpop.permute.xlu1 %723 }
  0xea   : > { %v797_v41 = vadd.f32 %v793_v11, %v758_v40 }
  0xed   : > { %v728_v29 = vpop.permute.xlu1 %727 }
  0xee   : > { %v734_v34 = vsel %vm731_vm14, %v728_v29, %v724_v5  ;;  %v732_v44 = vsel %vm731_vm14, %v724_v5, %v728_v29  ;;  %v798_v29 = vadd.f32 %v794_v6, %v759_v53 }
  0xef   : > { %v741_v19 = vsel %vm696_vm13, %v734_v34, 0.0  ;;  %v752_v30 = vmul.f32 %v3781_v15, %v732_v44  ;;  %v3245_v34 = vld [vmem:[%s5261_s2] ss:$8 sps:$4 sm:$0xff]  }
  0xf0   : > { %v753_v5 = vmul.f32 %v3781_v15, %v741_v19  ;;  %v3254_v19 = vld [vmem:[%s5261_s2 + $0x34] ss:$8 sps:$4 sm:$0xff]  }
  0xf1   : > { %v761_v58 = vpop.permute.xlu1 %760  ;;  %v756_v47 = vadd.f32 %v752_v30, %v719_v22 }
  0xf2   : > { %v757_v20 = vadd.f32 %v753_v5, %v720_v55 }
  0xf5   : > { %v765_v26 = vpop.permute.xlu1 %764 }
  0xf6   : > { %v769_v56 = vsel %vm5290_vm11, %v761_v58, %v765_v26  ;;  %v771_v60 = vsel %vm5290_vm11, %v765_v26, %v761_v58 }
  0xf7   : > { %v779_v24 = vsel %vm3795_vm7, %v769_v56, 0.0  ;;  %v780_v15 = vsel %vm3989_vm12, %v771_v60, 0.0 }
  0xf8   : > { %v792_v13 = vmul.f32 %v3785_v49, %v780_v15  ;;  %v791_v57 = vmul.f32 %v3785_v49, %v779_v24  ;;  %v1105_v49 = vpop.permute.xlu0 %1104 }
  0xf9   : > { %v1091_v3 = vpop.permute.xlu1 %1090 }
  0xfa   : > { %v796_v50 = vadd.f32 %v792_v13, %v757_v20  ;;  %v795_v39 = vadd.f32 %v791_v57, %v756_v47  ;;  %v1093_v18 = vmul.f32 %v1091_v3, %v3640_v17  ;;  %v1094_v30 = vmul.f32 %v1091_v3, %v3634_v16 }
  0xfc   : > { %v808_v14 = vpack.c.bf16 %v798_v29, %v796_v50  ;;  %v807_v21 = vpack.c.bf16 %v797_v41, %v795_v39  ;;  %v1098_v28 = vpop.permute.xlu0 %1097 }
  0xfe   : > { %863 = vmatprep.subr.bf16.mxu0 %v808_v14  ;;  %v1121_v45 = vpop.permute.xlu1 %1120 }
  0xff   : > { %864 = vmatpush1.bf16.xpose.msra.mxu0 %v807_v21 }
 0x100   : > { %v1112_v48 = vpop.permute.xlu0 %1111 }
 0x102   : > { %v1096_v42 = vpop.permute.xlu1 %1095 }
 0x103   : > { %v1099_v58 = vsel %vm5325_vm0, %v1096_v42, %v1098_v28  ;;  %v1100_v31 = vsel %vm5325_vm0, %v1098_v28, %v1096_v42 }
 0x104   : > { %v1153_v8 = vpop.permute.xlu0 %1152  ;;  %v1101_v12 = vsel %vm3767_vm3, %v1100_v31, 0.0  ;;  %v1102_v10 = vsel %vm3773_vm4, %v1099_v58, 0.0 }
 0x105   : > { %v1107_v5 = vmul.f32 %v1105_v49, %v1101_v12  ;;  %v1108_v26 = vmul.f32 %v1105_v49, %v1102_v10 }
 0x106   : > { %882 = vmatmul.mubr.bf16.vlgmr.msra.gmra.mxu0 %v3245_v34  ;;  %v1137_v35 = vpop.permute.xlu1 %1136 }
 0x107   : > { %889 = vmatprep.mubr.bf16.mxu0 %v3248_v36  ;;  %v1109_v17 = vadd.f32 %v1107_v5, %v1093_v18  ;;  %v1110_v11 = vadd.f32 %v1108_v26, %v1094_v30 }
 0x108   : > { %v1169_v40 = vpop.permute.xlu0 %1168 }
 0x10a   : > { %v1114_v25 = vpop.permute.xlu1 %1113 }
 0x10b   : > { %v1116_v23 = vsel %vm5326_vm5, %v1114_v25, %v1112_v48  ;;  %v1115_v22 = vsel %vm5326_vm5, %v1112_v48, %v1114_v25 }
 0x10c   : > { %v1117_v56 = vsel %vm5289_vm1, %v1116_v23, 0.0  ;;  %v1124_v6 = vmul.f32 %v1121_v45, %v1115_v22  ;;  %v1185_v41 = vpop.permute.xlu0 %1184 }
 0x10d   : > { %v1123_v16 = vmul.f32 %v1121_v45, %v1117_v56 }
 0x10e   : > { %890 = vmatmul.mubr.bf16.gmra.mxu0 %v3250_v37  ;;  %v1128_v52 = vpop.permute.xlu1 %1127  ;;  %v1126_v29 = vadd.f32 %v1124_v6, %v1110_v11 }
 0x10f   : > { %897 = vmatprep.mubr.bf16.mxu0 %v3251_v46  ;;  %v1125_v50 = vadd.f32 %v1123_v16, %v1109_v17 }
 0x110   : > { %v1201_v46 = vpop.permute.xlu0 %1200 }
 0x112   : > { %v1130_v44 = vpop.permute.xlu1 %1129 }
 0x113   : > { %v1131_v60 = vsel %vm5288_vm6, %v1128_v52, %v1130_v44  ;;  %v1132_v53 = vsel %vm5288_vm6, %v1130_v44, %v1128_v52  ;;  %vm5346_vm6 = vcmp.lt.s32.totalorder %v3740_v51, 127 }
 0x114   : > { %v1133_v15 = vsel %vm3833_vm9, %v1132_v53, 0.0  ;;  %v1134_v20 = vsel %vm3805_vm8, %v1131_v60, 0.0  ;;  %vm5347_vm1 = vmmov %vm5346_vm6  ;;  %v1217_v10 = vpop.permute.xlu0 %1216 }
 0x115   : > { %v1139_v57 = vmul.f32 %v1137_v35, %v1133_v15  ;;  %v1140_v3 = vmul.f32 %v1137_v35, %v1134_v20 }
 0x116   : > { %898 = vmatmul.mubr.bf16.gmra.mxu0 %v3253_v62  ;;  %v1144_v32 = vpop.permute.xlu1 %1143 }
 0x117   : > { %905 = vmatprep.mubr.bf16.mxu0 %v3254_v19  ;;  %v1141_v42 = vadd.f32 %v1139_v57, %v1125_v50  ;;  %v1142_v36 = vadd.f32 %v1140_v3, %v1126_v29 }
 0x11a   : > { %v1146_v55 = vpop.permute.xlu1 %1145 }
 0x11b   : > { %v1147_v13 = vsel %vm5327_vm10, %v1144_v32, %v1146_v55  ;;  %v1148_v47 = vsel %vm5327_vm10, %v1146_v55, %v1144_v32 }
 0x11c   : > { %v1149_v14 = vsel %vm3757_vm2, %v1148_v47, 0.0  ;;  %v1150_v21 = vsel %vm3773_vm4, %v1147_v13, 0.0 }
 0x11d   : > { %v1155_v49 = vmul.f32 %v1153_v8, %v1149_v14  ;;  %v1156_v35 = vmul.f32 %v1153_v8, %v1150_v21  ;;  %v3257_v14 = vld [vmem:[%s5268_s9] sm:$0xff]  }
 0x11e   : > { %906 = vmatmul.mubr.bf16.gmra.mxu0 %v3256_v38  ;;  %v1160_v24 = vpop.permute.xlu1 %1159  ;;  %v3258_v21 = vld [vmem:[%s5263_s4] sm:$0xff]  }
 0x11f   : > { %1293 = vmatprep.mubr.bf16.mxu0 %v5293_v1  ;;  %v1157_v52 = vadd.f32 %v1155_v49, %v1141_v42  ;;  %v1158_v48 = vadd.f32 %v1156_v35, %v1142_v36  ;;  %3140 = vmatprep.subr.bf16.mxu1 %v3258_v21 }
 0x120   : > { %3141 = vmatpush3.bf16.msra.mxu1 %v3258_v21 }
 0x122   : > { %v1162_v39 = vpop.permute.xlu1 %1161 }
 0x123   : > { %v1163_v45 = vsel %vm5346_vm6, %v1160_v24, %v1162_v39  ;;  %v1164_v34 = vsel %vm5347_vm1, %v1162_v39, %v1160_v24  ;;  %vm5348_vm6 = vcmp.lt.s32.totalorder %v3740_v51, 113 }
 0x124   : > { %v1165_v25 = vsel %vm3795_vm7, %v1163_v45, 0.0  ;;  %v1166_v28 = vsel %vm3805_vm8, %v1164_v34, 0.0  ;;  %vm5349_vm1 = vmmov %vm5348_vm6 }
 0x125   : > { %v1171_v44 = vmul.f32 %v1169_v40, %v1165_v25  ;;  %v1172_v19 = vmul.f32 %v1169_v40, %v1166_v28  ;;  %v1208_v40 = vpop.permute.xlu0 %1207 }
 0x126   : > { %v1176_v37 = vpop.permute.xlu1 %1175 }
 0x127   : > { %v1173_v23 = vadd.f32 %v1171_v44, %v1157_v52  ;;  %v1174_v38 = vadd.f32 %v1172_v19, %v1158_v48 }
 0x12a   : > { %v1178_v62 = vpop.permute.xlu1 %1177 }
 0x12b   : > { %v1179_v58 = vsel %vm5348_vm6, %v1176_v37, %v1178_v62  ;;  %v1180_v31 = vsel %vm5349_vm1, %v1178_v62, %v1176_v37  ;;  %vm1254_vm6 = vcmask 1043456   ;;  %vm1247_vm1 = vcmask 64512  }
 0x12c   : > { %v1181_v32 = vsel %vm3757_vm2, %v1179_v58, 0.0  ;;  %v1182_v8 = vsel %vm3940_vm15, %v1180_v31, 0.0 }
 0x12d   : > { %v1187_v18 = vmul.f32 %v1185_v41, %v1181_v32  ;;  %v1188_v30 = vmul.f32 %v1185_v41, %v1182_v8  ;;  %v3259_v8 = vld [vmem:[%s5264_s5] sm:$0xff]  }
 0x12e   : > { %v1192_v12 = vpop.permute.xlu1 %1191 }
 0x12f   : > { %v1189_v26 = vadd.f32 %v1187_v18, %v1173_v23  ;;  %v1190_v55 = vadd.f32 %v1188_v30, %v1174_v38 }
 0x132   : > { %v1194_v5 = vpop.permute.xlu1 %1193 }
 0x133   : > { %v1195_v22 = vsel %vm731_vm14, %v1192_v12, %v1194_v5  ;;  %v1196_v56 = vsel %vm731_vm14, %v1194_v5, %v1192_v12  ;;  %v3260_v5 = vld [vmem:[%s5264_s5 + $0x8] sm:$0xff]  }
 0x134   : > { %v1198_v60 = vsel %vm696_vm13, %v1196_v56, 0.0  ;;  %v1203_v53 = vmul.f32 %v1201_v46, %v1195_v22  ;;  %v1230_v22 = vld [vmem:[%s5269_s10 + $0x8] sm:$0xff] }
 0x135   : > { %v1204_v17 = vmul.f32 %v1201_v46, %v1198_v60 }
 0x136   : > { %v1210_v11 = vpop.permute.xlu1 %1209  ;;  %v1205_v16 = vadd.f32 %v1203_v53, %v1189_v26  ;;  %v1229_v26 = vld [vmem:[%s5269_s10] sm:$0xff] }
 0x137   : > { %v1206_v6 = vadd.f32 %v1204_v17, %v1190_v55  ;;  %v1211_v24 = vsel %vm5290_vm11, %v1208_v40, %v1210_v11  ;;  %v1212_v15 = vsel %vm5290_vm11, %v1210_v11, %v1208_v40  ;;  %vm934_vm11 = vcmask 130048  }
 0x138   : > { %v1213_v20 = vsel %vm3795_vm7, %v1211_v24, 0.0  ;;  %v1214_v13 = vsel %vm3989_vm12, %v1212_v15, 0.0  ;;  %v923_v15 = vld [vmem:[%s5265_s6 + $0x18] sm:$0xff] }
 0x139   : > { %v1219_v47 = vmul.f32 %v1217_v10, %v1213_v20  ;;  %v1220_v57 = vmul.f32 %v1217_v10, %v1214_v13  ;;  %v920_v20 = vld [vmem:[%s5265_s6] sm:$0xff] }
 0x13b   : > { %v1222_v3 = vadd.f32 %v1220_v57, %v1206_v6  ;;  %v1221_v50 = vadd.f32 %v1219_v47, %v1205_v16  ;;  %v922_v6 = vld [vmem:[%s5265_s6 + $0x10] sm:$0xff]  ;;  %v921_v47 = vld [vmem:[%s5265_s6 + $0x8] sm:$0xff] }
 0x13d   : > { %v1228_v29 = vpack.c.bf16 %v1222_v3, %v1222_v3  ;;  %v1227_v39 = vpack.c.bf16 %v1221_v50, %v1221_v50 }
 0x13f   : > { %3096 = vmatprep.subr.msk.bf16.mxu0 %vm1254_vm6, %v1228_v29  ;;  %v1256_v41 = vsel %vm1254_vm6, %v1227_v39, 0 }
 0x140   : > { %1276 = vmatpush1.bf16.msra.mxu0 %v1256_v41 }
 0x143   : > { %3097 = vmatmul.mubr.msk.bf16.vlgmr.msra.gmra.mxu0 %vm1247_vm1, %v3257_v14 }
 0x144   : > { %1303 = vmatprep.mubr.bf16.mxu0 %v5293_v1 }
 0x1c6   : > { %v883_v45 = vpop.f32.mrf.mxu0 }
 0x1c8   : > { %v885_v34 = vpop.f32.mrf.mxu0 }
 0x1ca   : > { %v886_v42 = vpop.f32.mrf.mxu0 }
 0x1cb   : > { %v914_v36 = vpack.c.bf16 %v886_v42, %v883_v45  ;;  %v926_v45 = vld [vmem:[%s5265_s6 + $0x30] sm:$0xff]  ;;  %v927_v42 = vld [vmem:[%s5265_s6 + $0x38] sm:$0xff] }
 0x1cc   : > { %v888_v49 = vpop.f32.mrf.mxu0 }
 0x1cd   : > { %3142 = vmatprep.mubr.msk.bf16.mxu1 %vm934_vm11, %v914_v36  ;;  %v936_v30 = vsel %vm934_vm11, %v914_v36, 0 }
 0x1ce   : > { %v891_v35 = vpop.f32.mrf.mxu0 }
 0x1d0   : > { %v893_v37 = vpop.f32.mrf.mxu0 }
 0x1d2   : > { %v894_v25 = vpop.f32.mrf.mxu0 }
 0x1d3   : > { %v915_v28 = vpack.c.bf16 %v894_v25, %v891_v35  ;;  %v925_v35 = vld [vmem:[%s5265_s6 + $0x28] sm:$0xff] }
 0x1d4   : > { %v896_v46 = vpop.f32.mrf.mxu0 }
 0x1d5   : > { %3143 = vmatmul.mubr.msk.bf16.vlgmr.msra.gmra.mxu1 %vm934_vm11, %v915_v28  ;;  %v939_v18 = vsel %vm934_vm11, %v915_v28, 0 }
 0x1d6   : > { %v899_v52 = vpop.f32.mrf.mxu0 }
 0x1d8   : > { %v901_v48 = vpop.f32.mrf.mxu0 }
 0x1da   : > { %v902_v62 = vpop.f32.mrf.mxu0 }
 0x1db   : > { %v916_v44 = vpack.c.bf16 %v902_v62, %v899_v52 }
 0x1dc   : > { %v904_v19 = vpop.f32.mrf.mxu0 }
 0x1dd   : > { %3146 = vmatprep.mubr.msk.bf16.mxu1 %vm934_vm11, %v916_v44  ;;  %v942_v38 = vsel %vm934_vm11, %v916_v44, 0  ;;  %v3261_v19 = vld [vmem:[%s5268_s9 + $0x8] sm:$0xff]  }
 0x1de   : > { %v907_v58 = vpop.f32.mrf.mxu0  ;;  %3098 = vmatmul.mubr.msk.bf16.gmra.mxu0 %vm1247_vm1, %v3261_v19 }
 0x1df   : > { %1574 = vmatprep.mubr.bf16.mxu0 %v5293_v1 }
 0x1e0   : > { %v909_v31 = vpop.f32.mrf.mxu0 }
 0x1e2   : > { %v910_v32 = vpop.f32.mrf.mxu0 }
 0x1e3   : > { %v917_v12 = vpack.c.bf16 %v910_v32, %v907_v58 }
 0x1e4   : > { %v912_v10 = vpop.f32.mrf.mxu0 }
 0x1e5   : > { %3147 = vmatmul.mubr.msk.bf16.gmra.mxu1 %vm934_vm11, %v917_v12  ;;  %3162 = vmatprep.subr.msk.bf16.mxu1 %vm934_vm11, %v917_v12  ;;  %v945_v23 = vsel %vm934_vm11, %v917_v12, 0 }
 0x1e6   : > { %3151 = vmatpush3.bf16.xpose.msra.mxu1 %v945_v23  ;;  %3158 = vmatprep.mubr.msk.bf16.mxu1 %vm934_vm11, %v3259_v8 }
 0x1e7   : > { %3163 = vmatprep.subr.msk.bf16.mxu1 %vm934_vm11, %v916_v44 }
 0x1ee   : > { %3153 = vmatpush3.bf16.xpose.msra.mxu1 %v942_v38 }
 0x1ef   : > { %3164 = vmatprep.subr.msk.bf16.mxu1 %vm934_vm11, %v915_v28 }
 0x1f6   : > { %3155 = vmatpush3.bf16.xpose.msra.mxu1 %v939_v18 }
 0x1f7   : > { %3165 = vmatprep.subr.msk.bf16.mxu1 %vm934_vm11, %v914_v36  ;;  %v924_v36 = vld [vmem:[%s5265_s6 + $0x20] sm:$0xff] }
 0x1fe   : > { %3157 = vmatpush3.bf16.xpose.msra.mxu1 %v936_v30 }
 0x203   : > { %v1295_v55 = vpop.f32.mrf.mxu0 }
 0x204   : > { %v1296_v56 = vadd.f32 %v1295_v55, %v1229_v26 }
 0x205   : > { %3159 = vmatmul.mubr.msk.bf16.vlgmr.msra.gmra.mxu1 %vm934_vm11, %v3260_v5  ;;  %v1297_v60 = vpop.f32.mrf.mxu0  ;;  %vm5328_vm11 = vcmask 523264  }
 0x206   : > { %1370 = vmatprep.mubr.bf16.mxu1 %v5293_v1  ;;  %v1318_v53 = vpack.c.bf16 %v1296_v56, %v1296_v56  ;;  %v1298_v40 = vadd.f32 %v1297_v60, %v1230_v22 }
 0x208   : > { %v1333_v17 = vsel %vm1254_vm6, %v1318_v53, 0  ;;  %v1319_v11 = vpack.c.bf16 %v1298_v40, %v1298_v40 }
 0x20a   : > { %3099 = vmatprep.subr.msk.bf16.mxu1 %vm1254_vm6, %v1319_v11 }
 0x20b   : > { %1353 = vmatpush1.bf16.msra.mxu1 %v1333_v17 }
 0x295   : > { %v3144_v16 = vpop.f32.mrf.mxu1 }
 0x296   : > { %v990_v57 = vadd.f32 %v3144_v16, %v922_v6 }
 0x297   : > { %v981_v24 = vpop.f32.mrf.mxu1 }
 0x298   : > { %v982_v29 = vadd.f32 %v981_v24, %v920_v20 }
 0x299   : > { %v3145_v13 = vpop.f32.mrf.mxu1 }
 0x29a   : > { %v993_v3 = vadd.f32 %v3145_v13, %v923_v15 }
 0x29b   : > { %v984_v50 = vpop.f32.mrf.mxu1 }
 0x29c   : > { %v1315_v39 = vpack.c.bf16 %v993_v3, %v990_v57  ;;  %v985_v41 = vadd.f32 %v984_v50, %v921_v47 }
 0x29e   : > { %v1314_v14 = vpack.c.bf16 %v985_v41, %v982_v29  ;;  %1591 = vrot.lane.b32.xlu1 %v1315_v39, %s3431_s15 }
 0x2a0   : > { %1589 = vrot.lane.b32.xlu0 %v1314_v14, %s3431_s15  ;;  %3100 = vmatmul.mubr.msk.bf16.vlgmr.msra.gmra.mxu1 %vm1247_vm1, %v1314_v14 }
 0x2a1   : > { %1380 = vmatprep.mubr.bf16.mxu1 %v5293_v1 }
 0x2a5   : > { %v3148_v21 = vpop.f32.mrf.mxu1 }
 0x2a6   : > { %v1006_v37 = vadd.f32 %v3148_v21, %v926_v45 }
 0x2a7   : > { %v997_v34 = vpop.f32.mrf.mxu1 }
 0x2a8   : > { %3101 = vmatmul.mubr.msk.bf16.gmra.mxu1 %vm1247_vm1, %v1315_v39  ;;  %v998_v46 = vadd.f32 %v997_v34, %v924_v36  ;;  %v4225_v34 = vld [vmem:[%s5270_s11 + $0x10] sm:$0xff] }
 0x2a9   : > { %v3149_v49 = vpop.f32.mrf.mxu1  ;;  %1390 = vmatprep.mubr.bf16.mxu1 %v5293_v1 }
 0x2aa   : > { %v1009_v25 = vadd.f32 %v3149_v49, %v927_v42  ;;  %v4230_v42 = vld [vmem:[%s5270_s11 + $0x18] sm:$0xff] }
 0x2ab   : > { %v1000_v28 = vpop.f32.mrf.mxu1 }
 0x2ac   : > { %v1317_v52 = vpack.c.bf16 %v1009_v25, %v1006_v37  ;;  %v1001_v48 = vadd.f32 %v1000_v28, %v925_v35  ;;  %v4237_v35 = vld [vmem:[%s5270_s11] sm:$0xff] }
 0x2ae   : > { %v1316_v62 = vpack.c.bf16 %v1001_v48, %v998_v46  ;;  %1595 = vrot.lane.b32.xlu1 %v1317_v52, %s3431_s15 }
 0x2b0   : > { %1593 = vrot.lane.b32.xlu0 %v1316_v62, %s3431_s15  ;;  %3102 = vmatmul.mubr.msk.bf16.gmra.mxu1 %vm1247_vm1, %v1316_v62 }
 0x2b1   : > { %1400 = vmatprep.mubr.bf16.mxu1 %v5293_v1 }
 0x2b2   : > { %1863 = vrot.lane.b32.xlu1 %v1315_v39, %s3429_s24 }
 0x2b4   : > { %1861 = vrot.lane.b32.xlu0 %v1314_v14, %s3429_s24 }
 0x2b6   : > { %1867 = vrot.lane.b32.xlu1 %v1317_v52, %s3429_s24 }
 0x2b8   : > { %1865 = vrot.lane.b32.xlu0 %v1316_v62, %s3429_s24  ;;  %3103 = vmatmul.mubr.msk.bf16.gmra.mxu1 %vm1247_vm1, %v1317_v52 }
 0x2b9   : > { %1850 = vmatprep.mubr.bf16.mxu1 %v5293_v1 }
 0x2ba   : > { %2135 = vrot.lane.b32.xlu1 %v1315_v39, %s3432_s22 }
 0x2bc   : > { %2133 = vrot.lane.b32.xlu0 %v1314_v14, %s3432_s22 }
 0x2be   : > { %2139 = vrot.lane.b32.xlu1 %v1317_v52, %s3432_s22 }
 0x2c0   : > { %2137 = vrot.lane.b32.xlu0 %v1316_v62, %s3432_s22  ;;  %s5367_s22 = smov 113  }
 0x2c2   : > { %2424 = vperm.xlu1 %3219, %v4230_v42  }
 0x2c4   : > { %2419 = vperm.xlu0 %3218, %v4225_v34  }
 0x2c5   : > { %v4176_v44 = vpop.f32.mrf.mxu1 }
 0x2c6   : > { %5350 = vst [vmem:[#allocation3_spill] sm:$0xff] %v4176_v44  ;;  %3220 = vset.pattern.permute.xlu1 %v5293_v1 }
 0x2c7   : > { %v4181_v58 = vpop.f32.mrf.mxu1  ;;  %2476 = vperm.xlu1 %3220, %v4225_v34  }
 0x2c8   : > { %2409 = vperm.xlu0 %3218, %v4237_v35  }
 0x2c9   : > { %v4185_v31 = vpop.f32.mrf.mxu1 }
 0x2ca   : > { %5351 = vst [vmem:[#allocation4_spill] sm:$0xff] %v4185_v31 }
 0x2cb   : > { %v4187_v32 = vpop.f32.mrf.mxu1  ;;  %3221 = vset.pattern.permute.xlu1 %v3416_v4 }
 0x2cc   : > { %3222 = vset.pattern.permute.xlu0 %v5293_v1  ;;  %2540 = vperm.xlu1 %3221, %v4225_v34  }
 0x2cd   : > { %2480 = vperm.xlu0 %3222, %v4230_v42  }
 0x2d0   : > { %2544 = vperm.xlu1 %3221, %v4230_v42  }
 0x2d4   : > { %3223 = vset.pattern.permute.xlu1 %v3415_v2 }
 0x360   : > { %v1372_v8 = vpop.f32.mrf.mxu1 }
 0x362   : > { %v4189_v12 = vpop.f32.mrf.mxu1 }
 0x364   : > { %v1376_v10 = vpop.f32.mrf.mxu1 }
 0x366   : > { %v4191_v23 = vpop.f32.mrf.mxu1 }
 0x368   : > { %v1382_v38 = vpop.f32.mrf.mxu1 }
 0x369   : > { %v1411_v53 = vmax.f32 %v1372_v8, %v1382_v38 }
 0x36a   : > { %v4193_v18 = vpop.f32.mrf.mxu1 }
 0x36b   : > { %v1424_v11 = vmax.f32 %v4189_v12, %v4193_v18 }
 0x36c   : > { %v1386_v30 = vpop.f32.mrf.mxu1 }
 0x36d   : > { %v1412_v40 = vmax.f32 %v1376_v10, %v1386_v30 }
 0x36e   : > { %v4195_v5 = vpop.f32.mrf.mxu1 }
 0x36f   : > { %v1425_v16 = vmax.f32 %v4191_v23, %v4195_v5 }
 0x370   : > { %v1392_v26 = vpop.f32.mrf.mxu1 }
 0x371   : > { %v1413_v6 = vmax.f32 %v1411_v53, %v1392_v26 }
 0x372   : > { %v4197_v55 = vpop.f32.mrf.mxu1 }
 0x373   : > { %v1426_v20 = vmax.f32 %v1424_v11, %v4197_v55 }
 0x374   : > { %v4199_v22 = vpop.f32.mrf.mxu1 }
 0x375   : > { %v1414_v24 = vmax.f32 %v1412_v40, %v4199_v22 }
 0x376   : > { %v4201_v56 = vpop.f32.mrf.mxu1 }
 0x377   : > { %v1427_v13 = vmax.f32 %v1425_v16, %v4201_v56 }
 0x378   : > { %v4203_v60 = vpop.f32.mrf.mxu1 }
 0x379   : > { %v1415_v47 = vmax.f32 %v1413_v6, %v4203_v60 }
 0x37a   : > { %v4205_v17 = vpop.f32.mrf.mxu1 }
 0x37b   : > { %v1428_v50 = vmax.f32 %v1426_v20, %v4205_v17 }
 0x37c   : > { %v4212_v15 = vpop.f32.mrf.mxu1 }
 0x37d   : > { %v1416_v57 = vmax.f32 %v1414_v24, %v4212_v15 }
 0x37e   : > { %v4218_v3 = vpop.f32.mrf.mxu1 }
 0x37f   : > { %v1417_v29 = vmax.f32 %v1415_v47, %v1416_v57  ;;  %v1429_v39 = vmax.f32 %v1427_v13, %v4218_v3 }
 0x381   : > { %v1418_v41 = vrot.slane %v1417_v29, 4  ;;  %v1430_v14 = vmax.f32 %v1428_v50, %v1429_v39 }
 0x383   : > { %v1419_v21 = vmax.f32 %v1417_v29, %v1418_v41  ;;  %v1431_v45 = vrot.slane %v1430_v14, 4 }
 0x385   : > { %v1420_v36 = vrot.slane %v1419_v21, 2  ;;  %v1432_v49 = vmax.f32 %v1430_v14, %v1431_v45 }
 0x387   : > { %v1421_v37 = vmax.f32 %v1419_v21, %v1420_v36  ;;  %v1433_v25 = vrot.slane %v1432_v49, 2 }
 0x389   : > { %v1422_v28 = vrot.slane %v1421_v37, 1  ;;  %v1434_v46 = vmax.f32 %v1432_v49, %v1433_v25 }
 0x38b   : > { %v1423_v52 = vmax.f32 %v1421_v37, %v1422_v28  ;;  %v1435_v48 = vrot.slane %v1434_v46, 1  ;;  %v5352_v37 = vmov 3  }
 0x38d   : > { %v1437_v62 = vsub.f32 %v1372_v8, %v1423_v52  ;;  %v1439_v19 = vsub.f32 %v1376_v10, %v1423_v52  ;;  %v1441_v53 = vsub.f32 %v1382_v38, %v1423_v52  ;;  %v1443_v40 = vsub.f32 %v1386_v30, %v1423_v52  ;;  %v4252_v30 = vld [vmem:[%s5270_s11 + $0x8] sm:$0xff] }
 0x38e   : > { %v1445_v11 = vsub.f32 %v1392_v26, %v1423_v52  ;;  %v1436_v24 = vmax.f32 %v1434_v46, %v1435_v48  ;;  %v1447_v20 = vsub.f32 %v4199_v22, %v1423_v52  ;;  %v1449_v26 = vsub.f32 %v4203_v60, %v1423_v52  ;;  %2472 = vperm.xlu0 %3222, %v4252_v30  }
 0x38f   : > { %v1453_v16 = vmul.f32 1.442695, %v1437_v62  ;;  %v1457_v6 = vmul.f32 1.442695, %v1439_v19  ;;  %v1461_v13 = vmul.f32 1.442695, %v1441_v53  ;;  %v1451_v57 = vsub.f32 %v4212_v15, %v1423_v52  ;;  %2414 = vperm.xlu1 %3223, %v4252_v30  }
 0x390   : > { %v1438_v8 = vsub.f32 %v4189_v12, %v1436_v24  ;;  %v1465_v10 = vmul.f32 1.442695, %v1443_v40  ;;  %v1440_v38 = vsub.f32 %v4191_v23, %v1436_v24  ;;  %v1469_v47 = vmul.f32 1.442695, %v1445_v11 }
 0x391   : > { %3262 = vpow2.f32 %v1453_v16  ;;  %v1473_v22 = vmul.f32 1.442695, %v1447_v20  ;;  %v1442_v12 = vsub.f32 %v4193_v18, %v1436_v24  ;;  %v1444_v23 = vsub.f32 %v4195_v5, %v1436_v24 }
 0x392   : > { %3264 = vpow2.f32 %v1457_v6  ;;  %v1455_v50 = vmul.f32 1.442695, %v1438_v8  ;;  %v1459_v29 = vmul.f32 1.442695, %v1440_v38  ;;  %v1477_v39 = vmul.f32 1.442695, %v1449_v26  ;;  %3226 = vset.pattern.permute.xlu0 %v3416_v4 }
 0x393   : > { %3266 = vpow2.f32 %v1461_v13  ;;  %v1446_v60 = vsub.f32 %v4197_v55, %v1436_v24  ;;  %v1463_v41 = vmul.f32 1.442695, %v1442_v12  ;;  %2532 = vperm.xlu0 %3226, %v4237_v35   ;;  %v1481_v18 = vmul.f32 1.442695, %v1451_v57  ;;  %3224 = vset.pattern.permute.xlu1 %v5293_v1 }
 0x394   : > { %3268 = vpow2.f32 %v1465_v10  ;;  %v1448_v15 = vsub.f32 %v4201_v56, %v1436_v24  ;;  %v1467_v5 = vmul.f32 1.442695, %v1444_v23  ;;  %v1450_v14 = vsub.f32 %v4205_v17, %v1436_v24  ;;  %2468 = vperm.xlu1 %3224, %v4237_v35  }
 0x395   : > { %3270 = vpow2.f32 %v1469_v47  ;;  %v1471_v2 = vmul.f32 1.442695, %v1446_v60  ;;  %v1452_v56 = vsub.f32 %v4218_v3, %v1436_v24  ;;  %v5353_v8 = vmov 5  }
 0x396   : > { %3272 = vpow2.f32 %v1473_v22  ;;  %v1475_v21 = vmul.f32 1.442695, %v1448_v15  ;;  %v1479_v36 = vmul.f32 1.442695, %v1450_v14 }
 0x397   : > { %3274 = vpow2.f32 %v1455_v50  ;;  %3229 = vset.pattern.permute.xlu0 %v3418_v9  ;;  %v1483_v28 = vmul.f32 1.442695, %v1452_v56 }
 0x398   : > { %3276 = vpow2.f32 %v1459_v29  ;;  %2596 = vperm.xlu0 %3229, %v4237_v35   ;;  %3225 = vset.pattern.permute.xlu1 %v3418_v9 }
 0x399   : > { %3278 = vpow2.f32 %v1477_v39  ;;  %2604 = vperm.xlu1 %3225, %v4225_v34  }
 0x39a   : > { %3280 = vpow2.f32 %v1463_v41  ;;  %v5354_v41 = vmov 6  }
 0x39b   : > { %3282 = vpow2.f32 %v1481_v18 }
 0x39c   : > { %3284 = vpow2.f32 %v1467_v5  ;;  %3230 = vset.pattern.permute.xlu0 %v5352_v37 }
 0x39d   : > { %3286 = vpow2.f32 %v1471_v2  ;;  %2672 = vperm.xlu0 %3230, %v4230_v42   ;;  %2608 = vperm.xlu1 %3225, %v4230_v42  }
 0x39e   : > { %v4271_v55 = vpop.eup %3262  ;;  %3288 = vpow2.f32 %v1475_v21 }
 0x39f   : > { %v4274_v45 = vpop.eup %3264  ;;  %3290 = vpow2.f32 %v1479_v36  ;;  %v5355_v36 = vmov 7  }
 0x3a0   : > { %v1485_v17 = vadd.f32 %v4274_v45, %v4271_v55  ;;  %v4278_v49 = vpop.eup %3266  ;;  %3292 = vpow2.f32 %v1483_v28  ;;  %v5356_v28 = vmov 8  }
 0x3a1   : > { %v4285_v3 = vpop.eup %3268  ;;  %2660 = vperm.xlu0 %3230, %v4237_v35   ;;  %3227 = vset.pattern.permute.xlu1 %v3416_v4 }
 0x3a2   : > { %v1486_v25 = vadd.f32 %v4278_v49, %v1485_v17  ;;  %v4287_v46 = vpop.eup %3270  ;;  %2536 = vperm.xlu1 %3227, %v4252_v30  }
 0x3a3   : > { %v4290_v48 = vpop.eup %3272 }
 0x3a4   : > { %v1487_v52 = vadd.f32 %v4285_v3, %v1486_v25  ;;  %v4292_v62 = vpop.eup %3274 }
 0x3a5   : > { %v4297_v53 = vpop.eup %3276  ;;  %3233 = vset.pattern.permute.xlu0 %v5353_v8 }
 0x3a6   : > { %v1488_v19 = vadd.f32 %v4287_v46, %v1487_v52  ;;  %v4299_v40 = vpop.eup %3278  ;;  %v1498_v16 = vadd.f32 %v4297_v53, %v4292_v62  ;;  %2736 = vperm.xlu0 %3233, %v4230_v42   ;;  %3228 = vset.pattern.permute.xlu1 %v5352_v37 }
 0x3a7   : > { %v4304_v6 = vpop.eup %3280  ;;  %2668 = vperm.xlu1 %3228, %v4225_v34  }
 0x3a8   : > { %v1489_v11 = vadd.f32 %v4290_v48, %v1488_v19  ;;  %v3283_v24 = vpop.eup %3282  ;;  %v1499_v13 = vadd.f32 %v4304_v6, %v1498_v16 }
 0x3a9   : > { %v4310_v10 = vpop.eup %3284 }
 0x3aa   : > { %v1490_v20 = vadd.f32 %v4299_v40, %v1489_v11  ;;  %v1500_v26 = vadd.f32 %v4310_v10, %v1499_v13  ;;  %v3287_v47 = vpop.eup %3286  ;;  %2724 = vperm.xlu0 %3233, %v4237_v35  }
 0x3ab   : > { %v3289_v57 = vpop.eup %3288  ;;  %3231 = vset.pattern.permute.xlu1 %v3418_v9 }
 0x3ac   : > { %v1491_v38 = vadd.f32 %v3283_v24, %v1490_v20  ;;  %v1501_v12 = vadd.f32 %v3287_v47, %v1500_v26  ;;  %v3291_v23 = vpop.eup %3290  ;;  %2600 = vperm.xlu1 %3231, %v4252_v30  }
 0x3ad   : > { %v3293_v60 = vpop.eup %3292 }
 0x3ae   : > { %v1492_v22 = vrot.slane %v1491_v38, 4  ;;  %v1502_v50 = vadd.f32 %v3289_v57, %v1501_v12  ;;  %3236 = vset.pattern.permute.xlu0 %v5354_v41 }
 0x3af   : > { %2800 = vperm.xlu0 %3236, %v4230_v42  }
 0x3b0   : > { %v1493_v4 = vadd.f32 %v1492_v22, %v1491_v38  ;;  %v1503_v39 = vadd.f32 %v3291_v23, %v1502_v50  ;;  %3232 = vset.pattern.permute.xlu1 %v5353_v8 }
 0x3b1   : > { %2732 = vperm.xlu1 %3232, %v4225_v34  }
 0x3b2   : > { %v1494_v29 = vrot.slane %v1493_v4, 2  ;;  %v1504_v15 = vadd.f32 %v3293_v60, %v1503_v39 }
 0x3b3   : > { %2788 = vperm.xlu0 %3236, %v4237_v35  }
 0x3b4   : > { %v1495_v18 = vadd.f32 %v1494_v29, %v1493_v4  ;;  %v1505_v14 = vrot.slane %v1504_v15, 4 }
 0x3b5   : > { %3234 = vset.pattern.permute.xlu1 %v5352_v37 }
 0x3b6   : > { %v1496_v5 = vrot.slane %v1495_v18, 1  ;;  %v1506_v56 = vadd.f32 %v1505_v14, %v1504_v15  ;;  %2664 = vperm.xlu1 %3234, %v4252_v30  }
 0x3b7   : > { %3239 = vset.pattern.permute.xlu0 %v5355_v36 }
 0x3b8   : > { %v1497_v2 = vadd.f32 %v1496_v5, %v1495_v18  ;;  %v1507_v21 = vrot.slane %v1506_v56, 2  ;;  %2864 = vperm.xlu0 %3239, %v4230_v42  }
 0x3ba   : > { %3294 = vrcp.f32 %v1497_v2  ;;  %v1508_v17 = vadd.f32 %v1507_v21, %v1506_v56  ;;  %3235 = vset.pattern.permute.xlu1 %v5354_v41 }
 0x3bb   : > { %2796 = vperm.xlu1 %3235, %v4225_v34  }
 0x3bc   : > { %v1509_v9 = vrot.slane %v1508_v17, 1  ;;  %2852 = vperm.xlu0 %3239, %v4237_v35  }
 0x3be   : > { %v1510_v25 = vadd.f32 %v1509_v9, %v1508_v17 }
 0x3bf   : > { %3237 = vset.pattern.permute.xlu1 %v5353_v8 }
 0x3c0   : > { %3296 = vrcp.f32 %v1510_v25  ;;  %3242 = vset.pattern.permute.xlu0 %v5356_v28  ;;  %2728 = vperm.xlu1 %3237, %v4252_v30  }
 0x3c1   : > { %2928 = vperm.xlu0 %3242, %v4230_v42  }
 0x3c4   : > { %3238 = vset.pattern.permute.xlu1 %v5355_v36 }
 0x3c5   : > { %2920 = vperm.xlu0 %3242, %v4252_v30   ;;  %2860 = vperm.xlu1 %3238, %v4225_v34  }
 0x3c7   : > { %v3295_v52 = vpop.eup %3294 }
 0x3c8   : > { %v1513_v19 = vmul.f32 %v3295_v52, %v4271_v55  ;;  %v1515_v37 = vmul.f32 %v3295_v52, %v4274_v45  ;;  %v1525_v20 = vmul.f32 %v3295_v52, %v4299_v40  ;;  %v1527_v42 = vmul.f32 %v3295_v52, %v3283_v24  ;;  %v1299_v24 = vpop.f32.mrf.mxu0 }
 0x3c9   : > { %3240 = vset.pattern.permute.xlu1 %v5354_v41  ;;  %v1521_v22 = vmul.f32 %v3295_v52, %v4287_v46  ;;  %v1523_v12 = vmul.f32 %v3295_v52, %v4290_v48 }
 0x3ca   : > { %v1530_v11 = vpack.c.bf16 %v1515_v37, %v1513_v19  ;;  %v1536_v45 = vpack.c.bf16 %v1527_v42, %v1525_v20  ;;  %2792 = vperm.xlu1 %3240, %v4252_v30  }
 0x3cd   : > { %v3297_v16 = vpop.eup %3296 }
 0x3ce   : > { %v1526_v13 = vmul.f32 %v3297_v16, %v3291_v23  ;;  %v1528_v38 = vmul.f32 %v3297_v16, %v3293_v60  ;;  %v1522_v8 = vmul.f32 %v3297_v16, %v3287_v47  ;;  %v1524_v26 = vmul.f32 %v3297_v16, %v3289_v57  ;;  %3241 = vset.pattern.permute.xlu1 %v5356_v28 }
 0x3cf   : > { %v1518_v50 = vmul.f32 %v3297_v16, %v4304_v6  ;;  %v1520_v40 = vmul.f32 %v3297_v16, %v4310_v10  ;;  %v1534_v47 = vpack.c.bf16 %v1523_v12, %v1521_v22  ;;  %v1517_v57 = vmul.f32 %v3295_v52, %v4278_v49  ;;  %2924 = vperm.xlu1 %3241, %v4225_v34   ;;  %v1231_v6 = vld [vmem:[%s5269_s10 + $0x10] sm:$0xff]  ;;  %v1232_v10 = vld [vmem:[%s5269_s10 + $0x18] sm:$0xff]  ;;  %v1301_v49 = vpop.f32.mrf.mxu0 }
 0x3d0   : > { %v1537_v55 = vpack.c.bf16 %v1528_v38, %v1526_v13  ;;  %v1535_v4 = vpack.c.bf16 %v1524_v26, %v1522_v8  ;;  %v1519_v23 = vmul.f32 %v3295_v52, %v4285_v3  ;;  %v1514_v48 = vmul.f32 %v3297_v16, %v4292_v62  ;;  %v1016_v3 = vld [vmem:[%s5266_s7] sm:$0xff] }
 0x3d1   : > { %v1533_v46 = vpack.c.bf16 %v1520_v40, %v1518_v50  ;;  %v1516_v29 = vmul.f32 %v3297_v16, %v4297_v53  ;;  %v1300_v39 = vadd.f32 %v1299_v24, %v1231_v6  ;;  %v1302_v53 = vadd.f32 %v1301_v49, %v1232_v10  ;;  %v4392_v25 = vpop.f32.mrf.mxu0 }
 0x3d2   : > { %1550 = vmatprep.subr.bf16.mxu0 %v1537_v55  ;;  %v1532_v62 = vpack.c.bf16 %v1519_v23, %v1517_v57  ;;  %v1071_v34 = vadd.f32 %v4181_v58, %v1016_v3  ;;  %v1590_v58 = vpop.permute.xlu0 %1589 }
 0x3d3   : > { %1551 = vmatpush1.bf16.msra.mxu0 %v1536_v45  ;;  %v1531_v60 = vpack.c.bf16 %v1516_v29, %v1514_v48  ;;  %3243 = vset.pattern.permute.xlu1 %v5355_v36  ;;  %v1583_v41 = vpack.c.bf16 %v1300_v39, %v1300_v39  ;;  %v1584_v18 = vpack.c.bf16 %v1302_v53, %v1302_v53  ;;  %v4396_v52 = vpop.f32.mrf.mxu0 }
 0x3d4   : > { %1552 = vmatprep.subr.bf16.mxu0 %v1535_v4  ;;  %2856 = vperm.xlu1 %3243, %v4252_v30   ;;  %v1529_v15 = vpack.c.bf16 %v1071_v34, %v1071_v34  ;;  %v1592_v30 = vpop.permute.xlu1 %1591 }
 0x3d5   : > { %v1610_v5 = vsel %vm1254_vm6, %v1583_v41, 0 }
 0x3d6   : > { %v1594_v14 = vpop.permute.xlu0 %1593 }
 0x3d7   : > { %1553 = vmatpush1.bf16.msra.mxu0 %v1534_v47 }
 0x3d8   : > { %1554 = vmatprep.subr.bf16.mxu0 %v1533_v46  ;;  %3244 = vset.pattern.permute.xlu1 %v5356_v28 }
 0x3d9   : > { %2916 = vperm.xlu1 %3244, %v4237_v35   ;;  %v1596_v35 = vpop.permute.xlu1 %1595 }
 0x3da   : > { %v4380_v2 = vpop.permute.xlu0 %1861 }
 0x3db   : > { %1555 = vmatpush1.bf16.msra.mxu0 %v1532_v62 }
 0x3dc   : > { %1556 = vmatprep.subr.bf16.mxu0 %v1531_v60 }
 0x3dd   : > { %v4382_v56 = vpop.permute.xlu1 %1863 }
 0x3de   : > { %v4384_v21 = vpop.permute.xlu0 %1865 }
 0x3df   : > { %1557 = vmatpush1.bf16.msra.mxu0 %v1530_v11  ;;  %v4402_v11 = vpop.f32.mrf.mxu0 }
 0x3e0   : > { %3105 = vmatprep.subr.msk.bf16.mxu0 %vm1254_vm6, %v1584_v18 }
 0x3e1   : > { %v4386_v17 = vpop.permute.xlu1 %1867  ;;  %v4406_v20 = vpop.f32.mrf.mxu0 }
 0x3e2   : > { %3104 = vmatmul.mubr.msk.bf16.vlgmr.msra.gmra.mxu0 %vm5328_vm11, %v1529_v15  ;;  %v4388_v36 = vpop.permute.xlu0 %2133 }
 0x3e3   : > { %1630 = vmatpush1.bf16.msra.mxu0 %v1610_v5  ;;  %1647 = vmatprep.mubr.bf16.mxu0 %v5293_v1  ;;  %5357 = vst [vmem:[#allocation5_spill] sm:$0xff] %v4388_v36 }
 0x3e5   : > { %v4390_v9 = vpop.permute.xlu1 %2135 }
 0x3e6   : > { %5358 = vst [vmem:[#allocation6_spill] sm:$0xff] %v4390_v9  ;;  %v4394_v28 = vpop.permute.xlu0 %2137 }
 0x3e7   : > { %5359 = vst [vmem:[#allocation7_spill] sm:$0xff] %v4394_v28 }
 0x3e9   : > { %v4398_v19 = vpop.permute.xlu1 %2139 }
 0x3ea   : > { %3106 = vmatmul.mubr.msk.bf16.vlgmr.msra.gmra.mxu0 %vm1247_vm1, %v1590_v58  ;;  %5360 = vst [vmem:[#allocation8_spill] sm:$0xff] %v4398_v19  ;;  %v4400_v37 = vpop.permute.xlu0 %2419 }
 0x3eb   : > { %1657 = vmatprep.mubr.bf16.mxu0 %v5293_v1  ;;  %5361 = vst [vmem:[#allocation9_spill] sm:$0xff] %v4400_v37 }
 0x3ed   : > { %v4404_v16 = vpop.permute.xlu1 %2424 }
 0x3ee   : > { %5362 = vst [vmem:[#allocation10_spill] sm:$0xff] %v4404_v16  ;;  %v4408_v42 = vpop.permute.xlu0 %2409 }
 0x3f1   : > { %v4412_v38 = vpop.permute.xlu1 %2476 }
 0x3f2   : > { %3107 = vmatmul.mubr.msk.bf16.gmra.mxu0 %vm1247_vm1, %v1592_v30  ;;  %5363 = vst [vmem:[#allocation11_spill] sm:$0xff] %v4412_v38  ;;  %v4471_v39 = vpop.permute.xlu0 %2480 }
 0x3f3   : > { %1667 = vmatprep.mubr.bf16.mxu0 %v5293_v1  ;;  %5370 = vst [vmem:[#allocation16_spill] sm:$0xff] %v4471_v39 }
 0x3f5   : > { %v4421_v22 = vpop.permute.xlu1 %2540 }
 0x3f6   : > { %5364 = vst [vmem:[#allocation12_spill] sm:$0xff] %v4421_v22 }
 0x3f9   : > { %v4435_v40 = vpop.permute.xlu1 %2544 }
 0x3fa   : > { %3108 = vmatmul.mubr.msk.bf16.gmra.mxu0 %vm1247_vm1, %v1594_v14  ;;  %5366 = vst [vmem:[#allocation13_spill] sm:$0xff] %v4435_v40 }
 0x3fb   : > { %1677 = vmatprep.mubr.bf16.mxu0 %v5293_v1 }
 0x402   : > { %3109 = vmatmul.mubr.msk.bf16.gmra.mxu0 %vm1247_vm1, %v1596_v35 }
 0x403   : > { %2122 = vmatprep.mubr.bf16.mxu0 %v5293_v1 }
 0x409   : > { %v4491_v1 = vpop.permute.xlu0 %2472 }
 0x40a   : > { %v4446_v23 = vpop.permute.xlu1 %2414  ;;  %5372 = vst [vmem:[#allocation18_spill] sm:$0xff] %v4491_v1 }
 0x40b   : > { %5368 = vst [vmem:[#allocation14_spill] sm:$0xff] %v4446_v23 }
 0x40f   : > { %v4461_v6 = vpop.permute.xlu1 %2468 }
 0x414   : > { %v4469_v62 = vpop.permute.xlu1 %2604 }
 0x415   : > { %5369 = vst [vmem:[#allocation15_spill] sm:$0xff] %v4469_v62 }
 0x4a2   : > { %v1576_v13 = vpop.f32.mrf.mxu0 }
 0x4a3   : > { %2499 = vrot.lane.b32.xlu0 %v1576_v13, %s3419_s19  ;;  %2435 = vrot.lane.b32.xlu1 %v1576_v13, %s3417_s18  ;;  %v4415_v8 = vmul.f32 %v4408_v42, %v1576_v13 }
 0x4a4   : > { %v4417_v26 = vpop.f32.mrf.mxu0 }
 0x4a6   : > { %v1580_v55 = vpop.f32.mrf.mxu0 }
 0x4a7   : > { %2883 = vrot.lane.b32.xlu0 %v1576_v13, %s3430_s27  ;;  %2563 = vrot.lane.b32.xlu1 %v1576_v13, %s3421_s20 }
 0x4a8   : > { %v1581_v45 = vpop.f32.mrf.mxu0 }
 0x4a9   : > { %v4489_v45 = vpop.permute.xlu1 %2608 }
 0x4aa   : > { %v4423_v12 = vpop.f32.mrf.mxu0  ;;  %5371 = vst [vmem:[#allocation17_spill] sm:$0xff] %v4489_v45 }
 0x4ab   : > { %2627 = vrot.lane.b32.xlu1 %v1576_v13, %s3423_s21  ;;  %2443 = vrot.lane.b32.xlu0 %v4417_v26, %s3417_s18 }
 0x4ac   : > { %v4428_v4 = vpop.f32.mrf.mxu0 }
 0x4ad   : > { %v4497_v22 = vpop.permute.xlu1 %2536 }
 0x4ae   : > { %v4430_v50 = vpop.f32.mrf.mxu0  ;;  %5373 = vst [vmem:[#allocation19_spill] sm:$0xff] %v4497_v22 }
 0x4af   : > { %2691 = vrot.lane.b32.xlu1 %v1576_v13, %s5365_s14  ;;  %2507 = vrot.lane.b32.xlu0 %v4417_v26, %s3419_s19 }
 0x4b0   : > { %v4437_v24 = vpop.f32.mrf.mxu0 }
 0x4b1   : > { %v4501_v19 = vpop.permute.xlu1 %2668 }
 0x4b2   : > { %v4439_v47 = vpop.f32.mrf.mxu0  ;;  %5374 = vst [vmem:[#allocation20_spill] sm:$0xff] %v4501_v19 }
 0x4b3   : > { %2755 = vrot.lane.b32.xlu1 %v1576_v13, %s5367_s22  ;;  %2571 = vrot.lane.b32.xlu0 %v4417_v26, %s3421_s20  ;;  %v1688_v60 = vmax.f32 %v4423_v12, %v4439_v47 }
 0x4b4   : > { %v4444_v57 = vpop.f32.mrf.mxu0 }
 0x4b5   : > { %v1701_v18 = vmax.f32 %v4428_v4, %v4444_v57 }
 0x4b6   : > { %v4448_v46 = vpop.f32.mrf.mxu0 }
 0x4b7   : > { %2819 = vrot.lane.b32.xlu1 %v1576_v13, %s3429_s24  ;;  %2635 = vrot.lane.b32.xlu0 %v4417_v26, %s3423_s21  ;;  %v1689_v34 = vmax.f32 %v4430_v50, %v4448_v46 }
 0x4b8   : > { %v4453_v48 = vpop.f32.mrf.mxu0 }
 0x4b9   : > { %v1702_v15 = vmax.f32 %v4437_v24, %v4453_v48 }
 0x4ba   : > { %v4455_v29 = vpop.f32.mrf.mxu0 }
 0x4bb   : > { %2763 = vrot.lane.b32.xlu1 %v4417_v26, %s5367_s22  ;;  %2699 = vrot.lane.b32.xlu0 %v4417_v26, %s5365_s14  ;;  %v1690_v5 = vmax.f32 %v1688_v60, %v4455_v29 }
 0x4bc   : > { %v4463_v10 = vpop.f32.mrf.mxu0 }
 0x4bd   : > { %v1703_v14 = vmax.f32 %v1701_v18, %v4463_v10 }
 0x4be   : > { %v1673_v49 = vpop.f32.mrf.mxu0 }
 0x4bf   : > { %2827 = vrot.lane.b32.xlu0 %v4417_v26, %s3429_s24  ;;  %v1691_v58 = vmax.f32 %v1689_v34, %v1673_v49 }
 0x4c0   : > { %v4467_v3 = vpop.f32.mrf.mxu0 }
 0x4c1   : > { %v1704_v35 = vmax.f32 %v1702_v15, %v4467_v3  ;;  %v4499_v15 = vpop.permute.xlu0 %2532 }
 0x4c2   : > { %v4473_v53 = vpop.f32.mrf.mxu0 }
 0x4c3   : > { %v1692_v13 = vmax.f32 %v1690_v5, %v4473_v53 }
 0x4c4   : > { %v4479_v41 = vpop.f32.mrf.mxu0 }
 0x4c5   : > { %v1705_v40 = vmax.f32 %v1703_v14, %v4479_v41  ;;  %v4503_v14 = vpop.permute.xlu0 %2596 }
 0x4c6   : > { %v1683_v30 = vpop.f32.mrf.mxu0 }
 0x4c7   : > { %v1693_v55 = vmax.f32 %v1691_v58, %v1683_v30 }
 0x4c8   : > { %v4493_v43 = vpop.f32.mrf.mxu0 }
 0x4c9   : > { %v1694_v16 = vmax.f32 %v1692_v13, %v1693_v55  ;;  %v1706_v60 = vmax.f32 %v1704_v35, %v4493_v43 }
 0x4cb   : > { %v1695_v34 = vrot.slane %v1694_v16, 4  ;;  %v1707_v39 = vmax.f32 %v1705_v40, %v1706_v60 }
 0x4cd   : > { %v1696_v62 = vmax.f32 %v1694_v16, %v1695_v34  ;;  %v1708_v18 = vrot.slane %v1707_v39, 4 }
 0x4cf   : > { %v1697_v5 = vrot.slane %v1696_v62, 2  ;;  %v1709_v58 = vmax.f32 %v1707_v39, %v1708_v18 }
 0x4d1   : > { %v1698_v45 = vmax.f32 %v1696_v62, %v1697_v5  ;;  %v1710_v37 = vrot.slane %v1709_v58, 2  ;;  %v4512_v5 = vpop.permute.xlu0 %2672 }
 0x4d2   : > { %5376 = vst [vmem:[#allocation22_spill] sm:$0xff] %v4512_v5 }
 0x4d3   : > { %v1699_v38 = vrot.slane %v1698_v45, 1  ;;  %v1711_v31 = vmax.f32 %v1709_v58, %v1710_v37  ;;  %v4510_v37 = vpop.permute.xlu1 %2600 }
 0x4d4   : > { %5375 = vst [vmem:[#allocation21_spill] sm:$0xff] %v4510_v37 }
 0x4d5   : > { %v1700_v13 = vmax.f32 %v1698_v45, %v1699_v38  ;;  %v1712_v35 = vrot.slane %v1711_v31, 1 }
 0x4d7   : > { %v1714_v40 = vsub.f32 %v4423_v12, %v1700_v13  ;;  %v1716_v16 = vsub.f32 %v4430_v50, %v1700_v13  ;;  %v1718_v55 = vsub.f32 %v4439_v47, %v1700_v13  ;;  %v1720_v60 = vsub.f32 %v4448_v46, %v1700_v13 }
 0x4d8   : > { %v1722_v39 = vsub.f32 %v4455_v29, %v1700_v13  ;;  %v1713_v18 = vmax.f32 %v1711_v31, %v1712_v35  ;;  %v1724_v58 = vsub.f32 %v1673_v49, %v1700_v13  ;;  %v1726_v46 = vsub.f32 %v4473_v53, %v1700_v13  ;;  %v4520_v49 = vpop.permute.xlu0 %2660 }
 0x4d9   : > { %v1730_v62 = vmul.f32 1.442695, %v1714_v40  ;;  %v1734_v34 = vmul.f32 1.442695, %v1716_v16  ;;  %v1738_v38 = vmul.f32 1.442695, %v1718_v55  ;;  %v1728_v35 = vsub.f32 %v1683_v30, %v1700_v13  ;;  %v4518_v16 = vpop.permute.xlu1 %2732 }
 0x4da   : > { %v1715_v12 = vsub.f32 %v4428_v4, %v1713_v18  ;;  %v1742_v50 = vmul.f32 1.442695, %v1720_v60  ;;  %v1717_v47 = vsub.f32 %v4437_v24, %v1713_v18  ;;  %v1746_v45 = vmul.f32 1.442695, %v1722_v39  ;;  %5377 = vst [vmem:[#allocation23_spill] sm:$0xff] %v4518_v16 }
 0x4db   : > { %3298 = vpow2.f32 %v1730_v62  ;;  %v1750_v29 = vmul.f32 1.442695, %v1724_v58  ;;  %v1719_v31 = vsub.f32 %v4444_v57, %v1713_v18  ;;  %v1721_v4 = vsub.f32 %v4453_v48, %v1713_v18 }
 0x4dc   : > { %3300 = vpow2.f32 %v1734_v34  ;;  %v1732_v40 = vmul.f32 1.442695, %v1715_v12  ;;  %v1736_v55 = vmul.f32 1.442695, %v1717_v47  ;;  %v1754_v60 = vmul.f32 1.442695, %v1726_v46  ;;  %v4527_v62 = vpop.permute.xlu0 %2736 }
 0x4dd   : > { %3302 = vpow2.f32 %v1738_v38  ;;  %v1723_v24 = vsub.f32 %v4463_v10, %v1713_v18  ;;  %v1740_v53 = vmul.f32 1.442695, %v1719_v31  ;;  %v1758_v39 = vmul.f32 1.442695, %v1728_v35  ;;  %v4525_v13 = vpop.permute.xlu1 %2664  ;;  %5379 = vst [vmem:[#allocation25_spill] sm:$0xff] %v4527_v62 }
 0x4de   : > { %3304 = vpow2.f32 %v1742_v50  ;;  %v1725_v57 = vsub.f32 %v4467_v3, %v1713_v18  ;;  %v1744_v30 = vmul.f32 1.442695, %v1721_v4  ;;  %5378 = vst [vmem:[#allocation24_spill] sm:$0xff] %v4525_v13  ;;  %v1727_v48 = vsub.f32 %v4479_v41, %v1713_v18 }
 0x4df   : > { %3306 = vpow2.f32 %v1746_v45  ;;  %v1748_v34 = vmul.f32 1.442695, %v1723_v24  ;;  %v1729_v10 = vsub.f32 %v4493_v43, %v1713_v18 }
 0x4e0   : > { %3308 = vpow2.f32 %v1750_v29  ;;  %v1752_v38 = vmul.f32 1.442695, %v1725_v57  ;;  %v1756_v50 = vmul.f32 1.442695, %v1727_v48  ;;  %v4541_v41 = vpop.permute.xlu0 %2724 }
 0x4e1   : > { %3310 = vpow2.f32 %v1732_v40  ;;  %v4539_v46 = vpop.permute.xlu1 %2796  ;;  %v1760_v29 = vmul.f32 1.442695, %v1729_v10 }
 0x4e2   : > { %3312 = vpow2.f32 %v1736_v55  ;;  %5380 = vst [vmem:[#allocation26_spill] sm:$0xff] %v4539_v46 }
 0x4e3   : > { %3314 = vpow2.f32 %v1754_v60 }
 0x4e4   : > { %3316 = vpow2.f32 %v1740_v53  ;;  %v4558_v24 = vpop.permute.xlu0 %2800 }
 0x4e5   : > { %3318 = vpow2.f32 %v1758_v39  ;;  %v4556_v60 = vpop.permute.xlu1 %2728  ;;  %5382 = vst [vmem:[#allocation28_spill] sm:$0xff] %v4558_v24 }
 0x4e6   : > { %3320 = vpow2.f32 %v1744_v30  ;;  %5381 = vst [vmem:[#allocation27_spill] sm:$0xff] %v4556_v60 }
 0x4e7   : > { %3322 = vpow2.f32 %v1748_v34 }
 0x4e8   : > { %v4530_v58 = vpop.eup %3298  ;;  %3324 = vpow2.f32 %v1752_v38 }
 0x4e9   : > { %v4533_v12 = vpop.eup %3300  ;;  %3326 = vpow2.f32 %v1756_v50 }
 0x4ea   : > { %v1762_v3 = vadd.f32 %v4533_v12, %v4530_v58  ;;  %v4537_v47 = vpop.eup %3302  ;;  %3328 = vpow2.f32 %v1760_v29  ;;  %v4563_v29 = vpop.permute.xlu1 %2860 }
 0x4eb   : > { %v4544_v43 = vpop.eup %3304  ;;  %5383 = vst [vmem:[#allocation29_spill] sm:$0xff] %v4563_v29 }
 0x4ec   : > { %v1763_v45 = vadd.f32 %v4537_v47, %v1762_v3  ;;  %v4546_v18 = vpop.eup %3306 }
 0x4ed   : > { %v4549_v35 = vpop.eup %3308 }
 0x4ee   : > { %v1764_v31 = vadd.f32 %v4544_v43, %v1763_v45  ;;  %v4551_v40 = vpop.eup %3310  ;;  %v4567_v9 = vpop.permute.xlu1 %2792 }
 0x4ef   : > { %v4554_v55 = vpop.eup %3312  ;;  %5384 = vst [vmem:[#allocation30_spill] sm:$0xff] %v4567_v9 }
 0x4f0   : > { %v1765_v4 = vadd.f32 %v4546_v18, %v1764_v31  ;;  %v3315_v53 = vpop.eup %3314  ;;  %v1775_v57 = vadd.f32 %v4554_v55, %v4551_v40  ;;  %v4565_v31 = vpop.permute.xlu0 %2788 }
 0x4f1   : > { %v3317_v30 = vpop.eup %3316 }
 0x4f2   : > { %v1766_v39 = vadd.f32 %v4549_v35, %v1765_v4  ;;  %v3319_v48 = vpop.eup %3318  ;;  %v1776_v10 = vadd.f32 %v3317_v30, %v1775_v57  ;;  %v4571_v36 = vpop.permute.xlu1 %2924 }
 0x4f3   : > { %v3321_v38 = vpop.eup %3320  ;;  %5386 = vst [vmem:[#allocation32_spill] sm:$0xff] %v4571_v36 }
 0x4f4   : > { %v1767_v34 = vadd.f32 %v3315_v53, %v1766_v39  ;;  %v1777_v50 = vadd.f32 %v3321_v38, %v1776_v10  ;;  %v3323_v45 = vpop.eup %3322  ;;  %v4569_v39 = vpop.permute.xlu0 %2864 }
 0x4f5   : > { %v3325_v5 = vpop.eup %3324  ;;  %5385 = vst [vmem:[#allocation31_spill] sm:$0xff] %v4569_v39 }
 0x4f6   : > { %v1768_v3 = vadd.f32 %v3319_v48, %v1767_v34  ;;  %v1778_v24 = vadd.f32 %v3323_v45, %v1777_v50  ;;  %v3327_v16 = vpop.eup %3326 }
 0x4f7   : > { %v3329_v60 = vpop.eup %3328 }
 0x4f8   : > { %v1769_v62 = vrot.slane %v1768_v3, 4  ;;  %v1779_v4 = vadd.f32 %v3325_v5, %v1778_v24  ;;  %v4573_v50 = vpop.permute.xlu0 %2852 }
 0x4fa   : > { %v1770_v46 = vadd.f32 %v1769_v62, %v1768_v3  ;;  %v1780_v28 = vadd.f32 %v3327_v16, %v1779_v4  ;;  %v4575_v4 = vpop.permute.xlu1 %2856 }
 0x4fb   : > { %5387 = vst [vmem:[#allocation33_spill] sm:$0xff] %v4575_v4 }
 0x4fc   : > { %v1771_v19 = vrot.slane %v1770_v46, 2  ;;  %v1781_v34 = vadd.f32 %v3329_v60, %v1780_v28  ;;  %v4577_v22 = vpop.permute.xlu0 %2928 }
 0x4fd   : > { %5388 = vst [vmem:[#allocation34_spill] sm:$0xff] %v4577_v22 }
 0x4fe   : > { %v1772_v57 = vadd.f32 %v1771_v19, %v1770_v46  ;;  %v1782_v13 = vrot.slane %v1781_v34, 4  ;;  %v4579_v19 = vpop.permute.xlu1 %2916 }
 0x4ff   : > { %5389 = vst [vmem:[#allocation35_spill] sm:$0xff] %v4579_v19 }
 0x500   : > { %v1773_v10 = vrot.slane %v1772_v57, 1  ;;  %v1783_v37 = vadd.f32 %v1782_v13, %v1781_v34  ;;  %v4581_v28 = vpop.permute.xlu0 %2920 }
 0x501   : > { %5390 = vst [vmem:[#allocation36_spill] sm:$0xff] %v4581_v28 }
 0x502   : > { %v1774_v29 = vadd.f32 %v1773_v10, %v1772_v57  ;;  %v1784_v62 = vrot.slane %v1783_v37, 2 }
 0x504   : > { %3330 = vrcp.f32 %v1774_v29  ;;  %v1785_v24 = vadd.f32 %v1784_v62, %v1783_v37 }
 0x506   : > { %v1786_v3 = vrot.slane %v1785_v24, 1 }
 0x508   : > { %v1787_v9 = vadd.f32 %v1786_v3, %v1785_v24 }
 0x50a   : > { %3332 = vrcp.f32 %v1787_v9 }
 0x511   : > { %v3331_v46 = vpop.eup %3330 }
 0x512   : > { %v4584_v13 = vmul.f32 %v3331_v46, %v4530_v58  ;;  %v4587_v57 = vmul.f32 %v3331_v46, %v4533_v12  ;;  %v1802_v62 = vmul.f32 %v3331_v46, %v3315_v53  ;;  %v1804_v24 = vmul.f32 %v3331_v46, %v3319_v48 }
 0x513   : > { %v1798_v39 = vmul.f32 %v3331_v46, %v4546_v18  ;;  %v1800_v4 = vmul.f32 %v3331_v46, %v4549_v35 }
 0x514   : > { %v1813_v12 = vpack.c.bf16 %v1804_v24, %v1802_v62 }
 0x515   : > { %v2500_v29 = vpop.permute.xlu0 %2499  ;;  %v2436_v37 = vpop.permute.xlu1 %2435 }
 0x517   : > { %v3333_v10 = vpop.eup %3332 }
 0x518   : > { %v1803_v19 = vmul.f32 %v3333_v10, %v3327_v16  ;;  %v1805_v28 = vmul.f32 %v3333_v10, %v3329_v60  ;;  %v1799_v22 = vmul.f32 %v3333_v10, %v3323_v45  ;;  %v1801_v36 = vmul.f32 %v3333_v10, %v3325_v5 }
 0x519   : > { %v4591_v9 = vpop.permute.xlu0 %2883  ;;  %v2564_v3 = vpop.permute.xlu1 %2563  ;;  %v1795_v44 = vmul.f32 %v3333_v10, %v3317_v30  ;;  %v1797_v34 = vmul.f32 %v3333_v10, %v3321_v38  ;;  %v2428_v5 = vmul.f32 %v4408_v42, %v4417_v26  ;;  %v1796_v30 = vmul.f32 %v3331_v46, %v4544_v43 }
 0x51a   : > { %v1814_v58 = vpack.c.bf16 %v1805_v28, %v1803_v19  ;;  %v1812_v53 = vpack.c.bf16 %v1801_v36, %v1799_v22  ;;  %v1794_v22 = vmul.f32 %v3331_v46, %v4537_v47  ;;  %v1791_v42 = vmul.f32 %v3333_v10, %v4551_v40 }
 0x51b   : > { %v1810_v38 = vpack.c.bf16 %v1797_v34, %v1795_v44  ;;  %v1793_v28 = vmul.f32 %v3333_v10, %v4554_v55 }
 0x51c   : > { %1826 = vmatprep.subr.bf16.mxu1 %v1814_v58  ;;  %v1809_v34 = vpack.c.bf16 %v1796_v30, %v1794_v22 }
 0x51d   : > { %v2628_v1 = vpop.permute.xlu1 %2627  ;;  %v2444_v23 = vpop.permute.xlu0 %2443  ;;  %1827 = vmatpush1.bf16.msra.mxu1 %v1813_v12  ;;  %v1808_v12 = vpack.c.bf16 %v1793_v28, %v1791_v42 }
 0x51e   : > { %v2451_v48 = vsel %vm5325_vm0, %v2436_v37, %v2444_v23  ;;  %v2455_v16 = vsel %vm5325_vm0, %v2444_v23, %v2436_v37  ;;  %1828 = vmatprep.subr.bf16.mxu1 %v1812_v53  ;;  %v1811_v23 = vpack.c.bf16 %v1800_v4, %v1798_v39  ;;  %v1233_v37 = vld [vmem:[%s5269_s10 + $0x20] sm:$0xff]  ;;  %vm5391_vm0 = vcmp.ge.s32.totalorder %v3740_v51, 16 }
 0x51f   : > { %v2459_v18 = vsel %vm3767_vm3, %v2455_v16, 0.0  ;;  %v2460_v35 = vsel %vm3773_vm4, %v2451_v48, 0.0  ;;  %v1306_v4 = vadd.f32 %v4392_v25, %v1233_v37 }
 0x520   : > { %v2483_v60 = vmul.f32 %v4461_v6, %v2459_v18  ;;  %v2484_v36 = vmul.f32 %v4461_v6, %v2460_v35  ;;  %v1234_v6 = vld [vmem:[%s5269_s10 + $0x28] sm:$0xff] }
 0x521   : > { %v2692_v45 = vpop.permute.xlu1 %2691  ;;  %v2508_v19 = vpop.permute.xlu0 %2507  ;;  %1829 = vmatpush1.bf16.msra.mxu1 %v1811_v23  ;;  %v1308_v46 = vadd.f32 %v4396_v52, %v1234_v6  ;;  %v1859_v18 = vpack.c.bf16 %v1306_v4, %v1306_v4 }
 0x522   : > { %v2491_v47 = vadd.f32 %v2483_v60, %v4415_v8  ;;  %v2492_v62 = vadd.f32 %v2484_v36, %v2428_v5  ;;  %v2515_v44 = vsel %vm5326_vm5, %v2500_v29, %v2508_v19  ;;  %v2519_v43 = vsel %vm5326_vm5, %v2508_v19, %v2500_v29  ;;  %1830 = vmatprep.subr.bf16.mxu1 %v1810_v38  ;;  %v1017_v8 = vld [vmem:[%s5266_s7 + $0x8] sm:$0xff] }
 0x523   : > { %v2523_v40 = vsel %vm5391_vm0, %v2519_v43, 0.0  ;;  %v2548_v55 = vmul.f32 %v4499_v15, %v2515_v44  ;;  %vm5392_vm0 = vcmp.lt.s32.totalorder %v3740_v51, 15  ;;  %v1074_v52 = vadd.f32 %v4187_v32, %v1017_v8 }
 0x524   : > { %v2547_v39 = vmul.f32 %v4499_v15, %v2523_v40  ;;  %vm5393_vm5 = vmmov %vm5392_vm0  ;;  %v1860_v35 = vpack.c.bf16 %v1308_v46, %v1308_v46  ;;  %v5394_v32 = vpack.c.bf16 %v4587_v57, %v4584_v13  ;;  %v1882_v37 = vsel %vm1254_vm6, %v1859_v18, 0 }
 0x525   : > { %v2556_v10 = vadd.f32 %v2548_v55, %v2492_v62  ;;  %v2756_v29 = vpop.permute.xlu1 %2755  ;;  %v2572_v24 = vpop.permute.xlu0 %2571  ;;  %1831 = vmatpush1.bf16.msra.mxu1 %v1809_v34  ;;  %v1806_v19 = vpack.c.bf16 %v1074_v52, %v1074_v52  ;;  %v5399_v55 = vmov 0  }
 0x526   : > { %v2555_v58 = vadd.f32 %v2547_v39, %v2491_v47  ;;  %v2579_v53 = vsel %vm5392_vm0, %v2564_v3, %v2572_v24  ;;  %v2583_v15 = vsel %vm5393_vm5, %v2572_v24, %v2564_v3  ;;  %1832 = vmatprep.subr.bf16.mxu1 %v1808_v12  ;;  %vm5395_vm5 = vcmp.lt.s32.totalorder %v3740_v51, 113 }
 0x527   : > { %v2587_v48 = vsel %vm3833_vm9, %v2583_v15, 0.0  ;;  %v2588_v25 = vsel %vm3805_vm8, %v2579_v53, 0.0  ;;  %vm5396_vm0 = vmmov %vm5395_vm5 }
 0x528   : > { %v2611_v16 = vmul.f32 %v4503_v14, %v2587_v48  ;;  %v2612_v5 = vmul.f32 %v4503_v14, %v2588_v25 }
 0x529   : > { %v2820_v60 = vpop.permute.xlu1 %2819  ;;  %v2636_v36 = vpop.permute.xlu0 %2635  ;;  %1833 = vmatpush1.bf16.msra.mxu1 %v5394_v32 }
 0x52a   : > { %v2619_v22 = vadd.f32 %v2611_v16, %v2555_v58  ;;  %v2620_v3 = vadd.f32 %v2612_v5, %v2556_v10  ;;  %v2643_v30 = vsel %vm5327_vm10, %v2628_v1, %v2636_v36  ;;  %v2647_v23 = vsel %vm5327_vm10, %v2636_v36, %v2628_v1  ;;  %3111 = vmatprep.subr.msk.bf16.mxu1 %vm1254_vm6, %v1860_v35 }
 0x52b   : > { %v2651_v38 = vsel %vm3757_vm2, %v2647_v23, 0.0  ;;  %v2652_v14 = vsel %vm3773_vm4, %v2643_v30, 0.0  ;;  %vm5397_vm10 = vcmp.lt.s32.totalorder %v3740_v51, 127 }
 0x52c   : > { %v2675_v42 = vmul.f32 %v4520_v49, %v2651_v38  ;;  %v2676_v28 = vmul.f32 %v4520_v49, %v2652_v14  ;;  %3110 = vmatmul.mubr.msk.bf16.vlgmr.msra.gmra.mxu1 %vm5328_vm11, %v1806_v19  ;;  %vm5398_vm11 = vmmov %vm5397_vm10 }
 0x52d   : > { %v2764_v1 = vpop.permute.xlu1 %2763  ;;  %v2700_v6 = vpop.permute.xlu0 %2699  ;;  %1902 = vmatpush1.bf16.msra.mxu1 %v1882_v37  ;;  %1919 = vmatprep.mubr.bf16.mxu1 %v5399_v55 }
 0x52e   : > { %v2683_v13 = vadd.f32 %v2675_v42, %v2619_v22  ;;  %v2684_v57 = vadd.f32 %v2676_v28, %v2620_v3  ;;  %v2771_v47 = vsel %vm5395_vm5, %v2756_v29, %v2764_v1  ;;  %v2775_v62 = vsel %vm5396_vm0, %v2764_v1, %v2756_v29 }
 0x52f   : > { %v2779_v44 = vsel %vm3757_vm2, %v2771_v47, 0.0  ;;  %v2780_v49 = vsel %vm3940_vm15, %v2775_v62, 0.0  ;;  %v2707_v43 = vsel %vm5397_vm10, %v2692_v45, %v2700_v6  ;;  %v2711_v40 = vsel %vm5398_vm11, %v2700_v6, %v2692_v45 }
 0x530   : > { %v2715_v39 = vsel %vm3795_vm7, %v2707_v43, 0.0  ;;  %v2716_v8 = vsel %vm3805_vm8, %v2711_v40, 0.0  ;;  %v2803_v10 = vmul.f32 %v4565_v31, %v2779_v44  ;;  %v2804_v29 = vmul.f32 %v4565_v31, %v2780_v49 }
 0x531   : > { %v2739_v4 = vmul.f32 %v4541_v41, %v2715_v39  ;;  %v2740_v46 = vmul.f32 %v4541_v41, %v2716_v8  ;;  %v2828_v34 = vpop.permute.xlu0 %2827  ;;  %vm5401_vm10 = vcmask 523264   ;;  %vm5402_vm11 = vcmp.lt.s32.totalorder %v3740_v51, 17 }
 0x532   : > { %v2835_v45 = vsel %vm731_vm14, %v2820_v60, %v2828_v34  ;;  %v2839_v24 = vsel %vm731_vm14, %v2828_v34, %v2820_v60  ;;  %vm5403_vm5 = vmmov %vm5402_vm11 }
 0x533   : > { %v2747_v58 = vadd.f32 %v2739_v4, %v2683_v13  ;;  %v2748_v12 = vadd.f32 %v2740_v46, %v2684_v57  ;;  %v2844_v53 = vsel %vm696_vm13, %v2839_v24, 0.0  ;;  %v2867_v15 = vmul.f32 %v4573_v50, %v2835_v45 }
 0x534   : > { %v2868_v41 = vmul.f32 %v4573_v50, %v2844_v53  ;;  %3112 = vmatmul.mubr.msk.bf16.vlgmr.msra.gmra.mxu1 %vm1247_vm1, %v4380_v2 }
 0x535   : > { %v2811_v48 = vadd.f32 %v2803_v10, %v2747_v58  ;;  %v2812_v25 = vadd.f32 %v2804_v29, %v2748_v12  ;;  %1929 = vmatprep.mubr.bf16.mxu1 %v5399_v55 }
 0x537   : > { %v4689_v31 = vadd.f32 %v2867_v15, %v2811_v48  ;;  %v4691_v52 = vadd.f32 %v2868_v41, %v2812_v25 }
 0x53c   : > { %3113 = vmatmul.mubr.msk.bf16.gmra.mxu1 %vm1247_vm1, %v4382_v56 }
 0x53d   : > { %1939 = vmatprep.mubr.bf16.mxu1 %v5399_v55 }
 0x544   : > { %3114 = vmatmul.mubr.msk.bf16.gmra.mxu1 %vm1247_vm1, %v4384_v21 }
 0x545   : > { %1949 = vmatprep.mubr.bf16.mxu1 %v5399_v55 }
 0x54c   : > { %3115 = vmatmul.mubr.msk.bf16.gmra.mxu1 %vm1247_vm1, %v4386_v17 }
 0x54d   : > { %2394 = vmatprep.mubr.bf16.mxu1 %v5399_v55 }
 0x5ec   : > { %v4703_v2 = vpop.f32.mrf.mxu1 }
 0x5ed   : > { %2757 = vrot.lane.b32.xlu0 %v4703_v2, %s5367_s22  ;;  %2437 = vrot.lane.b32.xlu1 %v4703_v2, %s3417_s18 }
 0x5ee   : > { %v4709_v56 = vpop.f32.mrf.mxu1 }
 0x5f0   : > { %v1856_v50 = vpop.f32.mrf.mxu1 }
 0x5f1   : > { %2501 = vrot.lane.b32.xlu1 %v4703_v2, %s3419_s19  ;;  %2765 = vrot.lane.b32.xlu0 %v4709_v56, %s5367_s22 }
 0x5f2   : > { %v1857_v21 = vpop.f32.mrf.mxu1 }
 0x5f4   : > { %v1921_v17 = vpop.f32.mrf.mxu1 }
 0x5f5   : > { %2565 = vrot.lane.b32.xlu1 %v4703_v2, %s3421_s20 }
 0x5f6   : > { %v4717_v16 = vpop.f32.mrf.mxu1 }
 0x5f8   : > { %v1925_v5 = vpop.f32.mrf.mxu1 }
 0x5f9   : > { %2629 = vrot.lane.b32.xlu1 %v4703_v2, %s3423_s21 }
 0x5fa   : > { %v4721_v18 = vpop.f32.mrf.mxu1 }
 0x5fc   : > { %v1931_v35 = vpop.f32.mrf.mxu1 }
 0x5fd   : > { %2693 = vrot.lane.b32.xlu1 %v4703_v2, %s5365_s14  ;;  %v1960_v14 = vmax.f32 %v1921_v17, %v1931_v35 }
 0x5fe   : > { %v4725_v60 = vpop.f32.mrf.mxu1 }
 0x5ff   : > { %v1973_v28 = vmax.f32 %v4717_v16, %v4725_v60 }
 0x600   : > { %v1935_v36 = vpop.f32.mrf.mxu1 }
 0x601   : > { %2821 = vrot.lane.b32.xlu1 %v4703_v2, %s3429_s24  ;;  %v1961_v19 = vmax.f32 %v1925_v5, %v1935_v36 }
 0x602   : > { %v4729_v22 = vpop.f32.mrf.mxu1 }
 0x603   : > { %v1974_v37 = vmax.f32 %v4721_v18, %v4729_v22 }
 0x604   : > { %v1941_v3 = vpop.f32.mrf.mxu1 }
 0x605   : > { %2445 = vrot.lane.b32.xlu1 %v4709_v56, %s3417_s18  ;;  %v1962_v1 = vmax.f32 %v1960_v14, %v1941_v3 }
 0x606   : > { %v4733_v30 = vpop.f32.mrf.mxu1 }
 0x607   : > { %v1975_v57 = vmax.f32 %v1973_v28, %v4733_v30 }
 0x608   : > { %v1945_v23 = vpop.f32.mrf.mxu1 }
 0x609   : > { %2509 = vrot.lane.b32.xlu1 %v4709_v56, %s3419_s19  ;;  %v1963_v6 = vmax.f32 %v1961_v19, %v1945_v23 }
 0x60a   : > { %v4737_v32 = vpop.f32.mrf.mxu1 }
 0x60b   : > { %v1976_v47 = vmax.f32 %v1974_v37, %v4737_v32 }
 0x60c   : > { %v1951_v38 = vpop.f32.mrf.mxu1 }
 0x60d   : > { %2573 = vrot.lane.b32.xlu1 %v4709_v56, %s3421_s20  ;;  %v1964_v62 = vmax.f32 %v1962_v1, %v1951_v38 }
 0x60e   : > { %v4741_v42 = vpop.f32.mrf.mxu1 }
 0x60f   : > { %v1977_v43 = vmax.f32 %v1975_v57, %v4741_v42 }
 0x610   : > { %v1955_v13 = vpop.f32.mrf.mxu1 }
 0x611   : > { %v1965_v44 = vmax.f32 %v1963_v6, %v1955_v13  ;;  %2637 = vrot.lane.b32.xlu1 %v4709_v56, %s3423_s21 }
 0x612   : > { %v4751_v49 = vpop.f32.mrf.mxu1 }
 0x613   : > { %v1966_v40 = vmax.f32 %v1964_v62, %v1965_v44  ;;  %v1978_v39 = vmax.f32 %v1976_v47, %v4751_v49 }
 0x615   : > { %v1967_v8 = vrot.slane %v1966_v40, 4  ;;  %v1979_v4 = vmax.f32 %v1977_v43, %v1978_v39  ;;  %2701 = vrot.lane.b32.xlu1 %v4709_v56, %s5365_s14 }
 0x617   : > { %v1968_v46 = vmax.f32 %v1966_v40, %v1967_v8  ;;  %v1980_v34 = vrot.slane %v1979_v4, 4 }
 0x619   : > { %v1969_v10 = vrot.slane %v1968_v46, 2  ;;  %v1981_v29 = vmax.f32 %v1979_v4, %v1980_v34  ;;  %2829 = vrot.lane.b32.xlu1 %v4709_v56, %s3429_s24 }
 0x61b   : > { %v1970_v45 = vmax.f32 %v1968_v46, %v1969_v10  ;;  %v1982_v24 = vrot.slane %v1981_v29, 2 }
 0x61d   : > { %v1971_v58 = vrot.slane %v1970_v45, 1  ;;  %v1983_v12 = vmax.f32 %v1981_v29, %v1982_v24 }
 0x61f   : > { %v1972_v53 = vmax.f32 %v1970_v45, %v1971_v58  ;;  %v1984_v15 = vrot.slane %v1983_v12, 1 }
 0x621   : > { %v1986_v41 = vsub.f32 %v1921_v17, %v1972_v53  ;;  %v1988_v48 = vsub.f32 %v1925_v5, %v1972_v53  ;;  %v1990_v25 = vsub.f32 %v1931_v35, %v1972_v53  ;;  %v1992_v50 = vsub.f32 %v1935_v36, %v1972_v53 }
 0x622   : > { %v1994_v21 = vsub.f32 %v1941_v3, %v1972_v53  ;;  %v1985_v28 = vmax.f32 %v1983_v12, %v1984_v15  ;;  %v1996_v37 = vsub.f32 %v1945_v23, %v1972_v53  ;;  %v1998_v62 = vsub.f32 %v1951_v38, %v1972_v53 }
 0x623   : > { %v2002_v14 = vmul.f32 1.442695, %v1986_v41  ;;  %v2006_v19 = vmul.f32 1.442695, %v1988_v48  ;;  %v2010_v1 = vmul.f32 1.442695, %v1990_v25  ;;  %v2000_v35 = vsub.f32 %v1955_v13, %v1972_v53 }
 0x624   : > { %v1987_v6 = vsub.f32 %v4717_v16, %v1985_v28  ;;  %v2014_v57 = vmul.f32 1.442695, %v1992_v50  ;;  %v1989_v47 = vsub.f32 %v4721_v18, %v1985_v28  ;;  %v2018_v44 = vmul.f32 1.442695, %v1994_v21 }
 0x625   : > { %3334 = vpow2.f32 %v2002_v14  ;;  %v2022_v17 = vmul.f32 1.442695, %v1996_v37  ;;  %v1991_v5 = vsub.f32 %v4725_v60, %v1985_v28  ;;  %v1993_v3 = vsub.f32 %v4729_v22, %v1985_v28 }
 0x626   : > { %3336 = vpow2.f32 %v2006_v19  ;;  %v2004_v36 = vmul.f32 1.442695, %v1987_v6  ;;  %v2008_v23 = vmul.f32 1.442695, %v1989_v47  ;;  %v2026_v43 = vmul.f32 1.442695, %v1998_v62 }
 0x627   : > { %3338 = vpow2.f32 %v2010_v1  ;;  %v1995_v16 = vsub.f32 %v4733_v30, %v1985_v28  ;;  %v2012_v40 = vmul.f32 1.442695, %v1991_v5  ;;  %v2030_v39 = vmul.f32 1.442695, %v2000_v35 }
 0x628   : > { %3340 = vpow2.f32 %v2014_v57  ;;  %v1997_v18 = vsub.f32 %v4737_v32, %v1985_v28  ;;  %v2016_v38 = vmul.f32 1.442695, %v1993_v3  ;;  %v1999_v60 = vsub.f32 %v4741_v42, %v1985_v28 }
 0x629   : > { %3342 = vpow2.f32 %v2018_v44  ;;  %v2020_v13 = vmul.f32 1.442695, %v1995_v16  ;;  %v2001_v8 = vsub.f32 %v4751_v49, %v1985_v28 }
 0x62a   : > { %3344 = vpow2.f32 %v2022_v17  ;;  %v2024_v4 = vmul.f32 1.442695, %v1997_v18  ;;  %v2028_v34 = vmul.f32 1.442695, %v1999_v60 }
 0x62b   : > { %3346 = vpow2.f32 %v2004_v36  ;;  %v2032_v29 = vmul.f32 1.442695, %v2001_v8 }
 0x62c   : > { %3348 = vpow2.f32 %v2008_v23 }
 0x62d   : > { %3350 = vpow2.f32 %v2026_v43 }
 0x62e   : > { %3352 = vpow2.f32 %v2012_v40 }
 0x62f   : > { %3354 = vpow2.f32 %v2030_v39 }
 0x630   : > { %3356 = vpow2.f32 %v2016_v38 }
 0x631   : > { %3358 = vpow2.f32 %v2020_v13 }
 0x632   : > { %v3335_v22 = vpop.eup %3334  ;;  %3360 = vpow2.f32 %v2024_v4 }
 0x633   : > { %v3337_v46 = vpop.eup %3336  ;;  %3362 = vpow2.f32 %v2028_v34 }
 0x634   : > { %v2034_v30 = vadd.f32 %v3337_v46, %v3335_v22  ;;  %v4767_v10 = vpop.eup %3338  ;;  %3364 = vpow2.f32 %v2032_v29 }
 0x635   : > { %v4770_v45 = vpop.eup %3340 }
 0x636   : > { %v2035_v32 = vadd.f32 %v4767_v10, %v2034_v30  ;;  %v3343_v42 = vpop.eup %3342 }
 0x637   : > { %v3345_v58 = vpop.eup %3344 }
 0x638   : > { %v2036_v24 = vadd.f32 %v4770_v45, %v2035_v32  ;;  %v4773_v49 = vpop.eup %3346 }
 0x639   : > { %v4775_v53 = vpop.eup %3348 }
 0x63a   : > { %v2037_v12 = vadd.f32 %v3343_v42, %v2036_v24  ;;  %v3351_v15 = vpop.eup %3350  ;;  %v2047_v48 = vadd.f32 %v4775_v53, %v4773_v49 }
 0x63b   : > { %v3353_v25 = vpop.eup %3352 }
 0x63c   : > { %v2038_v41 = vadd.f32 %v3345_v58, %v2037_v12  ;;  %v3355_v50 = vpop.eup %3354  ;;  %v2048_v14 = vadd.f32 %v3353_v25, %v2047_v48 }
 0x63d   : > { %v3357_v19 = vpop.eup %3356 }
 0x63e   : > { %v2039_v21 = vadd.f32 %v3351_v15, %v2038_v41  ;;  %v2049_v37 = vadd.f32 %v3357_v19, %v2048_v14  ;;  %v3359_v1 = vpop.eup %3358 }
 0x63f   : > { %v3361_v47 = vpop.eup %3360 }
 0x640   : > { %v2040_v28 = vadd.f32 %v3355_v50, %v2039_v21  ;;  %v2050_v57 = vadd.f32 %v3359_v1, %v2049_v37  ;;  %v3363_v17 = vpop.eup %3362 }
 0x641   : > { %v3365_v36 = vpop.eup %3364 }
 0x642   : > { %v2041_v6 = vrot.slane %v2040_v28, 4  ;;  %v2051_v44 = vadd.f32 %v3361_v47, %v2050_v57 }
 0x644   : > { %v2042_v62 = vadd.f32 %v2041_v6, %v2040_v28  ;;  %v2052_v35 = vadd.f32 %v3363_v17, %v2051_v44 }
 0x646   : > { %v2043_v5 = vrot.slane %v2042_v62, 2  ;;  %v2053_v23 = vadd.f32 %v3365_v36, %v2052_v35 }
 0x648   : > { %v2044_v3 = vadd.f32 %v2043_v5, %v2042_v62  ;;  %v2054_v16 = vrot.slane %v2053_v23, 4 }
 0x64a   : > { %v2045_v43 = vrot.slane %v2044_v3, 1  ;;  %v2055_v39 = vadd.f32 %v2054_v16, %v2053_v23 }
 0x64c   : > { %v2046_v40 = vadd.f32 %v2045_v43, %v2044_v3  ;;  %v2056_v18 = vrot.slane %v2055_v39, 2  ;;  %v5400_v3 = vld [vmem:[#allocation3_spill] sm:$0xff] }
 0x64e   : > { %3366 = vrcp.f32 %v2046_v40  ;;  %v2057_v38 = vadd.f32 %v2056_v18, %v2055_v39 }
 0x650   : > { %v2058_v60 = vrot.slane %v2057_v38, 1 }
 0x652   : > { %v2059_v13 = vadd.f32 %v2058_v60, %v2057_v38 }
 0x654   : > { %3368 = vrcp.f32 %v2059_v13 }
 0x65b   : > { %v3367_v8 = vpop.eup %3366 }
 0x65c   : > { %v2062_v4 = vmul.f32 %v3367_v8, %v3335_v22  ;;  %v2064_v30 = vmul.f32 %v3367_v8, %v3337_v46  ;;  %v2074_v24 = vmul.f32 %v3367_v8, %v3351_v15  ;;  %v2076_v12 = vmul.f32 %v3367_v8, %v3355_v50 }
 0x65d   : > { %v2070_v57 = vmul.f32 %v3367_v8, %v3343_v42  ;;  %v2072_v62 = vmul.f32 %v3367_v8, %v3345_v58  ;;  %v2066_v15 = vmul.f32 %v3367_v8, %v4767_v10  ;;  %v2068_v50 = vmul.f32 %v3367_v8, %v4770_v45  ;;  %v1235_v58 = vld [vmem:[%s5269_s10 + $0x30] sm:$0xff] }
 0x65e   : > { %v2079_v32 = vpack.c.bf16 %v2064_v30, %v2062_v4  ;;  %v2085_v6 = vpack.c.bf16 %v2076_v12, %v2074_v24  ;;  %v1018_v10 = vld [vmem:[%s5266_s7 + $0x10] sm:$0xff]  ;;  %v5404_v4 = vld [vmem:[#allocation14_spill] sm:$0xff] }
 0x65f   : > { %v2438_v34 = vpop.permute.xlu1 %2437  ;;  %v2083_v46 = vpack.c.bf16 %v2072_v62, %v2070_v57  ;;  %v2081_v45 = vpack.c.bf16 %v2068_v50, %v2066_v15  ;;  %v1079_v23 = vadd.f32 %v5400_v3, %v1018_v10  ;;  %v2758_v8 = vpop.permute.xlu0 %2757  ;;  %v2430_v30 = vmul.f32 %v5404_v4, %v4709_v56 }
 0x661   : > { %v3369_v29 = vpop.eup %3368  ;;  %v2078_v39 = vpack.c.bf16 %v1079_v23, %v1079_v23 }
 0x662   : > { %v2075_v48 = vmul.f32 %v3369_v29, %v3363_v17  ;;  %v2077_v21 = vmul.f32 %v3369_v29, %v3365_v36  ;;  %v2071_v14 = vmul.f32 %v3369_v29, %v3359_v1  ;;  %v2073_v28 = vmul.f32 %v3369_v29, %v3361_v47 }
 0x663   : > { %v2502_v41 = vpop.permute.xlu1 %2501  ;;  %v2067_v35 = vmul.f32 %v3369_v29, %v3353_v25  ;;  %v2069_v22 = vmul.f32 %v3369_v29, %v3357_v19  ;;  %v2063_v47 = vmul.f32 %v3369_v29, %v4773_v49  ;;  %v2065_v42 = vmul.f32 %v3369_v29, %v4775_v53  ;;  %v1236_v25 = vld [vmem:[%s5269_s10 + $0x38] sm:$0xff] }
 0x664   : > { %v2086_v37 = vpack.c.bf16 %v2077_v21, %v2075_v48  ;;  %v2084_v5 = vpack.c.bf16 %v2073_v28, %v2071_v14  ;;  %v1310_v49 = vadd.f32 %v4402_v11, %v1235_v58  ;;  %v1312_v53 = vadd.f32 %v4406_v20, %v1236_v25 }
 0x665   : > { %v2082_v1 = vpack.c.bf16 %v2069_v22, %v2067_v35  ;;  %v2080_v36 = vpack.c.bf16 %v2065_v42, %v2063_v47  ;;  %v2766_v22 = vpop.permute.xlu0 %2765  ;;  %v5413_v42 = vld [vmem:[#allocation21_spill] sm:$0xff] }
 0x666   : > { %2098 = vmatprep.subr.bf16.mxu0 %v2086_v37  ;;  %v2131_v16 = vpack.c.bf16 %v1310_v49, %v1310_v49  ;;  %v2132_v40 = vpack.c.bf16 %v1312_v53, %v1312_v53  ;;  %v5409_v37 = vld [vmem:[#allocation19_spill] sm:$0xff] }
 0x667   : > { %v2566_v44 = vpop.permute.xlu1 %2565  ;;  %2099 = vmatpush1.bf16.msra.mxu0 %v2085_v6 }
 0x668   : > { %2100 = vmatprep.subr.bf16.mxu0 %v2084_v5  ;;  %v2154_v38 = vsel %vm1254_vm6, %v2131_v16, 0 }
 0x66b   : > { %v4781_v17 = vpop.permute.xlu1 %2629  ;;  %2101 = vmatpush1.bf16.msra.mxu0 %v2083_v46  ;;  %v5410_v46 = vld [vmem:[#allocation5_spill] sm:$0xff] }
 0x66c   : > { %2102 = vmatprep.subr.bf16.mxu0 %v2082_v1 }
 0x66f   : > { %v4794_v19 = vpop.permute.xlu1 %2693  ;;  %2103 = vmatpush1.bf16.msra.mxu0 %v2081_v45 }
 0x670   : > { %2104 = vmatprep.subr.bf16.mxu0 %v2080_v36 }
 0x673   : > { %v4799_v43 = vpop.permute.xlu1 %2821  ;;  %2105 = vmatpush1.bf16.msra.mxu0 %v2079_v32  ;;  %v5405_v32 = vld [vmem:[#allocation18_spill] sm:$0xff] }
 0x674   : > { %3117 = vmatprep.subr.msk.bf16.mxu0 %vm1254_vm6, %v2132_v40  ;;  %vm5406_vm6 = vcmp.lt.s32.totalorder %v3740_v51, 16  ;;  %v5418_v40 = vld [vmem:[#allocation24_spill] sm:$0xff] }
 0x675   : > { %vm5407_vm0 = vmmov %vm5406_vm6 }
 0x676   : > { %3116 = vmatmul.mubr.msk.bf16.vlgmr.msra.gmra.mxu0 %vm5401_vm10, %v2078_v39  ;;  %vm5408_vm10 = vcmp.ge.s32.totalorder %v3740_v51, 16 }
 0x677   : > { %v2446_v18 = vpop.permute.xlu1 %2445  ;;  %2174 = vmatpush1.bf16.msra.mxu0 %v2154_v38  ;;  %2191 = vmatprep.mubr.bf16.mxu0 %v5399_v55 }
 0x678   : > { %v2452_v11 = vsel %vm5402_vm11, %v2438_v34, %v2446_v18  ;;  %v2456_v20 = vsel %vm5403_vm5, %v2446_v18, %v2438_v34  ;;  %v2429_v34 = vmul.f32 %v5404_v4, %v4703_v2  ;;  %vm5411_vm11 = vcmp.lt.s32.totalorder %v3740_v51, 15 }
 0x679   : > { %v2461_v60 = vsel %vm3767_vm3, %v2456_v20, 0.0  ;;  %v2462_v13 = vsel %vm3773_vm4, %v2452_v11, 0.0  ;;  %vm5412_vm5 = vmmov %vm5411_vm11 }
 0x67a   : > { %v2485_v29 = vmul.f32 %v5405_v32, %v2461_v60  ;;  %v2486_v24 = vmul.f32 %v5405_v32, %v2462_v13  ;;  %v5419_v60 = vld [vmem:[#allocation6_spill] sm:$0xff] }
 0x67b   : > { %v2510_v12 = vpop.permute.xlu1 %2509 }
 0x67c   : > { %v2494_v48 = vadd.f32 %v2486_v24, %v2430_v30  ;;  %v2516_v21 = vsel %vm5406_vm6, %v2502_v41, %v2510_v12  ;;  %v2520_v14 = vsel %vm5407_vm0, %v2510_v12, %v2502_v41  ;;  %v2493_v57 = vadd.f32 %v2485_v29, %v2429_v34  ;;  %v5422_v29 = vld [vmem:[#allocation27_spill] sm:$0xff]  ;;  %v5423_v34 = vld [vmem:[#allocation30_spill] sm:$0xff] }
 0x67d   : > { %v2525_v28 = vsel %vm5408_vm10, %v2520_v14, 0.0  ;;  %v2550_v6 = vmul.f32 %v5409_v37, %v2516_v21  ;;  %vm5414_vm6 = vcmp.lt.s32.totalorder %v3740_v51, 113  ;;  %vm5416_vm10 = vcmp.lt.s32.totalorder %v3740_v51, 1 }
 0x67e   : > { %v2549_v62 = vmul.f32 %v5409_v37, %v2525_v28  ;;  %3118 = vmatmul.mubr.msk.bf16.vlgmr.msra.gmra.mxu0 %vm1247_vm1, %v5410_v46  ;;  %v2772_v10 = vsel %vm5414_vm6, %v2758_v8, %v2766_v22  ;;  %vm5415_vm0 = vmmov %vm5414_vm6 }
 0x67f   : > { %v2558_v5 = vadd.f32 %v2550_v6, %v2494_v48  ;;  %v2574_v35 = vpop.permute.xlu1 %2573  ;;  %2201 = vmatprep.mubr.bf16.mxu0 %v5399_v55  ;;  %v2776_v45 = vsel %vm5415_vm0, %v2766_v22, %v2758_v8  ;;  %v2781_v38 = vsel %vm3757_vm2, %v2772_v10, 0.0  ;;  %vm5429_vm0 = vcmp.lt.s32.totalorder %v3740_v51, 17 }
 0x680   : > { %v2557_v15 = vadd.f32 %v2549_v62, %v2493_v57  ;;  %v2580_v50 = vsel %vm5411_vm11, %v2566_v44, %v2574_v35  ;;  %v2584_v41 = vsel %vm5412_vm5, %v2574_v35, %v2566_v44  ;;  %vm5417_vm11 = vmmov %vm5416_vm10  ;;  %v2782_v11 = vsel %vm3940_vm15, %v2776_v45, 0.0  ;;  %v5424_v62 = vld [vmem:[#allocation33_spill] sm:$0xff] }
 0x681   : > { %v2589_v1 = vsel %vm3833_vm9, %v2584_v41, 0.0  ;;  %v2590_v47 = vsel %vm3805_vm8, %v2580_v50, 0.0  ;;  %vm5420_vm5 = vcmp.lt.s32.totalorder %v3740_v51, 127  ;;  %v2805_v48 = vmul.f32 %v5423_v34, %v2781_v38 }
 0x682   : > { %v2613_v58 = vmul.f32 %v5413_v42, %v2589_v1  ;;  %v2614_v25 = vmul.f32 %v5413_v42, %v2590_v47  ;;  %vm5421_vm6 = vmmov %vm5420_vm5  ;;  %v2806_v21 = vmul.f32 %v5423_v34, %v2782_v11  ;;  %v5426_v1 = vld [vmem:[#allocation8_spill] sm:$0xff] }
 0x683   : > { %v2638_v49 = vpop.permute.xlu1 %2637 }
 0x684   : > { %v2621_v44 = vadd.f32 %v2613_v58, %v2557_v15  ;;  %v2622_v53 = vadd.f32 %v2614_v25, %v2558_v5  ;;  %v2644_v36 = vsel %vm5416_vm10, %v4781_v17, %v2638_v49  ;;  %v2648_v3 = vsel %vm5417_vm11, %v2638_v49, %v4781_v17  ;;  %v5425_v15 = vld [vmem:[#allocation7_spill] sm:$0xff]  ;;  %vm5430_vm10 = vmmov %vm5429_vm0 }
 0x685   : > { %v2653_v23 = vsel %vm3757_vm2, %v2648_v3, 0.0  ;;  %v2654_v16 = vsel %vm3773_vm4, %v2644_v36, 0.0  ;;  %vm5432_vm11 = vcmp.lt.s32.totalorder %v3740_v51, 16 }
 0x686   : > { %v2677_v39 = vmul.f32 %v5418_v40, %v2653_v23  ;;  %v2678_v18 = vmul.f32 %v5418_v40, %v2654_v16  ;;  %3119 = vmatmul.mubr.msk.bf16.gmra.mxu0 %vm1247_vm1, %v5419_v60 }
 0x687   : > { %v2702_v20 = vpop.permute.xlu1 %2701  ;;  %2211 = vmatprep.mubr.bf16.mxu0 %v5399_v55 }
 0x688   : > { %v2685_v17 = vadd.f32 %v2677_v39, %v2621_v44  ;;  %v2686_v13 = vadd.f32 %v2678_v18, %v2622_v53  ;;  %v2708_v8 = vsel %vm5420_vm5, %v4794_v19, %v2702_v20  ;;  %v2712_v4 = vsel %vm5421_vm6, %v2702_v20, %v4794_v19  ;;  %vm5433_vm5 = vmmov %vm5432_vm11 }
 0x689   : > { %v2717_v30 = vsel %vm3795_vm7, %v2708_v8, 0.0  ;;  %v2718_v32 = vsel %vm3805_vm8, %v2712_v4, 0.0  ;;  %vm5435_vm6 = vcmp.lt.s32.totalorder %v3740_v51, 15 }
 0x68a   : > { %v2741_v24 = vmul.f32 %v5422_v29, %v2717_v30  ;;  %v2742_v12 = vmul.f32 %v5422_v29, %v2718_v32 }
 0x68b   : > { %v2830_v14 = vpop.permute.xlu1 %2829 }
 0x68c   : > { %v2749_v28 = vadd.f32 %v2741_v24, %v2685_v17  ;;  %v2750_v37 = vadd.f32 %v2742_v12, %v2686_v13  ;;  %v2836_v19 = vsel %vm731_vm14, %v4799_v43, %v2830_v14  ;;  %v2840_v6 = vsel %vm731_vm14, %v2830_v14, %v4799_v43 }
 0x68d   : > { %v2846_v57 = vsel %vm696_vm13, %v2840_v6, 0.0  ;;  %v2869_v5 = vmul.f32 %v5424_v62, %v2836_v19 }
 0x68e   : > { %v2813_v35 = vadd.f32 %v2805_v48, %v2749_v28  ;;  %v2814_v22 = vadd.f32 %v2806_v21, %v2750_v37  ;;  %v2870_v46 = vmul.f32 %v5424_v62, %v2846_v57  ;;  %3120 = vmatmul.mubr.msk.bf16.gmra.mxu0 %vm1247_vm1, %v5425_v15 }
 0x68f   : > { %2221 = vmatprep.mubr.bf16.mxu0 %v5399_v55 }
 0x690   : > { %v4889_v50 = vadd.f32 %v2869_v5, %v2813_v35  ;;  %v4891_v41 = vadd.f32 %v2870_v46, %v2814_v22 }
 0x696   : > { %3121 = vmatmul.mubr.msk.bf16.gmra.mxu0 %vm1247_vm1, %v5426_v1  ;;  %vm5428_vm1 = vcmask 523264  }
 0x736   : > { %v4896_v43 = vpop.f32.mrf.mxu0 }
 0x737   : > { %2631 = vrot.lane.b32.xlu1 %v4896_v43, %s3423_s21  ;;  %2439 = vrot.lane.b32.xlu0 %v4896_v43, %s3417_s18 }
 0x738   : > { %v4902_v47 = vpop.f32.mrf.mxu0 }
 0x73a   : > { %v2128_v42 = vpop.f32.mrf.mxu0 }
 0x73b   : > { %2887 = vrot.lane.b32.xlu1 %v4896_v43, %s3430_s27  ;;  %2503 = vrot.lane.b32.xlu0 %v4896_v43, %s3419_s19 }
 0x73c   : > { %v2129_v58 = vpop.f32.mrf.mxu0 }
 0x73e   : > { %v2193_v25 = vpop.f32.mrf.mxu0 }
 0x73f   : > { %2567 = vrot.lane.b32.xlu0 %v4896_v43, %s3421_s20  ;;  %2895 = vrot.lane.b32.xlu1 %v4902_v47, %s3430_s27 }
 0x740   : > { %v4912_v10 = vpop.f32.mrf.mxu0 }
 0x742   : > { %v2197_v45 = vpop.f32.mrf.mxu0 }
 0x743   : > { %2695 = vrot.lane.b32.xlu0 %v4896_v43, %s5365_s14 }
 0x744   : > { %v4916_v49 = vpop.f32.mrf.mxu0 }
 0x746   : > { %v2203_v44 = vpop.f32.mrf.mxu0 }
 0x747   : > { %2759 = vrot.lane.b32.xlu0 %v4896_v43, %s5367_s22  ;;  %v2232_v38 = vmax.f32 %v2193_v25, %v2203_v44 }
 0x748   : > { %v4920_v53 = vpop.f32.mrf.mxu0 }
 0x749   : > { %v2245_v60 = vmax.f32 %v4912_v10, %v4920_v53 }
 0x74a   : > { %v2207_v36 = vpop.f32.mrf.mxu0 }
 0x74b   : > { %2823 = vrot.lane.b32.xlu0 %v4896_v43, %s3429_s24  ;;  %v2233_v11 = vmax.f32 %v2197_v45, %v2207_v36 }
 0x74c   : > { %v4924_v3 = vpop.f32.mrf.mxu0 }
 0x74d   : > { %v2246_v17 = vmax.f32 %v4916_v49, %v4924_v3 }
 0x74e   : > { %v2213_v23 = vpop.f32.mrf.mxu0 }
 0x74f   : > { %2447 = vrot.lane.b32.xlu0 %v4902_v47, %s3417_s18  ;;  %v2234_v13 = vmax.f32 %v2232_v38, %v2213_v23 }
 0x750   : > { %v4928_v16 = vpop.f32.mrf.mxu0 }
 0x751   : > { %v2247_v30 = vmax.f32 %v2245_v60, %v4928_v16 }
 0x752   : > { %v2217_v40 = vpop.f32.mrf.mxu0 }
 0x753   : > { %2511 = vrot.lane.b32.xlu0 %v4902_v47, %s3419_s19  ;;  %v2235_v8 = vmax.f32 %v2233_v11, %v2217_v40 }
 0x754   : > { %v4932_v39 = vpop.f32.mrf.mxu0 }
 0x755   : > { %v2248_v32 = vmax.f32 %v2246_v17, %v4932_v39 }
 0x756   : > { %v2223_v18 = vpop.f32.mrf.mxu0 }
 0x757   : > { %2575 = vrot.lane.b32.xlu0 %v4902_v47, %s3421_s20  ;;  %v2236_v29 = vmax.f32 %v2234_v13, %v2223_v18 }
 0x758   : > { %v4936_v20 = vpop.f32.mrf.mxu0 }
 0x759   : > { %v2249_v34 = vmax.f32 %v2247_v30, %v4936_v20 }
 0x75a   : > { %v2227_v4 = vpop.f32.mrf.mxu0 }
 0x75b   : > { %v2237_v24 = vmax.f32 %v2235_v8, %v2227_v4  ;;  %2639 = vrot.lane.b32.xlu0 %v4902_v47, %s3423_s21 }
 0x75c   : > { %v4946_v12 = vpop.f32.mrf.mxu0 }
 0x75d   : > { %v2238_v48 = vmax.f32 %v2236_v29, %v2237_v24  ;;  %v2250_v21 = vmax.f32 %v2248_v32, %v4946_v12 }
 0x75f   : > { %v2239_v14 = vrot.slane %v2238_v48, 4  ;;  %v2251_v28 = vmax.f32 %v2249_v34, %v2250_v21  ;;  %2703 = vrot.lane.b32.xlu0 %v4902_v47, %s5365_s14 }
 0x761   : > { %v2240_v37 = vmax.f32 %v2238_v48, %v2239_v14  ;;  %v2252_v19 = vrot.slane %v2251_v28, 4 }
 0x763   : > { %v2241_v6 = vrot.slane %v2240_v37, 2  ;;  %v2253_v57 = vmax.f32 %v2251_v28, %v2252_v19  ;;  %2767 = vrot.lane.b32.xlu0 %v4902_v47, %s5367_s22 }
 0x765   : > { %v2242_v62 = vmax.f32 %v2240_v37, %v2241_v6  ;;  %v2254_v5 = vrot.slane %v2253_v57, 2 }
 0x767   : > { %v2243_v35 = vrot.slane %v2242_v62, 1  ;;  %v2255_v22 = vmax.f32 %v2253_v57, %v2254_v5  ;;  %2831 = vrot.lane.b32.xlu0 %v4902_v47, %s3429_s24 }
 0x769   : > { %v2244_v46 = vmax.f32 %v2242_v62, %v2243_v35  ;;  %v2256_v15 = vrot.slane %v2255_v22, 1 }
 0x76b   : > { %v2258_v1 = vsub.f32 %v2193_v25, %v2244_v46  ;;  %v2260_v42 = vsub.f32 %v2197_v45, %v2244_v46  ;;  %v2262_v58 = vsub.f32 %v2203_v44, %v2244_v46  ;;  %v2264_v38 = vsub.f32 %v2207_v36, %v2244_v46 }
 0x76c   : > { %v2266_v11 = vsub.f32 %v2213_v23, %v2244_v46  ;;  %v2257_v13 = vmax.f32 %v2255_v22, %v2256_v15  ;;  %v2268_v8 = vsub.f32 %v2217_v40, %v2244_v46  ;;  %v2270_v34 = vsub.f32 %v2223_v18, %v2244_v46 }
 0x76d   : > { %v2274_v60 = vmul.f32 1.442695, %v2258_v1  ;;  %v2278_v17 = vmul.f32 1.442695, %v2260_v42  ;;  %v2282_v30 = vmul.f32 1.442695, %v2262_v58  ;;  %v2272_v44 = vsub.f32 %v2227_v4, %v2244_v46 }
 0x76e   : > { %v2259_v32 = vsub.f32 %v4912_v10, %v2257_v13  ;;  %v2286_v29 = vmul.f32 1.442695, %v2264_v38  ;;  %v2261_v24 = vsub.f32 %v4916_v49, %v2257_v13  ;;  %v2290_v48 = vmul.f32 1.442695, %v2266_v11 }
 0x76f   : > { %3370 = vpow2.f32 %v2274_v60  ;;  %v2294_v25 = vmul.f32 1.442695, %v2268_v8  ;;  %v2263_v45 = vsub.f32 %v4920_v53, %v2257_v13  ;;  %v2265_v23 = vsub.f32 %v4924_v3, %v2257_v13 }
 0x770   : > { %3372 = vpow2.f32 %v2278_v17  ;;  %v2276_v36 = vmul.f32 1.442695, %v2259_v32  ;;  %v2280_v40 = vmul.f32 1.442695, %v2261_v24  ;;  %v2298_v21 = vmul.f32 1.442695, %v2270_v34 }
 0x771   : > { %3374 = vpow2.f32 %v2282_v30  ;;  %v2267_v10 = vsub.f32 %v4928_v16, %v2257_v13  ;;  %v2284_v14 = vmul.f32 1.442695, %v2263_v45  ;;  %v2302_v28 = vmul.f32 1.442695, %v2272_v44 }
 0x772   : > { %3376 = vpow2.f32 %v2286_v29  ;;  %v2269_v49 = vsub.f32 %v4932_v39, %v2257_v13  ;;  %v2288_v18 = vmul.f32 1.442695, %v2265_v23  ;;  %v2271_v53 = vsub.f32 %v4936_v20, %v2257_v13 }
 0x773   : > { %3378 = vpow2.f32 %v2290_v48  ;;  %v2292_v4 = vmul.f32 1.442695, %v2267_v10  ;;  %v2273_v37 = vsub.f32 %v4946_v12, %v2257_v13 }
 0x774   : > { %3380 = vpow2.f32 %v2294_v25  ;;  %v2296_v19 = vmul.f32 1.442695, %v2269_v49  ;;  %v2300_v57 = vmul.f32 1.442695, %v2271_v53 }
 0x775   : > { %3382 = vpow2.f32 %v2276_v36  ;;  %v2304_v5 = vmul.f32 1.442695, %v2273_v37 }
 0x776   : > { %3384 = vpow2.f32 %v2280_v40 }
 0x777   : > { %3386 = vpow2.f32 %v2298_v21 }
 0x778   : > { %3388 = vpow2.f32 %v2284_v14 }
 0x779   : > { %3390 = vpow2.f32 %v2302_v28 }
 0x77a   : > { %3392 = vpow2.f32 %v2288_v18 }
 0x77b   : > { %3394 = vpow2.f32 %v2292_v4 }
 0x77c   : > { %v3371_v3 = vpop.eup %3370  ;;  %3396 = vpow2.f32 %v2296_v19 }
 0x77d   : > { %v3373_v6 = vpop.eup %3372  ;;  %3398 = vpow2.f32 %v2300_v57 }
 0x77e   : > { %v2306_v16 = vadd.f32 %v3373_v6, %v3371_v3  ;;  %v4964_v62 = vpop.eup %3374  ;;  %3400 = vpow2.f32 %v2304_v5 }
 0x77f   : > { %v4967_v35 = vpop.eup %3376 }
 0x780   : > { %v2307_v39 = vadd.f32 %v4964_v62, %v2306_v16  ;;  %v3379_v20 = vpop.eup %3378 }
 0x781   : > { %v3381_v46 = vpop.eup %3380 }
 0x782   : > { %v2308_v22 = vadd.f32 %v4967_v35, %v2307_v39  ;;  %v3383_v12 = vpop.eup %3382 }
 0x783   : > { %v3385_v1 = vpop.eup %3384 }
 0x784   : > { %v2309_v15 = vadd.f32 %v3379_v20, %v2308_v22  ;;  %v3387_v42 = vpop.eup %3386  ;;  %v2319_v38 = vadd.f32 %v3385_v1, %v3383_v12 }
 0x785   : > { %v3389_v11 = vpop.eup %3388 }
 0x786   : > { %v2310_v58 = vadd.f32 %v3381_v46, %v2309_v15  ;;  %v3391_v60 = vpop.eup %3390  ;;  %v2320_v13 = vadd.f32 %v3389_v11, %v2319_v38 }
 0x787   : > { %v3393_v8 = vpop.eup %3392 }
 0x788   : > { %v2311_v17 = vadd.f32 %v3387_v42, %v2310_v58  ;;  %v2321_v32 = vadd.f32 %v3393_v8, %v2320_v13  ;;  %v3395_v29 = vpop.eup %3394 }
 0x789   : > { %v3397_v48 = vpop.eup %3396 }
 0x78a   : > { %v2312_v30 = vadd.f32 %v3391_v60, %v2311_v17  ;;  %v2322_v34 = vadd.f32 %v3395_v29, %v2321_v32  ;;  %v3399_v44 = vpop.eup %3398 }
 0x78b   : > { %v3401_v40 = vpop.eup %3400 }
 0x78c   : > { %v2313_v24 = vrot.slane %v2312_v30, 4  ;;  %v2323_v45 = vadd.f32 %v3397_v48, %v2322_v34 }
 0x78e   : > { %v2314_v25 = vadd.f32 %v2313_v24, %v2312_v30  ;;  %v2324_v23 = vadd.f32 %v3399_v44, %v2323_v45 }
 0x790   : > { %v2315_v36 = vrot.slane %v2314_v25, 2  ;;  %v2325_v10 = vadd.f32 %v3401_v40, %v2324_v23 }
 0x792   : > { %v2316_v21 = vadd.f32 %v2315_v36, %v2314_v25  ;;  %v2326_v28 = vrot.slane %v2325_v10, 4 }
 0x794   : > { %v2317_v14 = vrot.slane %v2316_v21, 1  ;;  %v2327_v18 = vadd.f32 %v2326_v28, %v2325_v10 }
 0x796   : > { %v2318_v49 = vadd.f32 %v2317_v14, %v2316_v21  ;;  %v2328_v53 = vrot.slane %v2327_v18, 2 }
 0x798   : > { %3402 = vrcp.f32 %v2318_v49  ;;  %v2329_v4 = vadd.f32 %v2328_v53, %v2327_v18 }
 0x79a   : > { %v2330_v37 = vrot.slane %v2329_v4, 1 }
 0x79c   : > { %v2331_v19 = vadd.f32 %v2330_v37, %v2329_v4 }
 0x79e   : > { %3404 = vrcp.f32 %v2331_v19 }
 0x7a5   : > { %v3403_v16 = vpop.eup %3402 }
 0x7a6   : > { %v2334_v57 = vmul.f32 %v3403_v16, %v3371_v3  ;;  %v2336_v39 = vmul.f32 %v3403_v16, %v3373_v6  ;;  %v2346_v15 = vmul.f32 %v3403_v16, %v3387_v42  ;;  %v2348_v58 = vmul.f32 %v3403_v16, %v3391_v60 }
 0x7a7   : > { %v2342_v34 = vmul.f32 %v3403_v16, %v3379_v20  ;;  %v2344_v25 = vmul.f32 %v3403_v16, %v3381_v46  ;;  %v2338_v6 = vmul.f32 %v3403_v16, %v4964_v62  ;;  %v2340_v42 = vmul.f32 %v3403_v16, %v4967_v35  ;;  %v1019_v20 = vld [vmem:[%s5266_s7 + $0x18] sm:$0xff] }
 0x7a8   : > { %v2351_v5 = vpack.c.bf16 %v2336_v39, %v2334_v57  ;;  %v2357_v24 = vpack.c.bf16 %v2348_v58, %v2346_v15 }
 0x7a9   : > { %v2355_v3 = vpack.c.bf16 %v2344_v25, %v2342_v34  ;;  %v2353_v46 = vpack.c.bf16 %v2340_v42, %v2338_v6  ;;  %v2632_v14 = vpop.permute.xlu1 %2631  ;;  %v5434_v25 = vld [vmem:[#allocation9_spill] sm:$0xff] }
 0x7ab   : > { %v3405_v22 = vpop.eup %3404 }
 0x7ac   : > { %v2347_v38 = vmul.f32 %v3405_v22, %v3399_v44  ;;  %v2349_v17 = vmul.f32 %v3405_v22, %v3401_v40  ;;  %v2343_v13 = vmul.f32 %v3405_v22, %v3395_v29  ;;  %v2345_v30 = vmul.f32 %v3405_v22, %v3397_v48 }
 0x7ad   : > { %v2339_v36 = vmul.f32 %v3405_v22, %v3389_v11  ;;  %v2341_v23 = vmul.f32 %v3405_v22, %v3393_v8  ;;  %v2335_v44 = vmul.f32 %v3405_v22, %v3383_v12  ;;  %v2337_v40 = vmul.f32 %v3405_v22, %v3385_v1  ;;  %v5427_v11 = vld [vmem:[#allocation4_spill] sm:$0xff]  ;;  %v2888_v49 = vpop.permute.xlu1 %2887 }
 0x7ae   : > { %v2358_v32 = vpack.c.bf16 %v2349_v17, %v2347_v38  ;;  %v2356_v45 = vpack.c.bf16 %v2345_v30, %v2343_v13  ;;  %v1082_v8 = vadd.f32 %v5427_v11, %v1019_v20  ;;  %v5431_v13 = vld [vmem:[#allocation11_spill] sm:$0xff] }
 0x7af   : > { %v2354_v60 = vpack.c.bf16 %v2341_v23, %v2339_v36  ;;  %v2352_v29 = vpack.c.bf16 %v2337_v40, %v2335_v44  ;;  %v5438_v40 = vld [vmem:[#allocation12_spill] sm:$0xff] }
 0x7b0   : > { %2370 = vmatprep.subr.bf16.mxu1 %v2358_v32  ;;  %v2350_v48 = vpack.c.bf16 %v1082_v8, %v1082_v8 }
 0x7b1   : > { %2371 = vmatpush1.bf16.msra.mxu1 %v2357_v24  ;;  %v2896_v53 = vpop.permute.xlu1 %2895 }
 0x7b2   : > { %2372 = vmatprep.subr.bf16.mxu1 %v2356_v45  ;;  %v2432_v45 = vmul.f32 %v5434_v25, %v4902_v47 }
 0x7b5   : > { %2373 = vmatpush1.bf16.msra.mxu1 %v2355_v3 }
 0x7b6   : > { %2374 = vmatprep.subr.bf16.mxu1 %v2354_v60  ;;  %v2431_v60 = vmul.f32 %v5434_v25, %v4896_v43 }
 0x7b9   : > { %2375 = vmatpush1.bf16.msra.mxu1 %v2353_v46 }
 0x7ba   : > { %2376 = vmatprep.subr.bf16.mxu1 %v2352_v29 }
 0x7bd   : > { %2377 = vmatpush1.bf16.msra.mxu1 %v2351_v5 }
 0x7c0   : > { %3122 = vmatmul.mubr.msk.bf16.vlgmr.msra.gmra.mxu1 %vm5428_vm1, %v2350_v48  ;;  %vm5436_vm1 = vmmov %vm5435_vm6 }
 0x7c1   : > { %2988 = vmatprep.mubr.bf16.mxu1 %v5399_v55 }
 0x880   : > { %v4978_v62 = vpop.f32.mrf.mxu1 }
 0x881   : > { %2889 = vrot.lane.b32.xlu0 %v4978_v62, %s3430_s27  ;;  %2441 = vrot.lane.b32.xlu1 %v4978_v62, %s3417_s18 }
 0x882   : > { %v4984_v35 = vpop.f32.mrf.mxu1 }
 0x884   : > { %v2400_v12 = vpop.f32.mrf.mxu1 }
 0x885   : > { %2505 = vrot.lane.b32.xlu1 %v4978_v62, %s3419_s19  ;;  %2897 = vrot.lane.b32.xlu0 %v4984_v35, %s3430_s27 }
 0x886   : > { %v2401_v1 = vpop.f32.mrf.mxu1 }
 0x889   : > { %2569 = vrot.lane.b32.xlu1 %v4978_v62, %s3421_s20  ;;  %2891 = vrot.lane.b32.xlu0 %v4417_v26, %s3430_s27  ;;  %v2440_v26 = vpop.permute.xlu0 %2439 }
 0x88d   : > { %2633 = vrot.lane.b32.xlu1 %v4978_v62, %s3423_s21  ;;  %v2504_v55 = vpop.permute.xlu0 %2503 }
 0x891   : > { %2697 = vrot.lane.b32.xlu1 %v4978_v62, %s5365_s14  ;;  %v2568_v21 = vpop.permute.xlu0 %2567 }
 0x895   : > { %2761 = vrot.lane.b32.xlu1 %v4978_v62, %s5367_s22  ;;  %v2696_v10 = vpop.permute.xlu0 %2695 }
 0x899   : > { %2825 = vrot.lane.b32.xlu1 %v4978_v62, %s3429_s24  ;;  %v5020_v28 = vpop.permute.xlu0 %2759 }
 0x89d   : > { %2449 = vrot.lane.b32.xlu1 %v4984_v35, %s3417_s18  ;;  %v5022_v18 = vpop.permute.xlu0 %2823 }
 0x8a1   : > { %2513 = vrot.lane.b32.xlu1 %v4984_v35, %s3419_s19  ;;  %v2448_v4 = vpop.permute.xlu0 %2447 }
 0x8a2   : > { %v2453_v39 = vsel %vm5429_vm0, %v2440_v26, %v2448_v4  ;;  %v2457_v15 = vsel %vm5430_vm10, %v2448_v4, %v2440_v26  ;;  %vm5437_vm0 = vcmp.ge.s32.totalorder %v3740_v51, 16  ;;  %vm5439_vm10 = vcmp.lt.s32.totalorder %v3740_v51, 1  ;;  %v5442_v26 = vld [vmem:[#allocation15_spill] sm:$0xff] }
 0x8a3   : > { %v2464_v58 = vsel %vm3773_vm4, %v2453_v39, 0.0  ;;  %v2463_v17 = vsel %vm3767_vm3, %v2457_v15, 0.0 }
 0x8a4   : > { %v2488_v30 = vmul.f32 %v5431_v13, %v2464_v58  ;;  %v2487_v6 = vmul.f32 %v5431_v13, %v2463_v17  ;;  %v5446_v13 = vld [vmem:[#allocation20_spill] sm:$0xff] }
 0x8a5   : > { %2577 = vrot.lane.b32.xlu1 %v4984_v35, %s3421_s20  ;;  %v2512_v16 = vpop.permute.xlu0 %2511  ;;  %s5483_s20 = sshll.u32 %s5485_s26, 4 }
 0x8a6   : > { %v2521_v32 = vsel %vm5432_vm11, %v2512_v16, %v2504_v55  ;;  %v2517_v24 = vsel %vm5433_vm5, %v2504_v55, %v2512_v16  ;;  %v2496_v44 = vadd.f32 %v2488_v30, %v2432_v45  ;;  %vm5440_vm11 = vmmov %vm5439_vm10  ;;  %v2495_v12 = vadd.f32 %v2487_v6, %v2431_v60  ;;  %v5448_v45 = vld [vmem:[#allocation23_spill] sm:$0xff] }
 0x8a7   : > { %v2527_v42 = vsel %vm5437_vm0, %v2521_v32, 0.0  ;;  %v2552_v20 = vmul.f32 %v5438_v40, %v2517_v24  ;;  %vm5441_vm5 = vcmp.lt.s32.totalorder %v3740_v51, 127  ;;  %vm5445_vm0 = vcmp.lt.s32.totalorder %v3740_v51, 111 }
 0x8a8   : > { %v2551_v8 = vmul.f32 %v5438_v40, %v2527_v42  ;;  %v5086_v17 = vsel %vm5445_vm0, %v2888_v49, %v2896_v53 }
 0x8a9   : > { %2641 = vrot.lane.b32.xlu1 %v4984_v35, %s3423_s21  ;;  %v2576_v57 = vpop.permute.xlu0 %2575 }
 0x8aa   : > { %v2581_v36 = vsel %vm5435_vm6, %v2568_v21, %v2576_v57  ;;  %v2585_v23 = vsel %vm5436_vm1, %v2576_v57, %v2568_v21  ;;  %v2560_v57 = vadd.f32 %v2552_v20, %v2496_v44  ;;  %vm5443_vm6 = vmmov %vm5441_vm5  ;;  %vm5444_vm1 = vcmp.lt.s32.totalorder %v3740_v51, 17 }
 0x8ab   : > { %v2591_v47 = vsel %vm3833_vm9, %v2585_v23, 0.0  ;;  %v2592_v46 = vsel %vm3805_vm8, %v2581_v36, 0.0 }
 0x8ac   : > { %v2615_v55 = vmul.f32 %v5442_v26, %v2591_v47  ;;  %v2616_v21 = vmul.f32 %v5442_v26, %v2592_v46 }
 0x8ad   : > { %2705 = vrot.lane.b32.xlu1 %v4984_v35, %s5365_s14  ;;  %v2640_v22 = vpop.permute.xlu0 %2639 }
 0x8ae   : > { %v2645_v29 = vsel %vm5439_vm10, %v2632_v14, %v2640_v22  ;;  %v2649_v11 = vsel %vm5440_vm11, %v2640_v22, %v2632_v14  ;;  %v2559_v14 = vadd.f32 %v2551_v8, %v2495_v12  ;;  %vm5447_vm10 = vmmov %vm5444_vm1  ;;  %vm5449_vm11 = vcmp.lt.s32.totalorder %v3740_v51, 16 }
 0x8af   : > { %v2655_v4 = vsel %vm3757_vm2, %v2649_v11, 0.0  ;;  %v2656_v16 = vsel %vm3773_vm4, %v2645_v29, 0.0 }
 0x8b0   : > { %v2679_v30 = vmul.f32 %v5446_v13, %v2655_v4  ;;  %v2680_v32 = vmul.f32 %v5446_v13, %v2656_v16  ;;  %v2623_v25 = vadd.f32 %v2615_v55, %v2559_v14  ;;  %v5457_v4 = vld [vmem:[#allocation10_spill] sm:$0xff] }
 0x8b1   : > { %2769 = vrot.lane.b32.xlu1 %v4984_v35, %s5367_s22  ;;  %v2704_v34 = vpop.permute.xlu0 %2703  ;;  %v2433_v16 = vmul.f32 %v5457_v4, %v4978_v62  ;;  %v5461_v13 = vld [vmem:[#allocation26_spill] sm:$0xff] }
 0x8b2   : > { %v2709_v43 = vsel %vm5441_vm5, %v2696_v10, %v2704_v34  ;;  %v2713_v39 = vsel %vm5443_vm6, %v2704_v34, %v2696_v10  ;;  %v2624_v10 = vadd.f32 %v2616_v21, %v2560_v57  ;;  %vm5450_vm5 = vmmov %vm5445_vm0  ;;  %v2687_v20 = vadd.f32 %v2679_v30, %v2623_v25 }
 0x8b3   : > { %v2719_v22 = vsel %vm3795_vm7, %v2709_v43, 0.0  ;;  %v2720_v34 = vsel %vm3805_vm8, %v2713_v39, 0.0  ;;  %v5102_v60 = vsel %vm5450_vm5, %v2896_v53, %v2888_v49  ;;  %vm5451_vm6 = vcmp.lt.s32.totalorder %v3740_v51, 113  ;;  %v5453_v53 = vld [vmem:[#allocation16_spill] sm:$0xff] }
 0x8b4   : > { %v2743_v36 = vmul.f32 %v5448_v45, %v2719_v22  ;;  %v2688_v47 = vadd.f32 %v2680_v32, %v2624_v10  ;;  %v2744_v49 = vmul.f32 %v5448_v45, %v2720_v34  ;;  %vm5454_vm0 = vcmp.ge.s32.totalorder %v3740_v51, 16 }
 0x8b5   : > { %2833 = vrot.lane.b32.xlu1 %v4984_v35, %s3429_s24  ;;  %v2768_v1 = vpop.permute.xlu0 %2767  ;;  %vm5459_vm5 = vcmp.lt.s32.totalorder %v3740_v51, 1 }
 0x8b6   : > { %v2773_v46 = vsel %vm5451_vm6, %v5020_v28, %v2768_v1  ;;  %v2752_v22 = vadd.f32 %v2744_v49, %v2688_v47 }
 0x8b7   : > { %v2783_v21 = vsel %vm3757_vm2, %v2773_v46, 0.0 }
 0x8b8   : > { %v2807_v30 = vmul.f32 %v5461_v13, %v2783_v21 }
 0x8b9   : > { %2885 = vrot.lane.b32.xlu1 %v4703_v2, %s3430_s27  ;;  %v2832_v23 = vpop.permute.xlu0 %2831 }
 0x8ba   : > { %v2837_v10 = vsel %vm731_vm14, %v5022_v18, %v2832_v23 }
 0x8bd   : > { %2893 = vrot.lane.b32.xlu1 %v4709_v56, %s3430_s27  ;;  %s460_s27 = scalar_lea.vmem %s5272_s13, %s5483_s20 }
 0x8f3   : > { %v2442_v37 = vpop.permute.xlu1 %2441  ;;  %v2890_v43 = vpop.permute.xlu0 %2889 }
 0x8f7   : > { %v5024_v19 = vpop.permute.xlu1 %2505 }
 0x8fb   : > { %v5026_v2 = vpop.permute.xlu1 %2569 }
 0x8ff   : > { %v5028_v56 = vpop.permute.xlu1 %2633 }
 0x903   : > { %v5032_v5 = vpop.permute.xlu1 %2697 }
 0x907   : > { %v5038_v38 = vpop.permute.xlu1 %2761 }
 0x90b   : > { %v5053_v3 = vpop.permute.xlu1 %2825 }
 0x90f   : > { %v2450_v48 = vpop.permute.xlu1 %2449 }
 0x910   : > { %v2454_v15 = vsel %vm5444_vm1, %v2442_v37, %v2450_v48  ;;  %v2458_v24 = vsel %vm5447_vm10, %v2450_v48, %v2442_v37  ;;  %v2911_v37 = vsel %vm3795_vm7, %v5086_v17, 0.0  ;;  %vm5452_vm1 = vcmp.lt.s32.totalorder %v3740_v51, 15  ;;  %vm5456_vm10 = vmmov %vm5451_vm6 }
 0x911   : > { %v2466_v6 = vsel %vm3773_vm4, %v2454_v15, 0.0  ;;  %v2465_v44 = vsel %vm3767_vm3, %v2458_v24, 0.0  ;;  %vm5455_vm3 = vmmov %vm5452_vm1  ;;  %v2751_v48 = vadd.f32 %v2743_v36, %v2687_v20  ;;  %v2777_v12 = vsel %vm5456_vm10, %v2768_v1, %v5020_v28  ;;  %v5458_v1 = vld [vmem:[#allocation13_spill] sm:$0xff] }
 0x912   : > { %v2490_v11 = vmul.f32 %v5453_v53, %v2466_v6  ;;  %v2489_v26 = vmul.f32 %v5453_v53, %v2465_v44  ;;  %vm5460_vm6 = vmmov %vm5459_vm5  ;;  %v5462_v24 = vld [vmem:[#allocation17_spill] sm:$0xff]  ;;  %v2898_v6 = vpop.permute.xlu0 %2897  ;;  %v5463_v44 = vld [vmem:[#allocation22_spill] sm:$0xff] }
 0x913   : > { %v2514_v58 = vpop.permute.xlu1 %2513 }
 0x914   : > { %v2522_v42 = vsel %vm5449_vm11, %v2514_v58, %v5024_v19  ;;  %v2518_v55 = vsel %vm5449_vm11, %v5024_v19, %v2514_v58  ;;  %v2784_v58 = vsel %vm3940_vm15, %v2777_v12, 0.0  ;;  %v2497_v32 = vadd.f32 %v2489_v26, %v2433_v16  ;;  %v5467_v12 = vld [vmem:[#allocation29_spill] sm:$0xff] }
 0x915   : > { %v2529_v8 = vsel %vm5454_vm0, %v2522_v42, 0.0 }
 0x916   : > { %v2553_v14 = vmul.f32 %v5458_v1, %v2529_v8 }
 0x917   : > { %v2578_v40 = vpop.permute.xlu1 %2577 }
 0x918   : > { %v2586_v29 = vsel %vm5452_vm1, %v2578_v40, %v5026_v2  ;;  %v2582_v61 = vsel %vm5455_vm3, %v5026_v2, %v2578_v40  ;;  %v2434_v2 = vmul.f32 %v5457_v4, %v4984_v35  ;;  %v2554_v35 = vmul.f32 %v5458_v1, %v2518_v55 }
 0x919   : > { %v2593_v57 = vsel %vm3833_vm9, %v2586_v29, 0.0  ;;  %v2594_v39 = vsel %vm3805_vm8, %v2582_v61, 0.0  ;;  %v2561_v42 = vadd.f32 %v2553_v14, %v2497_v32  ;;  %vm5464_vm9 = vcmp.lt.s32.totalorder %v3740_v51, 127  ;;  %v2892_v14 = vpop.permute.xlu0 %2891 }
 0x91a   : > { %v2498_v15 = vadd.f32 %v2490_v11, %v2434_v2  ;;  %v2617_v25 = vmul.f32 %v5462_v24, %v2593_v57  ;;  %v2618_v34 = vmul.f32 %v5462_v24, %v2594_v39  ;;  %vm5465_vm1 = vmmov %vm5464_vm9  ;;  %v5466_v11 = vld [vmem:[#allocation25_spill] sm:$0xff]  ;;  %v2815_v61 = vadd.f32 %v2807_v30, %v2751_v48 }
 0x91b   : > { %v2642_v28 = vpop.permute.xlu1 %2641 }
 0x91c   : > { %v2646_v19 = vsel %vm5459_vm5, %v5028_v56, %v2642_v28  ;;  %v2650_v62 = vsel %vm5460_vm6, %v2642_v28, %v5028_v56  ;;  %v2841_v56 = vsel %vm731_vm14, %v2832_v23, %v5022_v18  ;;  %v2808_v18 = vmul.f32 %v5461_v13, %v2784_v58 }
 0x91d   : > { %v2657_v7 = vsel %vm3757_vm2, %v2650_v62, 0.0  ;;  %v2658_v45 = vsel %vm3773_vm4, %v2646_v19, 0.0  ;;  %v2562_v23 = vadd.f32 %v2554_v35, %v2498_v15  ;;  %v2848_v29 = vsel %vm696_vm13, %v2841_v56, 0.0  ;;  %v5472_v62 = vld [vmem:[#allocation28_spill] sm:$0xff] }
 0x91e   : > { %v2681_v40 = vmul.f32 %v5463_v44, %v2657_v7  ;;  %v2625_v49 = vadd.f32 %v2617_v25, %v2561_v42  ;;  %v2682_v53 = vmul.f32 %v5463_v44, %v2658_v45  ;;  %vm5468_vm4 = vcmp.lt.s32.totalorder %v3740_v51, 111  ;;  %v5478_v44 = vld [vmem:[#allocation34_spill] sm:$0xff] }
 0x91f   : > { %v2706_v36 = vpop.permute.xlu1 %2705  ;;  %v2902_v26 = vsel %vm5468_vm4, %v2890_v43, %v2898_v6  ;;  %v2626_v55 = vadd.f32 %v2618_v34, %v2562_v23  ;;  %v2872_v48 = vmul.f32 %v5467_v12, %v2848_v29  ;;  %vm5471_vm3 = vmmov %vm5468_vm4  ;;  %v2912_v7 = vsel %vm3989_vm12, %v5102_v60, 0.0 }
 0x920   : > { %v2710_v20 = vsel %vm5464_vm9, %v5032_v5, %v2706_v36  ;;  %v2714_v47 = vsel %vm5465_vm1, %v2706_v36, %v5032_v5  ;;  %v2871_v5 = vmul.f32 %v5467_v12, %v2837_v10  ;;  %v2689_v4 = vadd.f32 %v2681_v40, %v2625_v49  ;;  %v5475_v10 = vld [vmem:[#allocation31_spill] sm:$0xff] }
 0x921   : > { %v2721_v63 = vsel %vm3795_vm7, %v2710_v20, 0.0  ;;  %v2722_v46 = vsel %vm3805_vm8, %v2714_v47, 0.0  ;;  %vm5469_vm8 = vmmov %vm5456_vm10  ;;  %v2906_v57 = vsel %vm5471_vm3, %v2898_v6, %v2890_v43  ;;  %v2690_v39 = vadd.f32 %v2682_v53, %v2626_v55  ;;  %v5477_v6 = vld [vmem:[#allocation32_spill] sm:$0xff] }
 0x922   : > { %v2745_v8 = vmul.f32 %v5466_v11, %v2721_v63  ;;  %v2746_v0 = vmul.f32 %v5466_v11, %v2722_v46  ;;  %vm5470_vm0 = vmmov %vm5469_vm8  ;;  %v2816_v58 = vadd.f32 %v2808_v18, %v2752_v22  ;;  %v2879_v13 = vadd.f32 %v2871_v5, %v2815_v61 }
 0x923   : > { %v2770_v21 = vpop.permute.xlu1 %2769  ;;  %v2913_v59 = vsel %vm3795_vm7, %v2902_v26, 0.0  ;;  %v2914_v25 = vsel %vm3989_vm12, %v2906_v57, 0.0  ;;  %v2935_v42 = vmul.f32 %v5477_v6, %v2911_v37  ;;  %v2936_v47 = vmul.f32 %v5477_v6, %v2912_v7  ;;  %v5479_v37 = vld [vmem:[#allocation35_spill] sm:$0xff] }
 0x924   : > { %v2774_v16 = vsel %vm5469_vm8, %v5038_v38, %v2770_v21  ;;  %v2778_v2 = vsel %vm5470_vm0, %v2770_v21, %v5038_v38  ;;  %v2753_v19 = vadd.f32 %v2745_v8, %v2689_v4  ;;  %v2754_v30 = vadd.f32 %v2746_v0, %v2690_v39  ;;  %v5482_v4 = vld [vmem:[#allocation36_spill] sm:$0xff] }
 0x925   : > { %v2785_v28 = vsel %vm3757_vm2, %v2774_v16, 0.0  ;;  %v2786_v1 = vsel %vm3940_vm15, %v2778_v2, 0.0  ;;  %vm5474_vm2 = vmmov %vm5471_vm3  ;;  %v2880_v34 = vadd.f32 %v2872_v48, %v2816_v58  ;;  %v2937_v40 = vmul.f32 %v5478_v44, %v2913_v59 }
 0x926   : > { %v2809_v15 = vmul.f32 %v5472_v62, %v2785_v28  ;;  %v2810_v35 = vmul.f32 %v5472_v62, %v2786_v1  ;;  %v2899_v60 = vsel %vm5474_vm2, %v4591_v9, %v2892_v14  ;;  %vm5476_vm15 = vmmov %vm5474_vm2  ;;  %v2938_v18 = vmul.f32 %v5478_v44, %v2914_v25  ;;  %v2947_v1 = vld [vmem:[%s5271_s12] sm:$0xf] }
 0x927   : > { %v2834_v43 = vpop.permute.xlu1 %2833  ;;  %v2903_v45 = vsel %vm5476_vm15, %v2892_v14, %v4591_v9  ;;  %v2907_v9 = vsel %vm3795_vm7, %v2899_v60, 0.0  ;;  %v2943_v63 = vadd.f32 %v2935_v42, %v2879_v13  ;;  %v2944_v17 = vadd.f32 %v2936_v47, %v2880_v34 }
 0x928   : > { %v2817_v33 = vadd.f32 %v2809_v15, %v2753_v19  ;;  %v2838_v32 = vsel %vm731_vm14, %v5053_v3, %v2834_v43  ;;  %v2842_v24 = vsel %vm731_vm14, %v2834_v43, %v5053_v3  ;;  %v2818_v36 = vadd.f32 %v2810_v35, %v2754_v30  ;;  %vm5481_vm14 = vmmov %vm5474_vm2 }
 0x929   : > { %v2850_v22 = vsel %vm696_vm13, %v2842_v24, 0.0  ;;  %v2873_v56 = vmul.f32 %v5475_v10, %v2838_v32  ;;  %v2908_v46 = vsel %vm3989_vm12, %v2903_v45, 0.0  ;;  %v2931_v53 = vmul.f32 %v5479_v37, %v2907_v9  ;;  %vm5480_vm13 = vmmov %vm5474_vm2 }
 0x92a   : > { %v2874_v3 = vmul.f32 %v5475_v10, %v2850_v22  ;;  %v2932_v61 = vmul.f32 %v5479_v37, %v2908_v46 }
 0x92b   : > { %v2881_v54 = vadd.f32 %v2873_v56, %v2817_v33  ;;  %v2886_v20 = vpop.permute.xlu1 %2885  ;;  %v2939_v2 = vadd.f32 %v2931_v53, %v4689_v31 }
 0x92c   : > { %v2882_v23 = vadd.f32 %v2874_v3, %v2818_v36  ;;  %v2940_v48 = vadd.f32 %v2932_v61, %v4691_v52 }
 0x92d   : > { %v2945_v29 = vadd.f32 %v2937_v40, %v2881_v54 }
 0x92e   : > { %v2946_v49 = vadd.f32 %v2938_v18, %v2882_v23 }
 0x92f   : > { %v2894_v11 = vpop.permute.xlu1 %2893  ;;  %v2950_v8 = vpack.c.bf16 %v2945_v29, %v2943_v63 }
 0x930   : > { %v2900_v12 = vsel %vm5480_vm13, %v2886_v20, %v2894_v11  ;;  %v2904_v5 = vsel %vm5481_vm14, %v2894_v11, %v2886_v20  ;;  %v2951_v26 = vpack.c.bf16 %v2946_v49, %v2944_v17 }
 0x931   : > { %v2909_v55 = vsel %vm3795_vm7, %v2900_v12, 0.0  ;;  %v2910_v21 = vsel %vm3989_vm12, %v2904_v5, 0.0  ;;  %vm2952_vm7 = vcmask 261120  }
 0x932   : > { %v2933_v0 = vmul.f32 %v5482_v4, %v2909_v55  ;;  %v2934_v16 = vmul.f32 %v5482_v4, %v2910_v21  ;;  %2968 = vmatprep.subr.bf16.mxu1 %v2951_v26 }
 0x933   : > { %2969 = vmatpush1.bf16.msra.mxu1 %v2950_v8 }
 0x934   : > { %v2941_v51 = vadd.f32 %v2933_v0, %v4889_v50  ;;  %v2942_v57 = vadd.f32 %v2934_v16, %v4891_v41 }
 0x936   : > { %v2949_v27 = vpack.c.bf16 %v2942_v57, %v2940_v48  ;;  %v2948_v28 = vpack.c.bf16 %v2941_v51, %v2939_v2 }
 0x938   : > { %2970 = vmatprep.subr.bf16.mxu1 %v2949_v27 }
 0x939   : > { %2971 = vmatpush1.bf16.msra.mxu1 %v2948_v28 }
 0x93c   : > { %3123 = vmatmul.mubr.msk.bf16.vlgmr.msra.gmra.mxu1 %vm2952_vm7, %v2947_v1 }
 0x9fc   : > { %v2990_v31 = vpop.f32.mrf.mxu1 }
 0x9fd   : > { %2997 = vst [vmem:[%s460_s27] sm:$0xff] %v2990_v31 }
 0x9fe   : > { %v2992_v52 = vpop.f32.mrf.mxu1 }
 0x9ff   : > { %2998 = vst [vmem:[%s460_s27 + $0x8] sm:$0xff] %v2992_v52 }
 0xa00   : > { %v2994_v50 = vpop.f32.mrf.mxu1 }
 0xa02   : > { %v2995_v41 = vpop.f32.mrf.mxu1 }
 0xa03 PF: > { %s23_s25 = sadd.s32 1, %s3412_s25  }
 0xa04   : > { %p20_p4 = scmp.ge.s32.totalorder %s23_s25, 4  }
 0xa06   :  { %22 = sbr.rel (!%p20_p4) target bundleno = 1 (0x1), region = 105 }

</bundles_post_ra>
